<compile_context>
chip_gen: v7x
topology: tpu7x:2x2x1
jax: 0.10.0
libtpu: 0.0.40
codegen_flags: <defaults>
</compile_context>

<pallas_src>
import math
from functools import partial

import jax
import jax.numpy as jnp
from jax.experimental import pallas as pl
from jax.experimental.pallas import tpu as pltpu


def _vmem_limit_bytes():
    cap = 128 * 1024 * 1024
    try:
        cap = int(pltpu.get_tpu_info().vmem_capacity_bytes)
    except Exception:
        pass
    # Never request all of physical VMEM (v7x: 64 MiB/TC) - leave compiler headroom.
    return int(min(64 * 1024 * 1024, cap * 3 // 4))


_VMEM_LIMIT_BYTES = _vmem_limit_bytes()

# Single-buffer constant-index weight blocks (they are never re-fetched, so double
# buffering only wastes VMEM).  Falls back to default buffering if unsupported.
_SINGLE_BUFFER_WEIGHTS = [hasattr(pl, "Buffered")]


def _const_spec(shape):
    """BlockSpec for an operand whose block is identical for every grid step."""
    index_map = lambda *_: (0,) * len(shape)
    if _SINGLE_BUFFER_WEIGHTS[0]:
        try:
            return pl.BlockSpec(shape, index_map, pipeline_mode=pl.Buffered(1))
        except (TypeError, ValueError):      # pipeline_mode / buffer_count unsupported
            _SINGLE_BUFFER_WEIGHTS[0] = False
    return pl.BlockSpec(shape, index_map)


# ---------------- in-kernel math helpers (f32) ----------------

def _erf(x):
    # Abramowitz-Stegun 7.1.26 (|err| < 1.5e-7); the divide runs on the EUP slot.
    p = 0.3275911
    a1, a2, a3, a4, a5 = 0.254829592, -0.284496736, 1.421413741, -1.453152027, 1.061405429
    sgn = jnp.where(x >= 0.0, 1.0, -1.0)
    ax = jnp.abs(x)
    t = pl.reciprocal(1.0 + p * ax, approx=True)
    poly = ((((a5 * t + a4) * t + a3) * t + a2) * t + a1) * t
    return sgn * (1.0 - poly * jnp.exp(-ax * ax))


def _gelu_exact(x):
    return 0.5 * x * (1.0 + _erf(x * 0.7071067811865476))


def _layer_norm(x, gamma, beta, eps=1e-5):
    mu = jnp.mean(x, axis=-1, keepdims=True)
    var = jnp.maximum(jnp.mean(x * x, axis=-1, keepdims=True) - mu * mu, 0.0)
    return (x - mu) * jax.lax.rsqrt(var + eps) * gamma + beta


def _hardswish(x):
    return x * jnp.clip(x + 3.0, 0.0, 6.0) * (1.0 / 6.0)


def _hardsigmoid(x):
    return jnp.clip(x + 3.0, 0.0, 6.0) * (1.0 / 6.0)


# ---------------- Pallas kernels ----------------

def mlp_kernel(x_ref, w1_ref, b1_ref, w2_ref, b2_ref, o_ref):
    # x_ref: (1, tile_t, inc); w1/w2 pre-transposed to (in, out) and pre-cast to bf16.
    xb = x_ref[0].astype(jnp.bfloat16)
    h = jnp.dot(xb, w1_ref[...], preferred_element_type=jnp.float32) + b1_ref[...]
    h = _gelu_exact(h)                                           # f32 elementwise
    o = jnp.dot(h.astype(jnp.bfloat16), w2_ref[...],
                preferred_element_type=jnp.float32) + b2_ref[...]
    o_ref[0] = o.astype(o_ref.dtype)


def ir_kernel(stride, use_res, Hout, Wout, *refs):
    """One MobileNetV3 InvertedResidual block for one batch element.

    stride 1: refs = (xpad, dw9, ln1_g, ln1_b, se_w1, se_b1, se_w2, se_b2,
                      pw_w, ln2_g, ln2_b, out)
    stride 2: the single xpad ref is replaced by 4 parity planes (ee, eo, oe, oo).
    """
    n_planes = 1 if stride == 1 else 4
    plane_refs = refs[:n_planes]
    (w9_ref, ln1g_ref, ln1b_ref, sw1_ref, sb1_ref, sw2_ref, sb2_ref,
     pww_ref, ln2g_ref, ln2b_ref, o_ref) = refs[n_planes:]
    N = Hout * Wout

    def tap(kh, kw):
        # (Hout, Wout, C) shifted window of the zero-padded input, via static slices.
        if stride == 1:
            return plane_refs[0][0, kh:kh + Hout, kw:kw + Wout, :].astype(jnp.float32)
        sel = ((0, 0), (1, 0), (0, 1))    # tap index -> (parity plane, extra offset)
        rp, ro = sel[kh]
        cp, co = sel[kw]
        pref = plane_refs[rp * 2 + cp]
        return pref[0, ro:ro + Hout, co:co + Wout, :].astype(jnp.float32)

    # Depthwise 3x3 conv (bias=False): unrolled 9-tap accumulate, one live value.
    # The center tap doubles as the stride-1 residual (interior of the padded input).
    center = tap(1, 1)
    acc = center * w9_ref[4, :]
    for k in range(9):
        if k == 4:
            continue
        kh, kw = divmod(k, 3)
        acc = acc + tap(kh, kw) * w9_ref[k, :]

    # Flatten tokens once (free relayout when Wout % 8 == 0); the rest of the block is
    # lane-dense 2-D math and single 2-D MXU matmuls.
    c = acc.shape[-1]
    y = acc.reshape(N, c)

    # LayerNormAct2d (channel norm, no act) + Hardswish.
    yf = _hardswish(_layer_norm(y, ln1g_ref[...], ln1b_ref[...]))            # (N, C)

    # Squeeze-Excitation: global avg pool -> 1x1 conv + ReLU -> 1x1 conv -> Hardsigmoid.
    s = jnp.mean(yf, axis=0, keepdims=True)                                  # (1, C)
    s = jnp.dot(s.astype(jnp.bfloat16), sw1_ref[...],
                preferred_element_type=jnp.float32) + sb1_ref[...]
    s = jnp.maximum(s, 0.0)
    s = jnp.dot(s.astype(jnp.bfloat16), sw2_ref[...],
                preferred_element_type=jnp.float32) + sb2_ref[...]
    yf = yf * _hardsigmoid(s)

    # 1x1 projection conv (bias=False) + LayerNorm (bf16 MXU operands, f32 accumulate).
    z = jnp.dot(yf.astype(jnp.bfloat16), pww_ref[...],
                preferred_element_type=jnp.float32)
    z = _layer_norm(z, ln2g_ref[...], ln2b_ref[...])

    if use_res:
        # Residual == the center conv tap (interior of the padded input): one wide add.
        z = z + center.reshape(N, c)
    o_ref[0] = z.astype(o_ref.dtype)


# ---------------- wrappers (glue) ----------------

def _pick_token_tile(T, max_tile=512):
    # Largest divisor of T that is a multiple of 8 and <= max_tile (big MXU tiles,
    # low per-grid-step overhead); fall back to the whole sequence.
    best = 0
    for cand in range(8, min(T, max_tile) + 1, 8):
        if T % cand == 0:
            best = cand
    return best if best else T


def mlp_forward(x, w1, b1, w2, b2, *, out_dtype=jnp.bfloat16):
    """mlp: Linear -> GELU -> Linear.  Weights already in (in, out) bf16 layout."""
    B, T, inc = x.shape
    ouc = w1.shape[1]
    tile_t = _pick_token_tile(T)
    return pl.pallas_call(
        mlp_kernel,
        out_shape=jax.ShapeDtypeStruct((B, T, ouc), out_dtype),
        grid=(B, T // tile_t),
        in_specs=[
            pl.BlockSpec((1, tile_t, inc), lambda b, t: (b, t, 0)),
            _const_spec((inc, ouc)),
            _const_spec((1, ouc)),
            _const_spec((ouc, ouc)),
            _const_spec((1, ouc)),
        ],
        out_specs=pl.BlockSpec((1, tile_t, ouc), lambda b, t: (b, t, 0)),
        compiler_params=pltpu.CompilerParams(
            dimension_semantics=("parallel", "parallel"),
            vmem_limit_bytes=_VMEM_LIMIT_BYTES),
    )(x, w1, b1, w2, b2)


def inverted_residual(x, p, *, stride, use_res, out_dtype=None):
    """x: (B, H, W, C) NHWC -> (B, Hout*Wout, C) flattened tokens."""
    B, H, W, C = x.shape
    Hout = (H - 1) // stride + 1          # kernel 3, padding 1
    Wout = (W - 1) // stride + 1
    N = Hout * Wout
    Csq = p["se_w1"].shape[1]
    out_dtype = x.dtype if out_dtype is None else out_dtype

    xp = jnp.pad(x, ((0, 0), (1, 1), (1, 1), (0, 0)))       # zero padding = 1
    if stride == 1:
        plane_ops = [xp]
        plane_specs = [pl.BlockSpec((1, H + 2, W + 2, C), lambda b: (b, 0, 0, 0))]
    else:
        assert stride == 2 and H % 2 == 0 and W % 2 == 0
        # Four parity planes of the padded input (total HBM traffic stays ~1x input).
        # TODO(synk): move this parity selection in-kernel (strided slices) or have ir1
        #             emit its output directly in parity layout.
        plane_ops = [xp[:, rp::2, cp::2, :] for rp in (0, 1) for cp in (0, 1)]
        plane_specs = [pl.BlockSpec((1, Hout + 1, Wout + 1, C), lambda b: (b, 0, 0, 0))
                       for _ in range(4)]

    w_ops = [p["dw_w9"], p["ln1_g"], p["ln1_b"], p["se_w1"], p["se_b1"],
             p["se_w2"], p["se_b2"], p["pw_w"], p["ln2_g"], p["ln2_b"]]
    w_specs = [_const_spec((9, C)), _const_spec((1, C)), _const_spec((1, C)),
               _const_spec((C, Csq)), _const_spec((1, Csq)),
               _const_spec((Csq, C)), _const_spec((1, C)),
               _const_spec((C, C)), _const_spec((1, C)), _const_spec((1, C))]

    return pl.pallas_call(
        partial(ir_kernel, stride, use_res, Hout, Wout),
        out_shape=jax.ShapeDtypeStruct((B, N, C), out_dtype),
        grid=(B,),
        in_specs=plane_specs + w_specs,
        out_specs=pl.BlockSpec((1, N, C), lambda b: (b, 0, 0)),
        compiler_params=pltpu.CompilerParams(
            dimension_semantics=("parallel",),
            vmem_limit_bytes=_VMEM_LIMIT_BYTES),
    )(*plane_ops, *w_ops)


def ldp_net_projector(x, params):
    B, T, inc = x.shape
    h = int(math.sqrt(T))
    assert h * h == T, f"token count {T} is not a perfect square"
    y = mlp_forward(x, params["mlp_w1"], params["mlp_b1"],
                    params["mlp_w2"], params["mlp_b2"])          # (B, T, ouc) bf16
    ouc = y.shape[-1]
    # torch: permute(0,2,1).reshape(b, c, h, h) in NCHW == reshape to NHWC here.
    a = y.reshape(B, h, h, ouc)
    a = inverted_residual(a, params["ir1"], stride=1, use_res=True,
                          out_dtype=jnp.bfloat16).reshape(B, h, h, ouc)
    out = inverted_residual(a, params["ir2"], stride=2, use_res=False,
                            out_dtype=x.dtype)
    # torch: flatten(2).permute(0,2,1) in NCHW == already token-major here.
    return out


# -------- deterministic parameter init (torch layouts -> stored kernel layouts) --------

def init_params(key, inc, ouc):
    # _make_divisible(ouc // 4, 8)
    v = ouc // 4
    csq = max(8, int(v + 4) // 8 * 8)
    if csq < 0.9 * v:
        csq += 8

    keys = jax.random.split(key, 6)

    def nrm(k, shape, scale=0.05):
        return jax.random.normal(k, shape, jnp.float32) * scale

    params = {
        # torch Linear weight is (out, in); stored pre-transposed (in, out), bf16.
        "mlp_w1": nrm(keys[0], (ouc, inc)).T.astype(jnp.bfloat16),
        "mlp_b1": nrm(keys[1], (ouc,)).reshape(1, ouc),
        "mlp_w2": nrm(keys[2], (ouc, ouc)).T.astype(jnp.bfloat16),
        "mlp_b2": nrm(keys[3], (ouc,)).reshape(1, ouc),
    }

    def ir_params(kk):
        ks = jax.random.split(kk, 6)
        dw = nrm(ks[0], (ouc, 1, 3, 3))        # depthwise Conv2d weight, bias=False
        se1 = nrm(ks[1], (csq, ouc, 1, 1))     # SE fc1 Conv2d weight
        se1b = nrm(ks[2], (csq,))
        se2 = nrm(ks[3], (ouc, csq, 1, 1))     # SE fc2 Conv2d weight
        se2b = nrm(ks[4], (ouc,))
        pw = nrm(ks[5], (ouc, ouc, 1, 1))      # 1x1 project Conv2d weight, bias=False
        return {
            "dw_w9": dw.reshape(ouc, 9).T,                            # (9, C), k=kh*3+kw
            "ln1_g": jnp.ones((1, ouc), jnp.float32),
            "ln1_b": jnp.zeros((1, ouc), jnp.float32),
            "se_w1": se1.reshape(csq, ouc).T.astype(jnp.bfloat16),    # (C, Csq)
            "se_b1": se1b.reshape(1, csq),
            "se_w2": se2.reshape(ouc, csq).T.astype(jnp.bfloat16),    # (Csq, C)
            "se_b2": se2b.reshape(1, ouc),
            "pw_w": pw.reshape(ouc, ouc).T.astype(jnp.bfloat16),      # (Cin, Cout)
            "ln2_g": jnp.ones((1, ouc), jnp.float32),
            "ln2_b": jnp.zeros((1, ouc), jnp.float32),
        }

    params["ir1"] = ir_params(keys[4])
    params["ir2"] = ir_params(keys[5])
    return params


# ---------------- pure-jnp f32 reference (validation only) ----------------

def _reference_forward(x, params):
    def f32(a):
        return a.astype(jnp.float32)

    B, T, inc = x.shape
    h = int(math.sqrt(T))
    y = x @ f32(params["mlp_w1"]) + params["mlp_b1"]
    y = jax.nn.gelu(y, approximate=False)
    y = y @ f32(params["mlp_w2"]) + params["mlp_b2"]
    a = y.reshape(B, h, h, -1)                                   # NHWC

    def ln(v, g, b, eps=1e-5):
        mu = v.mean(-1, keepdims=True)
        var = ((v - mu) ** 2).mean(-1, keepdims=True)
        return (v - mu) / jnp.sqrt(var + eps) * g.reshape(-1) + b.reshape(-1)

    def ir(a, p, stride, use_res):
        Bb, H, W, C = a.shape
        Hout = (H - 1) // stride + 1
        Wout = (W - 1) // stride + 1
        ap = jnp.pad(a, ((0, 0), (1, 1), (1, 1), (0, 0)))
        acc = jnp.zeros((Bb, Hout, Wout, C), jnp.float32)
        for k in range(9):
            kh, kw = divmod(k, 3)
            acc = acc + ap[:, kh:kh + (Hout - 1) * stride + 1:stride,
                           kw:kw + (Wout - 1) * stride + 1:stride, :] * p["dw_w9"][k]
        yy = ln(acc, p["ln1_g"], p["ln1_b"])
        yy = yy * jnp.clip(yy + 3.0, 0.0, 6.0) / 6.0
        s = yy.mean(axis=(1, 2), keepdims=True)
        s = jnp.maximum(jnp.einsum("bhwc,cd->bhwd", s, f32(p["se_w1"]))
                        + p["se_b1"].reshape(-1), 0.0)
        s = jnp.einsum("bhwc,cd->bhwd", s, f32(p["se_w2"])) + p["se_b2"].reshape(-1)
        yy = yy * (jnp.clip(s + 3.0, 0.0, 6.0) / 6.0)
        z = jnp.einsum("bhwc,cd->bhwd", yy, f32(p["pw_w"]))
        z = ln(z, p["ln2_g"], p["ln2_b"])
        if use_res:
            z = z + a
        return z

    a = ir(a, params["ir1"], 1, True)
    a = ir(a, params["ir2"], 2, False)
    Bo, Ho, Wo, C = a.shape
    return a.reshape(Bo, Ho * Wo, C)


if __name__ == "__main__":
    # config.mm_hidden_size = 48, config.hidden_size = 32, 16 tokens (4x4 grid), batch 2.
    B, T, inc, ouc = 2, 16, 48, 32
    key = jax.random.PRNGKey(0)
    kx, kp = jax.random.split(key)
    x = jax.random.normal(kx, (B, T, inc), jnp.float32)
    params = init_params(kp, inc, ouc)

    fwd = jax.jit(ldp_net_projector)
    try:
        out = jax.block_until_ready(fwd(x, params))
    except Exception:
        # If this jax build rejects single-buffered weight blocks (pl.Buffered(1)),
        # retry once with default double-buffered pipelining.
        if not _SINGLE_BUFFER_WEIGHTS[0]:
            raise
        _SINGLE_BUFFER_WEIGHTS[0] = False
        out = jax.block_until_ready(jax.jit(ldp_net_projector)(x, params))

    h = int(math.sqrt(T))
    assert out.shape == (B, (h // 2) * (h // 2), ouc), out.shape
    assert out.dtype == x.dtype
    assert bool(jnp.all(jnp.isfinite(out)))

    # Validate vs. a pure-jnp f32 reference (same bf16-rounded weights; kernels use
    # bf16 MXU operands / bf16 inter-stage activations with f32 elementwise math).
    ref = _reference_forward(x, params)
    max_err = float(jnp.max(jnp.abs(out - ref)))
    rel_err = float(jnp.linalg.norm(out - ref) / (jnp.linalg.norm(ref) + 1e-12))
    assert max_err < 0.1, f"max |err| vs f32 reference = {max_err}"
    assert rel_err < 0.05, f"relative Frobenius error vs f32 reference = {rel_err}"
    print("KERNEL_OK")
</pallas_src>

<mosaic_0001>
module attributes {stable_mosaic.version = 11 : i64} {
  func.func @mlp_kernel(%arg0: i32, %arg1: i32, %arg2: memref<1x16x48xf32, #tpu.memory_space<vmem>>, %arg3: memref<48x32xbf16, #tpu.memory_space<vmem>>, %arg4: memref<1x32xf32, #tpu.memory_space<vmem>>, %arg5: memref<32x32xbf16, #tpu.memory_space<vmem>>, %arg6: memref<1x32xf32, #tpu.memory_space<vmem>>, %arg7: memref<1x16x32xbf16, #tpu.memory_space<vmem>>) attributes {dimension_semantics = [#tpu.dimension_semantics<parallel>, #tpu.dimension_semantics<parallel>], iteration_bounds = array<i64: 2, 1>, scalar_prefetch = 0 : i64, scratch_operands = 0 : i64, tpu.core_type = #tpu.core_type<tc>, window_params = [{transform_indices = @transform_0, window_bounds = array<i64: 1, 16, 48>}, {pipeline_mode = #tpu.pipeline_mode<synchronous>, transform_indices = @transform_1, window_bounds = array<i64: 48, 32>}, {pipeline_mode = #tpu.pipeline_mode<synchronous>, transform_indices = @transform_2, window_bounds = array<i64: 1, 32>}, {pipeline_mode = #tpu.pipeline_mode<synchronous>, transform_indices = @transform_3, window_bounds = array<i64: 32, 32>}, {pipeline_mode = #tpu.pipeline_mode<synchronous>, transform_indices = @transform_4, window_bounds = array<i64: 1, 32>}, {transform_indices = @transform_5, window_bounds = array<i64: 1, 16, 32>}]} {
    %c0 = arith.constant 0 : index
    %c0_0 = arith.constant 0 : index
    %c0_1 = arith.constant 0 : index
    %0 = vector.load %arg2[%c0, %c0_0, %c0_1] : memref<1x16x48xf32, #tpu.memory_space<vmem>>, vector<1x16x48xf32>
    %1 = vector.shape_cast %0 : vector<1x16x48xf32> to vector<16x48xf32>
    %2 = arith.truncf %1 : vector<16x48xf32> to vector<16x48xbf16>
    %c0_2 = arith.constant 0 : index
    %c0_3 = arith.constant 0 : index
    %3 = vector.load %arg3[%c0_2, %c0_3] : memref<48x32xbf16, #tpu.memory_space<vmem>>, vector<48x32xbf16>
    %cst = arith.constant dense<0.000000e+00> : vector<16x32xf32>
    %4 = tpu.matmul %2, %3, %cst {dimension_numbers = #tpu.dot_dimension_numbers<[1], [0], [0], [1], [0, 0, 1, 1], [], []>} : vector<16x48xbf16>, vector<48x32xbf16>, vector<16x32xf32> -> vector<16x32xf32>
    %c0_4 = arith.constant 0 : index
    %c0_5 = arith.constant 0 : index
    %5 = vector.load %arg4[%c0_4, %c0_5] : memref<1x32xf32, #tpu.memory_space<vmem>>, vector<1x32xf32>
    %6 = vector.broadcast %5 : vector<1x32xf32> to vector<16x32xf32>
    %7 = arith.addf %4, %6 : vector<16x32xf32>
    %cst_6 = arith.constant 5.000000e-01 : f32
    %8 = vector.broadcast %cst_6 : f32 to vector<16x32xf32>
    %9 = arith.mulf %8, %7 : vector<16x32xf32>
    %cst_7 = arith.constant 0.707106769 : f32
    %10 = vector.broadcast %cst_7 : f32 to vector<16x32xf32>
    %11 = arith.mulf %7, %10 : vector<16x32xf32>
    %cst_8 = arith.constant 0.000000e+00 : f32
    %12 = vector.broadcast %cst_8 : f32 to vector<16x32xf32>
    %13 = arith.cmpf oge, %11, %12 : vector<16x32xf32>
    %cst_9 = arith.constant 1.000000e+00 : f32
    %cst_10 = arith.constant -1.000000e+00 : f32
    %14 = vector.broadcast %cst_9 : f32 to vector<16x32xf32>
    %15 = vector.broadcast %cst_10 : f32 to vector<16x32xf32>
    %16 = arith.select %13, %14, %15 : vector<16x32xi1>, vector<16x32xf32>
    %17 = math.absf %11 : vector<16x32xf32>
    %cst_11 = arith.constant 0.327591091 : f32
    %18 = vector.broadcast %cst_11 : f32 to vector<16x32xf32>
    %19 = arith.mulf %18, %17 : vector<16x32xf32>
    %cst_12 = arith.constant 1.000000e+00 : f32
    %20 = vector.broadcast %cst_12 : f32 to vector<16x32xf32>
    %21 = arith.addf %20, %19 : vector<16x32xf32>
    %22 = tpu.reciprocal %21 {approx = true} : vector<16x32xf32> -> vector<16x32xf32>
    %cst_13 = arith.constant 1.06140542 : f32
    %23 = vector.broadcast %cst_13 : f32 to vector<16x32xf32>
    %24 = arith.mulf %23, %22 : vector<16x32xf32>
    %cst_14 = arith.constant -1.45315206 : f32
    %25 = vector.broadcast %cst_14 : f32 to vector<16x32xf32>
    %26 = arith.addf %24, %25 : vector<16x32xf32>
    %27 = arith.mulf %26, %22 : vector<16x32xf32>
    %cst_15 = arith.constant 1.42141378 : f32
    %28 = vector.broadcast %cst_15 : f32 to vector<16x32xf32>
    %29 = arith.addf %27, %28 : vector<16x32xf32>
    %30 = arith.mulf %29, %22 : vector<16x32xf32>
    %cst_16 = arith.constant -0.284496725 : f32
    %31 = vector.broadcast %cst_16 : f32 to vector<16x32xf32>
    %32 = arith.addf %30, %31 : vector<16x32xf32>
    %33 = arith.mulf %32, %22 : vector<16x32xf32>
    %cst_17 = arith.constant 0.254829586 : f32
    %34 = vector.broadcast %cst_17 : f32 to vector<16x32xf32>
    %35 = arith.addf %33, %34 : vector<16x32xf32>
    %36 = arith.mulf %35, %22 : vector<16x32xf32>
    %cst_18 = arith.constant 0.000000e+00 : f32
    %37 = vector.broadcast %cst_18 : f32 to vector<16x32xf32>
    %38 = arith.subf %37, %17 : vector<16x32xf32>
    %39 = arith.mulf %38, %17 : vector<16x32xf32>
    %40 = math.exp %39 : vector<16x32xf32>
    %41 = arith.mulf %36, %40 : vector<16x32xf32>
    %cst_19 = arith.constant 1.000000e+00 : f32
    %42 = vector.broadcast %cst_19 : f32 to vector<16x32xf32>
    %43 = arith.subf %42, %41 : vector<16x32xf32>
    %44 = arith.mulf %16, %43 : vector<16x32xf32>
    %cst_20 = arith.constant 1.000000e+00 : f32
    %45 = vector.broadcast %cst_20 : f32 to vector<16x32xf32>
    %46 = arith.addf %45, %44 : vector<16x32xf32>
    %47 = arith.mulf %9, %46 : vector<16x32xf32>
    %48 = arith.truncf %47 : vector<16x32xf32> to vector<16x32xbf16>
    %c0_21 = arith.constant 0 : index
    %c0_22 = arith.constant 0 : index
    %49 = vector.load %arg5[%c0_21, %c0_22] : memref<32x32xbf16, #tpu.memory_space<vmem>>, vector<32x32xbf16>
    %cst_23 = arith.constant dense<0.000000e+00> : vector<16x32xf32>
    %50 = tpu.matmul %48, %49, %cst_23 {dimension_numbers = #tpu.dot_dimension_numbers<[1], [0], [0], [1], [0, 0, 1, 1], [], []>} : vector<16x32xbf16>, vector<32x32xbf16>, vector<16x32xf32> -> vector<16x32xf32>
    %c0_24 = arith.constant 0 : index
    %c0_25 = arith.constant 0 : index
    %51 = vector.load %arg6[%c0_24, %c0_25] : memref<1x32xf32, #tpu.memory_space<vmem>>, vector<1x32xf32>
    %52 = vector.broadcast %51 : vector<1x32xf32> to vector<16x32xf32>
    %53 = arith.addf %50, %52 : vector<16x32xf32>
    %54 = arith.truncf %53 : vector<16x32xf32> to vector<16x32xbf16>
    %c0_26 = arith.constant 0 : index
    %c0_27 = arith.constant 0 : index
    %c0_28 = arith.constant 0 : index
    %55 = vector.load %arg7[%c0_26, %c0_27, %c0_28] : memref<1x16x32xbf16, #tpu.memory_space<vmem>>, vector<1x16x32xbf16>
    %56 = vector.shape_cast %55 : vector<1x16x32xbf16> to vector<16x32xbf16>
    %57 = vector.shape_cast %54 : vector<16x32xbf16> to vector<1x16x32xbf16>
    tpu.vector_store %arg7[%c0_26, %c0_27, %c0_28], %57 {strides = array<i32>} : memref<1x16x32xbf16, #tpu.memory_space<vmem>>, vector<1x16x32xbf16>,
    return
  }
  func.func @transform_0(%arg0: i32, %arg1: i32) -> (i32, i32, i32) {
    %c0_i32 = arith.constant 0 : i32
    %c0_i32_0 = arith.constant 0 : i32
    return %arg0, %arg1, %c0_i32 : i32, i32, i32
  }
  func.func @transform_1(%arg0: i32, %arg1: i32) -> (i32, i32) {
    %c0_i32 = arith.constant 0 : i32
    %c0_i32_0 = arith.constant 0 : i32
    %c0_i32_1 = arith.constant 0 : i32
    return %c0_i32, %c0_i32_0 : i32, i32
  }
  func.func @transform_2(%arg0: i32, %arg1: i32) -> (i32, i32) {
    %c0_i32 = arith.constant 0 : i32
    %c0_i32_0 = arith.constant 0 : i32
    %c0_i32_1 = arith.constant 0 : i32
    return %c0_i32, %c0_i32_0 : i32, i32
  }
  func.func @transform_3(%arg0: i32, %arg1: i32) -> (i32, i32) {
    %c0_i32 = arith.constant 0 : i32
    %c0_i32_0 = arith.constant 0 : i32
    %c0_i32_1 = arith.constant 0 : i32
    return %c0_i32, %c0_i32_0 : i32, i32
  }
  func.func @transform_4(%arg0: i32, %arg1: i32) -> (i32, i32) {
    %c0_i32 = arith.constant 0 : i32
    %c0_i32_0 = arith.constant 0 : i32
    %c0_i32_1 = arith.constant 0 : i32
    return %c0_i32, %c0_i32_0 : i32, i32
  }
  func.func @transform_5(%arg0: i32, %arg1: i32) -> (i32, i32, i32) {
    %c0_i32 = arith.constant 0 : i32
    %c0_i32_0 = arith.constant 0 : i32
    return %arg0, %arg1, %c0_i32 : i32, i32, i32
  }
}

module attributes {stable_mosaic.version = 11 : i64} {
  func.func @ir_kernel(%arg0: i32, %arg1: memref<1x6x6x32xbf16, #tpu.memory_space<vmem>>, %arg2: memref<9x32xf32, #tpu.memory_space<vmem>>, %arg3: memref<1x32xf32, #tpu.memory_space<vmem>>, %arg4: memref<1x32xf32, #tpu.memory_space<vmem>>, %arg5: memref<32x8xbf16, #tpu.memory_space<vmem>>, %arg6: memref<1x8xf32, #tpu.memory_space<vmem>>, %arg7: memref<8x32xbf16, #tpu.memory_space<vmem>>, %arg8: memref<1x32xf32, #tpu.memory_space<vmem>>, %arg9: memref<32x32xbf16, #tpu.memory_space<vmem>>, %arg10: memref<1x32xf32, #tpu.memory_space<vmem>>, %arg11: memref<1x32xf32, #tpu.memory_space<vmem>>, %arg12: memref<1x16x32xbf16, #tpu.memory_space<vmem>>) attributes {dimension_semantics = [#tpu.dimension_semantics<parallel>], iteration_bounds = array<i64: 2>, scalar_prefetch = 0 : i64, scratch_operands = 0 : i64, tpu.core_type = #tpu.core_type<tc>, window_params = [{transform_indices = @transform_0, window_bounds = array<i64: 1, 6, 6, 32>}, {pipeline_mode = #tpu.pipeline_mode<synchronous>, transform_indices = @transform_1, window_bounds = array<i64: 9, 32>}, {pipeline_mode = #tpu.pipeline_mode<synchronous>, transform_indices = @transform_2, window_bounds = array<i64: 1, 32>}, {pipeline_mode = #tpu.pipeline_mode<synchronous>, transform_indices = @transform_3, window_bounds = array<i64: 1, 32>}, {pipeline_mode = #tpu.pipeline_mode<synchronous>, transform_indices = @transform_4, window_bounds = array<i64: 32, 8>}, {pipeline_mode = #tpu.pipeline_mode<synchronous>, transform_indices = @transform_5, window_bounds = array<i64: 1, 8>}, {pipeline_mode = #tpu.pipeline_mode<synchronous>, transform_indices = @transform_6, window_bounds = array<i64: 8, 32>}, {pipeline_mode = #tpu.pipeline_mode<synchronous>, transform_indices = @transform_7, window_bounds = array<i64: 1, 32>}, {pipeline_mode = #tpu.pipeline_mode<synchronous>, transform_indices = @transform_8, window_bounds = array<i64: 32, 32>}, {pipeline_mode = #tpu.pipeline_mode<synchronous>, transform_indices = @transform_9, window_bounds = array<i64: 1, 32>}, {pipeline_mode = #tpu.pipeline_mode<synchronous>, transform_indices = @transform_10, window_bounds = array<i64: 1, 32>}, {transform_indices = @transform_11, window_bounds = array<i64: 1, 16, 32>}]} {
    %c0 = arith.constant 0 : index
    %c1 = arith.constant 1 : index
    %c1_0 = arith.constant 1 : index
    %c0_1 = arith.constant 0 : index
    %0 = vector.load %arg1[%c0, %c1, %c1_0, %c0_1] : memref<1x6x6x32xbf16, #tpu.memory_space<vmem>>, vector<1x4x4x32xbf16>
    %1 = vector.shape_cast %0 : vector<1x4x4x32xbf16> to vector<4x4x32xbf16>
    %2 = arith.extf %1 : vector<4x4x32xbf16> to vector<4x4x32xf32>
    %c4 = arith.constant 4 : index
    %c0_2 = arith.constant 0 : index
    %3 = vector.load %arg2[%c4, %c0_2] : memref<9x32xf32, #tpu.memory_space<vmem>>, vector<1x32xf32>
    %4 = vector.shape_cast %3 : vector<1x32xf32> to vector<32xf32>
    %5 = vector.shape_cast %4 : vector<32xf32> to vector<1x1x32xf32>
    %6 = vector.broadcast %5 : vector<1x1x32xf32> to vector<4x4x32xf32>
    %7 = arith.mulf %2, %6 : vector<4x4x32xf32>
    %c0_3 = arith.constant 0 : index
    %c0_4 = arith.constant 0 : index
    %c0_5 = arith.constant 0 : index
    %c0_6 = arith.constant 0 : index
    %8 = vector.load %arg1[%c0_3, %c0_4, %c0_5, %c0_6] : memref<1x6x6x32xbf16, #tpu.memory_space<vmem>>, vector<1x4x4x32xbf16>
    %9 = vector.shape_cast %8 : vector<1x4x4x32xbf16> to vector<4x4x32xbf16>
    %10 = arith.extf %9 : vector<4x4x32xbf16> to vector<4x4x32xf32>
    %c0_7 = arith.constant 0 : index
    %c0_8 = arith.constant 0 : index
    %11 = vector.load %arg2[%c0_7, %c0_8] : memref<9x32xf32, #tpu.memory_space<vmem>>, vector<1x32xf32>
    %12 = vector.shape_cast %11 : vector<1x32xf32> to vector<32xf32>
    %13 = vector.shape_cast %12 : vector<32xf32> to vector<1x1x32xf32>
    %14 = vector.broadcast %13 : vector<1x1x32xf32> to vector<4x4x32xf32>
    %15 = arith.mulf %10, %14 : vector<4x4x32xf32>
    %16 = arith.addf %7, %15 : vector<4x4x32xf32>
    %c0_9 = arith.constant 0 : index
    %c0_10 = arith.constant 0 : index
    %c1_11 = arith.constant 1 : index
    %c0_12 = arith.constant 0 : index
    %17 = vector.load %arg1[%c0_9, %c0_10, %c1_11, %c0_12] : memref<1x6x6x32xbf16, #tpu.memory_space<vmem>>, vector<1x4x4x32xbf16>
    %18 = vector.shape_cast %17 : vector<1x4x4x32xbf16> to vector<4x4x32xbf16>
    %19 = arith.extf %18 : vector<4x4x32xbf16> to vector<4x4x32xf32>
    %c1_13 = arith.constant 1 : index
    %c0_14 = arith.constant 0 : index
    %20 = vector.load %arg2[%c1_13, %c0_14] : memref<9x32xf32, #tpu.memory_space<vmem>>, vector<1x32xf32>
    %21 = vector.shape_cast %20 : vector<1x32xf32> to vector<32xf32>
    %22 = vector.shape_cast %21 : vector<32xf32> to vector<1x1x32xf32>
    %23 = vector.broadcast %22 : vector<1x1x32xf32> to vector<4x4x32xf32>
    %24 = arith.mulf %19, %23 : vector<4x4x32xf32>
    %25 = arith.addf %16, %24 : vector<4x4x32xf32>
    %c0_15 = arith.constant 0 : index
    %c0_16 = arith.constant 0 : index
    %c2 = arith.constant 2 : index
    %c0_17 = arith.constant 0 : index
    %26 = vector.load %arg1[%c0_15, %c0_16, %c2, %c0_17] : memref<1x6x6x32xbf16, #tpu.memory_space<vmem>>, vector<1x4x4x32xbf16>
    %27 = vector.shape_cast %26 : vector<1x4x4x32xbf16> to vector<4x4x32xbf16>
    %28 = arith.extf %27 : vector<4x4x32xbf16> to vector<4x4x32xf32>
    %c2_18 = arith.constant 2 : index
    %c0_19 = arith.constant 0 : index
    %29 = vector.load %arg2[%c2_18, %c0_19] : memref<9x32xf32, #tpu.memory_space<vmem>>, vector<1x32xf32>
    %30 = vector.shape_cast %29 : vector<1x32xf32> to vector<32xf32>
    %31 = vector.shape_cast %30 : vector<32xf32> to vector<1x1x32xf32>
    %32 = vector.broadcast %31 : vector<1x1x32xf32> to vector<4x4x32xf32>
    %33 = arith.mulf %28, %32 : vector<4x4x32xf32>
    %34 = arith.addf %25, %33 : vector<4x4x32xf32>
    %c0_20 = arith.constant 0 : index
    %c1_21 = arith.constant 1 : index
    %c0_22 = arith.constant 0 : index
    %c0_23 = arith.constant 0 : index
    %35 = vector.load %arg1[%c0_20, %c1_21, %c0_22, %c0_23] : memref<1x6x6x32xbf16, #tpu.memory_space<vmem>>, vector<1x4x4x32xbf16>
    %36 = vector.shape_cast %35 : vector<1x4x4x32xbf16> to vector<4x4x32xbf16>
    %37 = arith.extf %36 : vector<4x4x32xbf16> to vector<4x4x32xf32>
    %c3 = arith.constant 3 : index
    %c0_24 = arith.constant 0 : index
    %38 = vector.load %arg2[%c3, %c0_24] : memref<9x32xf32, #tpu.memory_space<vmem>>, vector<1x32xf32>
    %39 = vector.shape_cast %38 : vector<1x32xf32> to vector<32xf32>
    %40 = vector.shape_cast %39 : vector<32xf32> to vector<1x1x32xf32>
    %41 = vector.broadcast %40 : vector<1x1x32xf32> to vector<4x4x32xf32>
    %42 = arith.mulf %37, %41 : vector<4x4x32xf32>
    %43 = arith.addf %34, %42 : vector<4x4x32xf32>
    %c0_25 = arith.constant 0 : index
    %c1_26 = arith.constant 1 : index
    %c2_27 = arith.constant 2 : index
    %c0_28 = arith.constant 0 : index
    %44 = vector.load %arg1[%c0_25, %c1_26, %c2_27, %c0_28] : memref<1x6x6x32xbf16, #tpu.memory_space<vmem>>, vector<1x4x4x32xbf16>
    %45 = vector.shape_cast %44 : vector<1x4x4x32xbf16> to vector<4x4x32xbf16>
    %46 = arith.extf %45 : vector<4x4x32xbf16> to vector<4x4x32xf32>
    %c5 = arith.constant 5 : index
    %c0_29 = arith.constant 0 : index
    %47 = vector.load %arg2[%c5, %c0_29] : memref<9x32xf32, #tpu.memory_space<vmem>>, vector<1x32xf32>
    %48 = vector.shape_cast %47 : vector<1x32xf32> to vector<32xf32>
    %49 = vector.shape_cast %48 : vector<32xf32> to vector<1x1x32xf32>
    %50 = vector.broadcast %49 : vector<1x1x32xf32> to vector<4x4x32xf32>
    %51 = arith.mulf %46, %50 : vector<4x4x32xf32>
    %52 = arith.addf %43, %51 : vector<4x4x32xf32>
    %c0_30 = arith.constant 0 : index
    %c2_31 = arith.constant 2 : index
    %c0_32 = arith.constant 0 : index
    %c0_33 = arith.constant 0 : index
    %53 = vector.load %arg1[%c0_30, %c2_31, %c0_32, %c0_33] : memref<1x6x6x32xbf16, #tpu.memory_space<vmem>>, vector<1x4x4x32xbf16>
    %54 = vector.shape_cast %53 : vector<1x4x4x32xbf16> to vector<4x4x32xbf16>
    %55 = arith.extf %54 : vector<4x4x32xbf16> to vector<4x4x32xf32>
    %c6 = arith.constant 6 : index
    %c0_34 = arith.constant 0 : index
    %56 = vector.load %arg2[%c6, %c0_34] : memref<9x32xf32, #tpu.memory_space<vmem>>, vector<1x32xf32>
    %57 = vector.shape_cast %56 : vector<1x32xf32> to vector<32xf32>
    %58 = vector.shape_cast %57 : vector<32xf32> to vector<1x1x32xf32>
    %59 = vector.broadcast %58 : vector<1x1x32xf32> to vector<4x4x32xf32>
    %60 = arith.mulf %55, %59 : vector<4x4x32xf32>
    %61 = arith.addf %52, %60 : vector<4x4x32xf32>
    %c0_35 = arith.constant 0 : index
    %c2_36 = arith.constant 2 : index
    %c1_37 = arith.constant 1 : index
    %c0_38 = arith.constant 0 : index
    %62 = vector.load %arg1[%c0_35, %c2_36, %c1_37, %c0_38] : memref<1x6x6x32xbf16, #tpu.memory_space<vmem>>, vector<1x4x4x32xbf16>
    %63 = vector.shape_cast %62 : vector<1x4x4x32xbf16> to vector<4x4x32xbf16>
    %64 = arith.extf %63 : vector<4x4x32xbf16> to vector<4x4x32xf32>
    %c7 = arith.constant 7 : index
    %c0_39 = arith.constant 0 : index
    %65 = vector.load %arg2[%c7, %c0_39] : memref<9x32xf32, #tpu.memory_space<vmem>>, vector<1x32xf32>
    %66 = vector.shape_cast %65 : vector<1x32xf32> to vector<32xf32>
    %67 = vector.shape_cast %66 : vector<32xf32> to vector<1x1x32xf32>
    %68 = vector.broadcast %67 : vector<1x1x32xf32> to vector<4x4x32xf32>
    %69 = arith.mulf %64, %68 : vector<4x4x32xf32>
    %70 = arith.addf %61, %69 : vector<4x4x32xf32>
    %c0_40 = arith.constant 0 : index
    %c2_41 = arith.constant 2 : index
    %c2_42 = arith.constant 2 : index
    %c0_43 = arith.constant 0 : index
    %71 = vector.load %arg1[%c0_40, %c2_41, %c2_42, %c0_43] : memref<1x6x6x32xbf16, #tpu.memory_space<vmem>>, vector<1x4x4x32xbf16>
    %72 = vector.shape_cast %71 : vector<1x4x4x32xbf16> to vector<4x4x32xbf16>
    %73 = arith.extf %72 : vector<4x4x32xbf16> to vector<4x4x32xf32>
    %c8 = arith.constant 8 : index
    %c0_44 = arith.constant 0 : index
    %74 = vector.load %arg2[%c8, %c0_44] : memref<9x32xf32, #tpu.memory_space<vmem>>, vector<1x32xf32>
    %75 = vector.shape_cast %74 : vector<1x32xf32> to vector<32xf32>
    %76 = vector.shape_cast %75 : vector<32xf32> to vector<1x1x32xf32>
    %77 = vector.broadcast %76 : vector<1x1x32xf32> to vector<4x4x32xf32>
    %78 = arith.mulf %73, %77 : vector<4x4x32xf32>
    %79 = arith.addf %70, %78 : vector<4x4x32xf32>
    %80 = vector.shape_cast %79 : vector<4x4x32xf32> to vector<16x32xf32>
    %c0_45 = arith.constant 0 : index
    %c0_46 = arith.constant 0 : index
    %81 = vector.load %arg3[%c0_45, %c0_46] : memref<1x32xf32, #tpu.memory_space<vmem>>, vector<1x32xf32>
    %c0_47 = arith.constant 0 : index
    %c0_48 = arith.constant 0 : index
    %82 = vector.load %arg4[%c0_47, %c0_48] : memref<1x32xf32, #tpu.memory_space<vmem>>, vector<1x32xf32>
    %cst = arith.constant dense<0.000000e+00> : vector<16xf32>
    %83 = vector.multi_reduction <add>, %80, %cst [1] : vector<16x32xf32> to vector<16xf32>
    %84 = vector.shape_cast %83 : vector<16xf32> to vector<16x1xf32>
    %cst_49 = arith.constant 3.200000e+01 : f32
    %85 = vector.broadcast %cst_49 : f32 to vector<16x1xf32>
    %86 = arith.divf %84, %85 : vector<16x1xf32>
    %87 = arith.mulf %80, %80 : vector<16x32xf32>
    %cst_50 = arith.constant dense<0.000000e+00> : vector<16xf32>
    %88 = vector.multi_reduction <add>, %87, %cst_50 [1] : vector<16x32xf32> to vector<16xf32>
    %89 = vector.shape_cast %88 : vector<16xf32> to vector<16x1xf32>
    %cst_51 = arith.constant 3.200000e+01 : f32
    %90 = vector.broadcast %cst_51 : f32 to vector<16x1xf32>
    %91 = arith.divf %89, %90 : vector<16x1xf32>
    %92 = arith.mulf %86, %86 : vector<16x1xf32>
    %93 = arith.subf %91, %92 : vector<16x1xf32>
    %cst_52 = arith.constant 0.000000e+00 : f32
    %94 = vector.broadcast %cst_52 : f32 to vector<16x1xf32>
    %95 = arith.maximumf %93, %94 : vector<16x1xf32>
    %96 = vector.broadcast %86 : vector<16x1xf32> to vector<16x32xf32>
    %97 = arith.subf %80, %96 : vector<16x32xf32>
    %cst_53 = arith.constant 9.99999974E-6 : f32
    %98 = vector.broadcast %cst_53 : f32 to vector<16x1xf32>
    %99 = arith.addf %95, %98 : vector<16x1xf32>
    %100 = math.rsqrt %99 : vector<16x1xf32>
    %101 = vector.broadcast %100 : vector<16x1xf32> to vector<16x32xf32>
    %102 = arith.mulf %97, %101 : vector<16x32xf32>
    %103 = vector.broadcast %81 : vector<1x32xf32> to vector<16x32xf32>
    %104 = arith.mulf %102, %103 : vector<16x32xf32>
    %105 = vector.broadcast %82 : vector<1x32xf32> to vector<16x32xf32>
    %106 = arith.addf %104, %105 : vector<16x32xf32>
    %cst_54 = arith.constant 3.000000e+00 : f32
    %107 = vector.broadcast %cst_54 : f32 to vector<16x32xf32>
    %108 = arith.addf %106, %107 : vector<16x32xf32>
    %cst_55 = arith.constant 0.000000e+00 : f32
    %cst_56 = arith.constant 6.000000e+00 : f32
    %109 = vector.broadcast %cst_55 : f32 to vector<16x32xf32>
    %110 = arith.maximumf %109, %108 : vector<16x32xf32>
    %111 = vector.broadcast %cst_56 : f32 to vector<16x32xf32>
    %112 = arith.minimumf %111, %110 : vector<16x32xf32>
    %113 = arith.mulf %106, %112 : vector<16x32xf32>
    %cst_57 = arith.constant 0.166666672 : f32
    %114 = vector.broadcast %cst_57 : f32 to vector<16x32xf32>
    %115 = arith.mulf %113, %114 : vector<16x32xf32>
    %cst_58 = arith.constant dense<0.000000e+00> : vector<32xf32>
    %116 = vector.multi_reduction <add>, %115, %cst_58 [0] : vector<16x32xf32> to vector<32xf32>
    %117 = vector.shape_cast %116 : vector<32xf32> to vector<1x32xf32>
    %cst_59 = arith.constant 1.600000e+01 : f32
    %118 = vector.broadcast %cst_59 : f32 to vector<1x32xf32>
    %119 = arith.divf %117, %118 : vector<1x32xf32>
    %120 = arith.truncf %119 : vector<1x32xf32> to vector<1x32xbf16>
    %c0_60 = arith.constant 0 : index
    %c0_61 = arith.constant 0 : index
    %121 = vector.load %arg5[%c0_60, %c0_61] : memref<32x8xbf16, #tpu.memory_space<vmem>>, vector<32x8xbf16>
    %cst_62 = arith.constant dense<0.000000e+00> : vector<1x8xf32>
    %122 = tpu.matmul %120, %121, %cst_62 {dimension_numbers = #tpu.dot_dimension_numbers<[1], [0], [0], [1], [0, 0, 1, 1], [], []>} : vector<1x32xbf16>, vector<32x8xbf16>, vector<1x8xf32> -> vector<1x8xf32>
    %c0_63 = arith.constant 0 : index
    %c0_64 = arith.constant 0 : index
    %123 = vector.load %arg6[%c0_63, %c0_64] : memref<1x8xf32, #tpu.memory_space<vmem>>, vector<1x8xf32>
    %124 = arith.addf %122, %123 : vector<1x8xf32>
    %cst_65 = arith.constant 0.000000e+00 : f32
    %125 = vector.broadcast %cst_65 : f32 to vector<1x8xf32>
    %126 = arith.maximumf %124, %125 : vector<1x8xf32>
    %127 = arith.truncf %126 : vector<1x8xf32> to vector<1x8xbf16>
    %c0_66 = arith.constant 0 : index
    %c0_67 = arith.constant 0 : index
    %128 = vector.load %arg7[%c0_66, %c0_67] : memref<8x32xbf16, #tpu.memory_space<vmem>>, vector<8x32xbf16>
    %cst_68 = arith.constant dense<0.000000e+00> : vector<1x32xf32>
    %129 = tpu.matmul %127, %128, %cst_68 {dimension_numbers = #tpu.dot_dimension_numbers<[1], [0], [0], [1], [0, 0, 1, 1], [], []>} : vector<1x8xbf16>, vector<8x32xbf16>, vector<1x32xf32> -> vector<1x32xf32>
    %c0_69 = arith.constant 0 : index
    %c0_70 = arith.constant 0 : index
    %130 = vector.load %arg8[%c0_69, %c0_70] : memref<1x32xf32, #tpu.memory_space<vmem>>, vector<1x32xf32>
    %131 = arith.addf %129, %130 : vector<1x32xf32>
    %cst_71 = arith.constant 3.000000e+00 : f32
    %132 = vector.broadcast %cst_71 : f32 to vector<1x32xf32>
    %133 = arith.addf %131, %132 : vector<1x32xf32>
    %cst_72 = arith.constant 0.000000e+00 : f32
    %cst_73 = arith.constant 6.000000e+00 : f32
    %134 = vector.broadcast %cst_72 : f32 to vector<1x32xf32>
    %135 = arith.maximumf %134, %133 : vector<1x32xf32>
    %136 = vector.broadcast %cst_73 : f32 to vector<1x32xf32>
    %137 = arith.minimumf %136, %135 : vector<1x32xf32>
    %cst_74 = arith.constant 0.166666672 : f32
    %138 = vector.broadcast %cst_74 : f32 to vector<1x32xf32>
    %139 = arith.mulf %137, %138 : vector<1x32xf32>
    %140 = vector.broadcast %139 : vector<1x32xf32> to vector<16x32xf32>
    %141 = arith.mulf %115, %140 : vector<16x32xf32>
    %142 = arith.truncf %141 : vector<16x32xf32> to vector<16x32xbf16>
    %c0_75 = arith.constant 0 : index
    %c0_76 = arith.constant 0 : index
    %143 = vector.load %arg9[%c0_75, %c0_76] : memref<32x32xbf16, #tpu.memory_space<vmem>>, vector<32x32xbf16>
    %cst_77 = arith.constant dense<0.000000e+00> : vector<16x32xf32>
    %144 = tpu.matmul %142, %143, %cst_77 {dimension_numbers = #tpu.dot_dimension_numbers<[1], [0], [0], [1], [0, 0, 1, 1], [], []>} : vector<16x32xbf16>, vector<32x32xbf16>, vector<16x32xf32> -> vector<16x32xf32>
    %c0_78 = arith.constant 0 : index
    %c0_79 = arith.constant 0 : index
    %145 = vector.load %arg10[%c0_78, %c0_79] : memref<1x32xf32, #tpu.memory_space<vmem>>, vector<1x32xf32>
    %c0_80 = arith.constant 0 : index
    %c0_81 = arith.constant 0 : index
    %146 = vector.load %arg11[%c0_80, %c0_81] : memref<1x32xf32, #tpu.memory_space<vmem>>, vector<1x32xf32>
    %cst_82 = arith.constant dense<0.000000e+00> : vector<16xf32>
    %147 = vector.multi_reduction <add>, %144, %cst_82 [1] : vector<16x32xf32> to vector<16xf32>
    %148 = vector.shape_cast %147 : vector<16xf32> to vector<16x1xf32>
    %cst_83 = arith.constant 3.200000e+01 : f32
    %149 = vector.broadcast %cst_83 : f32 to vector<16x1xf32>
    %150 = arith.divf %148, %149 : vector<16x1xf32>
    %151 = arith.mulf %144, %144 : vector<16x32xf32>
    %cst_84 = arith.constant dense<0.000000e+00> : vector<16xf32>
    %152 = vector.multi_reduction <add>, %151, %cst_84 [1] : vector<16x32xf32> to vector<16xf32>
    %153 = vector.shape_cast %152 : vector<16xf32> to vector<16x1xf32>
    %cst_85 = arith.constant 3.200000e+01 : f32
    %154 = vector.broadcast %cst_85 : f32 to vector<16x1xf32>
    %155 = arith.divf %153, %154 : vector<16x1xf32>
    %156 = arith.mulf %150, %150 : vector<16x1xf32>
    %157 = arith.subf %155, %156 : vector<16x1xf32>
    %cst_86 = arith.constant 0.000000e+00 : f32
    %158 = vector.broadcast %cst_86 : f32 to vector<16x1xf32>
    %159 = arith.maximumf %157, %158 : vector<16x1xf32>
    %160 = vector.broadcast %150 : vector<16x1xf32> to vector<16x32xf32>
    %161 = arith.subf %144, %160 : vector<16x32xf32>
    %cst_87 = arith.constant 9.99999974E-6 : f32
    %162 = vector.broadcast %cst_87 : f32 to vector<16x1xf32>
    %163 = arith.addf %159, %162 : vector<16x1xf32>
    %164 = math.rsqrt %163 : vector<16x1xf32>
    %165 = vector.broadcast %164 : vector<16x1xf32> to vector<16x32xf32>
    %166 = arith.mulf %161, %165 : vector<16x32xf32>
    %167 = vector.broadcast %145 : vector<1x32xf32> to vector<16x32xf32>
    %168 = arith.mulf %166, %167 : vector<16x32xf32>
    %169 = vector.broadcast %146 : vector<1x32xf32> to vector<16x32xf32>
    %170 = arith.addf %168, %169 : vector<16x32xf32>
    %171 = vector.shape_cast %2 : vector<4x4x32xf32> to vector<16x32xf32>
    %172 = arith.addf %170, %171 : vector<16x32xf32>
    %173 = arith.truncf %172 : vector<16x32xf32> to vector<16x32xbf16>
    %c0_88 = arith.constant 0 : index
    %c0_89 = arith.constant 0 : index
    %c0_90 = arith.constant 0 : index
    %174 = vector.load %arg12[%c0_88, %c0_89, %c0_90] : memref<1x16x32xbf16, #tpu.memory_space<vmem>>, vector<1x16x32xbf16>
    %175 = vector.shape_cast %174 : vector<1x16x32xbf16> to vector<16x32xbf16>
    %176 = vector.shape_cast %173 : vector<16x32xbf16> to vector<1x16x32xbf16>
    tpu.vector_store %arg12[%c0_88, %c0_89, %c0_90], %176 {strides = array<i32>} : memref<1x16x32xbf16, #tpu.memory_space<vmem>>, vector<1x16x32xbf16>,
    return
  }
  func.func @transform_0(%arg0: i32) -> (i32, i32, i32, i32) {
    %c0_i32 = arith.constant 0 : i32
    %c0_i32_0 = arith.constant 0 : i32
    %c0_i32_1 = arith.constant 0 : i32
    %c0_i32_2 = arith.constant 0 : i32
    return %arg0, %c0_i32, %c0_i32_0, %c0_i32_1 : i32, i32, i32, i32
  }
  func.func @transform_1(%arg0: i32) -> (i32, i32) {
    %c0_i32 = arith.constant 0 : i32
    %c0_i32_0 = arith.constant 0 : i32
    %c0_i32_1 = arith.constant 0 : i32
    return %c0_i32, %c0_i32_0 : i32, i32
  }
  func.func @transform_2(%arg0: i32) -> (i32, i32) {
    %c0_i32 = arith.constant 0 : i32
    %c0_i32_0 = arith.constant 0 : i32
    %c0_i32_1 = arith.constant 0 : i32
    return %c0_i32, %c0_i32_0 : i32, i32
  }
  func.func @transform_3(%arg0: i32) -> (i32, i32) {
    %c0_i32 = arith.constant 0 : i32
    %c0_i32_0 = arith.constant 0 : i32
    %c0_i32_1 = arith.constant 0 : i32
    return %c0_i32, %c0_i32_0 : i32, i32
  }
  func.func @transform_4(%arg0: i32) -> (i32, i32) {
    %c0_i32 = arith.constant 0 : i32
    %c0_i32_0 = arith.constant 0 : i32
    %c0_i32_1 = arith.constant 0 : i32
    return %c0_i32, %c0_i32_0 : i32, i32
  }
  func.func @transform_5(%arg0: i32) -> (i32, i32) {
    %c0_i32 = arith.constant 0 : i32
    %c0_i32_0 = arith.constant 0 : i32
    %c0_i32_1 = arith.constant 0 : i32
    return %c0_i32, %c0_i32_0 : i32, i32
  }
  func.func @transform_6(%arg0: i32) -> (i32, i32) {
    %c0_i32 = arith.constant 0 : i32
    %c0_i32_0 = arith.constant 0 : i32
    %c0_i32_1 = arith.constant 0 : i32
    return %c0_i32, %c0_i32_0 : i32, i32
  }
  func.func @transform_7(%arg0: i32) -> (i32, i32) {
    %c0_i32 = arith.constant 0 : i32
    %c0_i32_0 = arith.constant 0 : i32
    %c0_i32_1 = arith.constant 0 : i32
    return %c0_i32, %c0_i32_0 : i32, i32
  }
  func.func @transform_8(%arg0: i32) -> (i32, i32) {
    %c0_i32 = arith.constant 0 : i32
    %c0_i32_0 = arith.constant 0 : i32
    %c0_i32_1 = arith.constant 0 : i32
    return %c0_i32, %c0_i32_0 : i32, i32
  }
  func.func @transform_9(%arg0: i32) -> (i32, i32) {
    %c0_i32 = arith.constant 0 : i32
    %c0_i32_0 = arith.constant 0 : i32
    %c0_i32_1 = arith.constant 0 : i32
    return %c0_i32, %c0_i32_0 : i32, i32
  }
  func.func @transform_10(%arg0: i32) -> (i32, i32) {
    %c0_i32 = arith.constant 0 : i32
    %c0_i32_0 = arith.constant 0 : i32
    %c0_i32_1 = arith.constant 0 : i32
    return %c0_i32, %c0_i32_0 : i32, i32
  }
  func.func @transform_11(%arg0: i32) -> (i32, i32, i32) {
    %c0_i32 = arith.constant 0 : i32
    %c0_i32_0 = arith.constant 0 : i32
    %c0_i32_1 = arith.constant 0 : i32
    return %arg0, %c0_i32, %c0_i32_0 : i32, i32, i32
  }
}

module attributes {stable_mosaic.version = 11 : i64} {
  func.func @ir_kernel(%arg0: i32, %arg1: memref<1x3x3x32xbf16, #tpu.memory_space<vmem>>, %arg2: memref<1x3x3x32xbf16, #tpu.memory_space<vmem>>, %arg3: memref<1x3x3x32xbf16, #tpu.memory_space<vmem>>, %arg4: memref<1x3x3x32xbf16, #tpu.memory_space<vmem>>, %arg5: memref<9x32xf32, #tpu.memory_space<vmem>>, %arg6: memref<1x32xf32, #tpu.memory_space<vmem>>, %arg7: memref<1x32xf32, #tpu.memory_space<vmem>>, %arg8: memref<32x8xbf16, #tpu.memory_space<vmem>>, %arg9: memref<1x8xf32, #tpu.memory_space<vmem>>, %arg10: memref<8x32xbf16, #tpu.memory_space<vmem>>, %arg11: memref<1x32xf32, #tpu.memory_space<vmem>>, %arg12: memref<32x32xbf16, #tpu.memory_space<vmem>>, %arg13: memref<1x32xf32, #tpu.memory_space<vmem>>, %arg14: memref<1x32xf32, #tpu.memory_space<vmem>>, %arg15: memref<1x4x32xf32, #tpu.memory_space<vmem>>) attributes {dimension_semantics = [#tpu.dimension_semantics<parallel>], iteration_bounds = array<i64: 2>, scalar_prefetch = 0 : i64, scratch_operands = 0 : i64, tpu.core_type = #tpu.core_type<tc>, window_params = [{transform_indices = @transform_0, window_bounds = array<i64: 1, 3, 3, 32>}, {transform_indices = @transform_1, window_bounds = array<i64: 1, 3, 3, 32>}, {transform_indices = @transform_2, window_bounds = array<i64: 1, 3, 3, 32>}, {transform_indices = @transform_3, window_bounds = array<i64: 1, 3, 3, 32>}, {pipeline_mode = #tpu.pipeline_mode<synchronous>, transform_indices = @transform_4, window_bounds = array<i64: 9, 32>}, {pipeline_mode = #tpu.pipeline_mode<synchronous>, transform_indices = @transform_5, window_bounds = array<i64: 1, 32>}, {pipeline_mode = #tpu.pipeline_mode<synchronous>, transform_indices = @transform_6, window_bounds = array<i64: 1, 32>}, {pipeline_mode = #tpu.pipeline_mode<synchronous>, transform_indices = @transform_7, window_bounds = array<i64: 32, 8>}, {pipeline_mode = #tpu.pipeline_mode<synchronous>, transform_indices = @transform_8, window_bounds = array<i64: 1, 8>}, {pipeline_mode = #tpu.pipeline_mode<synchronous>, transform_indices = @transform_9, window_bounds = array<i64: 8, 32>}, {pipeline_mode = #tpu.pipeline_mode<synchronous>, transform_indices = @transform_10, window_bounds = array<i64: 1, 32>}, {pipeline_mode = #tpu.pipeline_mode<synchronous>, transform_indices = @transform_11, window_bounds = array<i64: 32, 32>}, {pipeline_mode = #tpu.pipeline_mode<synchronous>, transform_indices = @transform_12, window_bounds = array<i64: 1, 32>}, {pipeline_mode = #tpu.pipeline_mode<synchronous>, transform_indices = @transform_13, window_bounds = array<i64: 1, 32>}, {transform_indices = @transform_14, window_bounds = array<i64: 1, 4, 32>}]} {
    %c0 = arith.constant 0 : index
    %c0_0 = arith.constant 0 : index
    %c0_1 = arith.constant 0 : index
    %c0_2 = arith.constant 0 : index
    %0 = vector.load %arg4[%c0, %c0_0, %c0_1, %c0_2] : memref<1x3x3x32xbf16, #tpu.memory_space<vmem>>, vector<1x2x2x32xbf16>
    %1 = vector.shape_cast %0 : vector<1x2x2x32xbf16> to vector<2x2x32xbf16>
    %2 = arith.extf %1 : vector<2x2x32xbf16> to vector<2x2x32xf32>
    %c4 = arith.constant 4 : index
    %c0_3 = arith.constant 0 : index
    %3 = vector.load %arg5[%c4, %c0_3] : memref<9x32xf32, #tpu.memory_space<vmem>>, vector<1x32xf32>
    %4 = vector.shape_cast %3 : vector<1x32xf32> to vector<32xf32>
    %5 = vector.shape_cast %4 : vector<32xf32> to vector<1x1x32xf32>
    %6 = vector.broadcast %5 : vector<1x1x32xf32> to vector<2x2x32xf32>
    %7 = arith.mulf %2, %6 : vector<2x2x32xf32>
    %c0_4 = arith.constant 0 : index
    %c0_5 = arith.constant 0 : index
    %c0_6 = arith.constant 0 : index
    %c0_7 = arith.constant 0 : index
    %8 = vector.load %arg1[%c0_4, %c0_5, %c0_6, %c0_7] : memref<1x3x3x32xbf16, #tpu.memory_space<vmem>>, vector<1x2x2x32xbf16>
    %9 = vector.shape_cast %8 : vector<1x2x2x32xbf16> to vector<2x2x32xbf16>
    %10 = arith.extf %9 : vector<2x2x32xbf16> to vector<2x2x32xf32>
    %c0_8 = arith.constant 0 : index
    %c0_9 = arith.constant 0 : index
    %11 = vector.load %arg5[%c0_8, %c0_9] : memref<9x32xf32, #tpu.memory_space<vmem>>, vector<1x32xf32>
    %12 = vector.shape_cast %11 : vector<1x32xf32> to vector<32xf32>
    %13 = vector.shape_cast %12 : vector<32xf32> to vector<1x1x32xf32>
    %14 = vector.broadcast %13 : vector<1x1x32xf32> to vector<2x2x32xf32>
    %15 = arith.mulf %10, %14 : vector<2x2x32xf32>
    %16 = arith.addf %7, %15 : vector<2x2x32xf32>
    %c0_10 = arith.constant 0 : index
    %c0_11 = arith.constant 0 : index
    %c0_12 = arith.constant 0 : index
    %c0_13 = arith.constant 0 : index
    %17 = vector.load %arg2[%c0_10, %c0_11, %c0_12, %c0_13] : memref<1x3x3x32xbf16, #tpu.memory_space<vmem>>, vector<1x2x2x32xbf16>
    %18 = vector.shape_cast %17 : vector<1x2x2x32xbf16> to vector<2x2x32xbf16>
    %19 = arith.extf %18 : vector<2x2x32xbf16> to vector<2x2x32xf32>
    %c1 = arith.constant 1 : index
    %c0_14 = arith.constant 0 : index
    %20 = vector.load %arg5[%c1, %c0_14] : memref<9x32xf32, #tpu.memory_space<vmem>>, vector<1x32xf32>
    %21 = vector.shape_cast %20 : vector<1x32xf32> to vector<32xf32>
    %22 = vector.shape_cast %21 : vector<32xf32> to vector<1x1x32xf32>
    %23 = vector.broadcast %22 : vector<1x1x32xf32> to vector<2x2x32xf32>
    %24 = arith.mulf %19, %23 : vector<2x2x32xf32>
    %25 = arith.addf %16, %24 : vector<2x2x32xf32>
    %c0_15 = arith.constant 0 : index
    %c0_16 = arith.constant 0 : index
    %c1_17 = arith.constant 1 : index
    %c0_18 = arith.constant 0 : index
    %26 = vector.load %arg1[%c0_15, %c0_16, %c1_17, %c0_18] : memref<1x3x3x32xbf16, #tpu.memory_space<vmem>>, vector<1x2x2x32xbf16>
    %27 = vector.shape_cast %26 : vector<1x2x2x32xbf16> to vector<2x2x32xbf16>
    %28 = arith.extf %27 : vector<2x2x32xbf16> to vector<2x2x32xf32>
    %c2 = arith.constant 2 : index
    %c0_19 = arith.constant 0 : index
    %29 = vector.load %arg5[%c2, %c0_19] : memref<9x32xf32, #tpu.memory_space<vmem>>, vector<1x32xf32>
    %30 = vector.shape_cast %29 : vector<1x32xf32> to vector<32xf32>
    %31 = vector.shape_cast %30 : vector<32xf32> to vector<1x1x32xf32>
    %32 = vector.broadcast %31 : vector<1x1x32xf32> to vector<2x2x32xf32>
    %33 = arith.mulf %28, %32 : vector<2x2x32xf32>
    %34 = arith.addf %25, %33 : vector<2x2x32xf32>
    %c0_20 = arith.constant 0 : index
    %c0_21 = arith.constant 0 : index
    %c0_22 = arith.constant 0 : index
    %c0_23 = arith.constant 0 : index
    %35 = vector.load %arg3[%c0_20, %c0_21, %c0_22, %c0_23] : memref<1x3x3x32xbf16, #tpu.memory_space<vmem>>, vector<1x2x2x32xbf16>
    %36 = vector.shape_cast %35 : vector<1x2x2x32xbf16> to vector<2x2x32xbf16>
    %37 = arith.extf %36 : vector<2x2x32xbf16> to vector<2x2x32xf32>
    %c3 = arith.constant 3 : index
    %c0_24 = arith.constant 0 : index
    %38 = vector.load %arg5[%c3, %c0_24] : memref<9x32xf32, #tpu.memory_space<vmem>>, vector<1x32xf32>
    %39 = vector.shape_cast %38 : vector<1x32xf32> to vector<32xf32>
    %40 = vector.shape_cast %39 : vector<32xf32> to vector<1x1x32xf32>
    %41 = vector.broadcast %40 : vector<1x1x32xf32> to vector<2x2x32xf32>
    %42 = arith.mulf %37, %41 : vector<2x2x32xf32>
    %43 = arith.addf %34, %42 : vector<2x2x32xf32>
    %c0_25 = arith.constant 0 : index
    %c0_26 = arith.constant 0 : index
    %c1_27 = arith.constant 1 : index
    %c0_28 = arith.constant 0 : index
    %44 = vector.load %arg3[%c0_25, %c0_26, %c1_27, %c0_28] : memref<1x3x3x32xbf16, #tpu.memory_space<vmem>>, vector<1x2x2x32xbf16>
    %45 = vector.shape_cast %44 : vector<1x2x2x32xbf16> to vector<2x2x32xbf16>
    %46 = arith.extf %45 : vector<2x2x32xbf16> to vector<2x2x32xf32>
    %c5 = arith.constant 5 : index
    %c0_29 = arith.constant 0 : index
    %47 = vector.load %arg5[%c5, %c0_29] : memref<9x32xf32, #tpu.memory_space<vmem>>, vector<1x32xf32>
    %48 = vector.shape_cast %47 : vector<1x32xf32> to vector<32xf32>
    %49 = vector.shape_cast %48 : vector<32xf32> to vector<1x1x32xf32>
    %50 = vector.broadcast %49 : vector<1x1x32xf32> to vector<2x2x32xf32>
    %51 = arith.mulf %46, %50 : vector<2x2x32xf32>
    %52 = arith.addf %43, %51 : vector<2x2x32xf32>
    %c0_30 = arith.constant 0 : index
    %c1_31 = arith.constant 1 : index
    %c0_32 = arith.constant 0 : index
    %c0_33 = arith.constant 0 : index
    %53 = vector.load %arg1[%c0_30, %c1_31, %c0_32, %c0_33] : memref<1x3x3x32xbf16, #tpu.memory_space<vmem>>, vector<1x2x2x32xbf16>
    %54 = vector.shape_cast %53 : vector<1x2x2x32xbf16> to vector<2x2x32xbf16>
    %55 = arith.extf %54 : vector<2x2x32xbf16> to vector<2x2x32xf32>
    %c6 = arith.constant 6 : index
    %c0_34 = arith.constant 0 : index
    %56 = vector.load %arg5[%c6, %c0_34] : memref<9x32xf32, #tpu.memory_space<vmem>>, vector<1x32xf32>
    %57 = vector.shape_cast %56 : vector<1x32xf32> to vector<32xf32>
    %58 = vector.shape_cast %57 : vector<32xf32> to vector<1x1x32xf32>
    %59 = vector.broadcast %58 : vector<1x1x32xf32> to vector<2x2x32xf32>
    %60 = arith.mulf %55, %59 : vector<2x2x32xf32>
    %61 = arith.addf %52, %60 : vector<2x2x32xf32>
    %c0_35 = arith.constant 0 : index
    %c1_36 = arith.constant 1 : index
    %c0_37 = arith.constant 0 : index
    %c0_38 = arith.constant 0 : index
    %62 = vector.load %arg2[%c0_35, %c1_36, %c0_37, %c0_38] : memref<1x3x3x32xbf16, #tpu.memory_space<vmem>>, vector<1x2x2x32xbf16>
    %63 = vector.shape_cast %62 : vector<1x2x2x32xbf16> to vector<2x2x32xbf16>
    %64 = arith.extf %63 : vector<2x2x32xbf16> to vector<2x2x32xf32>
    %c7 = arith.constant 7 : index
    %c0_39 = arith.constant 0 : index
    %65 = vector.load %arg5[%c7, %c0_39] : memref<9x32xf32, #tpu.memory_space<vmem>>, vector<1x32xf32>
    %66 = vector.shape_cast %65 : vector<1x32xf32> to vector<32xf32>
    %67 = vector.shape_cast %66 : vector<32xf32> to vector<1x1x32xf32>
    %68 = vector.broadcast %67 : vector<1x1x32xf32> to vector<2x2x32xf32>
    %69 = arith.mulf %64, %68 : vector<2x2x32xf32>
    %70 = arith.addf %61, %69 : vector<2x2x32xf32>
    %c0_40 = arith.constant 0 : index
    %c1_41 = arith.constant 1 : index
    %c1_42 = arith.constant 1 : index
    %c0_43 = arith.constant 0 : index
    %71 = vector.load %arg1[%c0_40, %c1_41, %c1_42, %c0_43] : memref<1x3x3x32xbf16, #tpu.memory_space<vmem>>, vector<1x2x2x32xbf16>
    %72 = vector.shape_cast %71 : vector<1x2x2x32xbf16> to vector<2x2x32xbf16>
    %73 = arith.extf %72 : vector<2x2x32xbf16> to vector<2x2x32xf32>
    %c8 = arith.constant 8 : index
    %c0_44 = arith.constant 0 : index
    %74 = vector.load %arg5[%c8, %c0_44] : memref<9x32xf32, #tpu.memory_space<vmem>>, vector<1x32xf32>
    %75 = vector.shape_cast %74 : vector<1x32xf32> to vector<32xf32>
    %76 = vector.shape_cast %75 : vector<32xf32> to vector<1x1x32xf32>
    %77 = vector.broadcast %76 : vector<1x1x32xf32> to vector<2x2x32xf32>
    %78 = arith.mulf %73, %77 : vector<2x2x32xf32>
    %79 = arith.addf %70, %78 : vector<2x2x32xf32>
    %80 = vector.shape_cast %79 : vector<2x2x32xf32> to vector<4x32xf32>
    %c0_45 = arith.constant 0 : index
    %c0_46 = arith.constant 0 : index
    %81 = vector.load %arg6[%c0_45, %c0_46] : memref<1x32xf32, #tpu.memory_space<vmem>>, vector<1x32xf32>
    %c0_47 = arith.constant 0 : index
    %c0_48 = arith.constant 0 : index
    %82 = vector.load %arg7[%c0_47, %c0_48] : memref<1x32xf32, #tpu.memory_space<vmem>>, vector<1x32xf32>
    %cst = arith.constant dense<0.000000e+00> : vector<4xf32>
    %83 = vector.multi_reduction <add>, %80, %cst [1] : vector<4x32xf32> to vector<4xf32>
    %84 = vector.shape_cast %83 : vector<4xf32> to vector<4x1xf32>
    %cst_49 = arith.constant 3.200000e+01 : f32
    %85 = vector.broadcast %cst_49 : f32 to vector<4x1xf32>
    %86 = arith.divf %84, %85 : vector<4x1xf32>
    %87 = arith.mulf %80, %80 : vector<4x32xf32>
    %cst_50 = arith.constant dense<0.000000e+00> : vector<4xf32>
    %88 = vector.multi_reduction <add>, %87, %cst_50 [1] : vector<4x32xf32> to vector<4xf32>
    %89 = vector.shape_cast %88 : vector<4xf32> to vector<4x1xf32>
    %cst_51 = arith.constant 3.200000e+01 : f32
    %90 = vector.broadcast %cst_51 : f32 to vector<4x1xf32>
    %91 = arith.divf %89, %90 : vector<4x1xf32>
    %92 = arith.mulf %86, %86 : vector<4x1xf32>
    %93 = arith.subf %91, %92 : vector<4x1xf32>
    %cst_52 = arith.constant 0.000000e+00 : f32
    %94 = vector.broadcast %cst_52 : f32 to vector<4x1xf32>
    %95 = arith.maximumf %93, %94 : vector<4x1xf32>
    %96 = vector.broadcast %86 : vector<4x1xf32> to vector<4x32xf32>
    %97 = arith.subf %80, %96 : vector<4x32xf32>
    %cst_53 = arith.constant 9.99999974E-6 : f32
    %98 = vector.broadcast %cst_53 : f32 to vector<4x1xf32>
    %99 = arith.addf %95, %98 : vector<4x1xf32>
    %100 = math.rsqrt %99 : vector<4x1xf32>
    %101 = vector.broadcast %100 : vector<4x1xf32> to vector<4x32xf32>
    %102 = arith.mulf %97, %101 : vector<4x32xf32>
    %103 = vector.broadcast %81 : vector<1x32xf32> to vector<4x32xf32>
    %104 = arith.mulf %102, %103 : vector<4x32xf32>
    %105 = vector.broadcast %82 : vector<1x32xf32> to vector<4x32xf32>
    %106 = arith.addf %104, %105 : vector<4x32xf32>
    %cst_54 = arith.constant 3.000000e+00 : f32
    %107 = vector.broadcast %cst_54 : f32 to vector<4x32xf32>
    %108 = arith.addf %106, %107 : vector<4x32xf32>
    %cst_55 = arith.constant 0.000000e+00 : f32
    %cst_56 = arith.constant 6.000000e+00 : f32
    %109 = vector.broadcast %cst_55 : f32 to vector<4x32xf32>
    %110 = arith.maximumf %109, %108 : vector<4x32xf32>
    %111 = vector.broadcast %cst_56 : f32 to vector<4x32xf32>
    %112 = arith.minimumf %111, %110 : vector<4x32xf32>
    %113 = arith.mulf %106, %112 : vector<4x32xf32>
    %cst_57 = arith.constant 0.166666672 : f32
    %114 = vector.broadcast %cst_57 : f32 to vector<4x32xf32>
    %115 = arith.mulf %113, %114 : vector<4x32xf32>
    %cst_58 = arith.constant dense<0.000000e+00> : vector<32xf32>
    %116 = vector.multi_reduction <add>, %115, %cst_58 [0] : vector<4x32xf32> to vector<32xf32>
    %117 = vector.shape_cast %116 : vector<32xf32> to vector<1x32xf32>
    %cst_59 = arith.constant 4.000000e+00 : f32
    %118 = vector.broadcast %cst_59 : f32 to vector<1x32xf32>
    %119 = arith.divf %117, %118 : vector<1x32xf32>
    %120 = arith.truncf %119 : vector<1x32xf32> to vector<1x32xbf16>
    %c0_60 = arith.constant 0 : index
    %c0_61 = arith.constant 0 : index
    %121 = vector.load %arg8[%c0_60, %c0_61] : memref<32x8xbf16, #tpu.memory_space<vmem>>, vector<32x8xbf16>
    %cst_62 = arith.constant dense<0.000000e+00> : vector<1x8xf32>
    %122 = tpu.matmul %120, %121, %cst_62 {dimension_numbers = #tpu.dot_dimension_numbers<[1], [0], [0], [1], [0, 0, 1, 1], [], []>} : vector<1x32xbf16>, vector<32x8xbf16>, vector<1x8xf32> -> vector<1x8xf32>
    %c0_63 = arith.constant 0 : index
    %c0_64 = arith.constant 0 : index
    %123 = vector.load %arg9[%c0_63, %c0_64] : memref<1x8xf32, #tpu.memory_space<vmem>>, vector<1x8xf32>
    %124 = arith.addf %122, %123 : vector<1x8xf32>
    %cst_65 = arith.constant 0.000000e+00 : f32
    %125 = vector.broadcast %cst_65 : f32 to vector<1x8xf32>
    %126 = arith.maximumf %124, %125 : vector<1x8xf32>
    %127 = arith.truncf %126 : vector<1x8xf32> to vector<1x8xbf16>
    %c0_66 = arith.constant 0 : index
    %c0_67 = arith.constant 0 : index
    %128 = vector.load %arg10[%c0_66, %c0_67] : memref<8x32xbf16, #tpu.memory_space<vmem>>, vector<8x32xbf16>
    %cst_68 = arith.constant dense<0.000000e+00> : vector<1x32xf32>
    %129 = tpu.matmul %127, %128, %cst_68 {dimension_numbers = #tpu.dot_dimension_numbers<[1], [0], [0], [1], [0, 0, 1, 1], [], []>} : vector<1x8xbf16>, vector<8x32xbf16>, vector<1x32xf32> -> vector<1x32xf32>
    %c0_69 = arith.constant 0 : index
    %c0_70 = arith.constant 0 : index
    %130 = vector.load %arg11[%c0_69, %c0_70] : memref<1x32xf32, #tpu.memory_space<vmem>>, vector<1x32xf32>
    %131 = arith.addf %129, %130 : vector<1x32xf32>
    %cst_71 = arith.constant 3.000000e+00 : f32
    %132 = vector.broadcast %cst_71 : f32 to vector<1x32xf32>
    %133 = arith.addf %131, %132 : vector<1x32xf32>
    %cst_72 = arith.constant 0.000000e+00 : f32
    %cst_73 = arith.constant 6.000000e+00 : f32
    %134 = vector.broadcast %cst_72 : f32 to vector<1x32xf32>
    %135 = arith.maximumf %134, %133 : vector<1x32xf32>
    %136 = vector.broadcast %cst_73 : f32 to vector<1x32xf32>
    %137 = arith.minimumf %136, %135 : vector<1x32xf32>
    %cst_74 = arith.constant 0.166666672 : f32
    %138 = vector.broadcast %cst_74 : f32 to vector<1x32xf32>
    %139 = arith.mulf %137, %138 : vector<1x32xf32>
    %140 = vector.broadcast %139 : vector<1x32xf32> to vector<4x32xf32>
    %141 = arith.mulf %115, %140 : vector<4x32xf32>
    %142 = arith.truncf %141 : vector<4x32xf32> to vector<4x32xbf16>
    %c0_75 = arith.constant 0 : index
    %c0_76 = arith.constant 0 : index
    %143 = vector.load %arg12[%c0_75, %c0_76] : memref<32x32xbf16, #tpu.memory_space<vmem>>, vector<32x32xbf16>
    %cst_77 = arith.constant dense<0.000000e+00> : vector<4x32xf32>
    %144 = tpu.matmul %142, %143, %cst_77 {dimension_numbers = #tpu.dot_dimension_numbers<[1], [0], [0], [1], [0, 0, 1, 1], [], []>} : vector<4x32xbf16>, vector<32x32xbf16>, vector<4x32xf32> -> vector<4x32xf32>
    %c0_78 = arith.constant 0 : index
    %c0_79 = arith.constant 0 : index
    %145 = vector.load %arg13[%c0_78, %c0_79] : memref<1x32xf32, #tpu.memory_space<vmem>>, vector<1x32xf32>
    %c0_80 = arith.constant 0 : index
    %c0_81 = arith.constant 0 : index
    %146 = vector.load %arg14[%c0_80, %c0_81] : memref<1x32xf32, #tpu.memory_space<vmem>>, vector<1x32xf32>
    %cst_82 = arith.constant dense<0.000000e+00> : vector<4xf32>
    %147 = vector.multi_reduction <add>, %144, %cst_82 [1] : vector<4x32xf32> to vector<4xf32>
    %148 = vector.shape_cast %147 : vector<4xf32> to vector<4x1xf32>
    %cst_83 = arith.constant 3.200000e+01 : f32
    %149 = vector.broadcast %cst_83 : f32 to vector<4x1xf32>
    %150 = arith.divf %148, %149 : vector<4x1xf32>
    %151 = arith.mulf %144, %144 : vector<4x32xf32>
    %cst_84 = arith.constant dense<0.000000e+00> : vector<4xf32>
    %152 = vector.multi_reduction <add>, %151, %cst_84 [1] : vector<4x32xf32> to vector<4xf32>
    %153 = vector.shape_cast %152 : vector<4xf32> to vector<4x1xf32>
    %cst_85 = arith.constant 3.200000e+01 : f32
    %154 = vector.broadcast %cst_85 : f32 to vector<4x1xf32>
    %155 = arith.divf %153, %154 : vector<4x1xf32>
    %156 = arith.mulf %150, %150 : vector<4x1xf32>
    %157 = arith.subf %155, %156 : vector<4x1xf32>
    %cst_86 = arith.constant 0.000000e+00 : f32
    %158 = vector.broadcast %cst_86 : f32 to vector<4x1xf32>
    %159 = arith.maximumf %157, %158 : vector<4x1xf32>
    %160 = vector.broadcast %150 : vector<4x1xf32> to vector<4x32xf32>
    %161 = arith.subf %144, %160 : vector<4x32xf32>
    %cst_87 = arith.constant 9.99999974E-6 : f32
    %162 = vector.broadcast %cst_87 : f32 to vector<4x1xf32>
    %163 = arith.addf %159, %162 : vector<4x1xf32>
    %164 = math.rsqrt %163 : vector<4x1xf32>
    %165 = vector.broadcast %164 : vector<4x1xf32> to vector<4x32xf32>
    %166 = arith.mulf %161, %165 : vector<4x32xf32>
    %167 = vector.broadcast %145 : vector<1x32xf32> to vector<4x32xf32>
    %168 = arith.mulf %166, %167 : vector<4x32xf32>
    %169 = vector.broadcast %146 : vector<1x32xf32> to vector<4x32xf32>
    %170 = arith.addf %168, %169 : vector<4x32xf32>
    %c0_88 = arith.constant 0 : index
    %c0_89 = arith.constant 0 : index
    %c0_90 = arith.constant 0 : index
    %171 = vector.load %arg15[%c0_88, %c0_89, %c0_90] : memref<1x4x32xf32, #tpu.memory_space<vmem>>, vector<1x4x32xf32>
    %172 = vector.shape_cast %171 : vector<1x4x32xf32> to vector<4x32xf32>
    %173 = vector.shape_cast %170 : vector<4x32xf32> to vector<1x4x32xf32>
    tpu.vector_store %arg15[%c0_88, %c0_89, %c0_90], %173 {strides = array<i32>} : memref<1x4x32xf32, #tpu.memory_space<vmem>>, vector<1x4x32xf32>,
    return
  }
  func.func @transform_0(%arg0: i32) -> (i32, i32, i32, i32) {
    %c0_i32 = arith.constant 0 : i32
    %c0_i32_0 = arith.constant 0 : i32
    %c0_i32_1 = arith.constant 0 : i32
    %c0_i32_2 = arith.constant 0 : i32
    return %arg0, %c0_i32, %c0_i32_0, %c0_i32_1 : i32, i32, i32, i32
  }
  func.func @transform_1(%arg0: i32) -> (i32, i32, i32, i32) {
    %c0_i32 = arith.constant 0 : i32
    %c0_i32_0 = arith.constant 0 : i32
    %c0_i32_1 = arith.constant 0 : i32
    %c0_i32_2 = arith.constant 0 : i32
    return %arg0, %c0_i32, %c0_i32_0, %c0_i32_1 : i32, i32, i32, i32
  }
  func.func @transform_2(%arg0: i32) -> (i32, i32, i32, i32) {
    %c0_i32 = arith.constant 0 : i32
    %c0_i32_0 = arith.constant 0 : i32
    %c0_i32_1 = arith.constant 0 : i32
    %c0_i32_2 = arith.constant 0 : i32
    return %arg0, %c0_i32, %c0_i32_0, %c0_i32_1 : i32, i32, i32, i32
  }
  func.func @transform_3(%arg0: i32) -> (i32, i32, i32, i32) {
    %c0_i32 = arith.constant 0 : i32
    %c0_i32_0 = arith.constant 0 : i32
    %c0_i32_1 = arith.constant 0 : i32
    %c0_i32_2 = arith.constant 0 : i32
    return %arg0, %c0_i32, %c0_i32_0, %c0_i32_1 : i32, i32, i32, i32
  }
  func.func @transform_4(%arg0: i32) -> (i32, i32) {
    %c0_i32 = arith.constant 0 : i32
    %c0_i32_0 = arith.constant 0 : i32
    %c0_i32_1 = arith.constant 0 : i32
    return %c0_i32, %c0_i32_0 : i32, i32
  }
  func.func @transform_5(%arg0: i32) -> (i32, i32) {
    %c0_i32 = arith.constant 0 : i32
    %c0_i32_0 = arith.constant 0 : i32
    %c0_i32_1 = arith.constant 0 : i32
    return %c0_i32, %c0_i32_0 : i32, i32
  }
  func.func @transform_6(%arg0: i32) -> (i32, i32) {
    %c0_i32 = arith.constant 0 : i32
    %c0_i32_0 = arith.constant 0 : i32
    %c0_i32_1 = arith.constant 0 : i32
    return %c0_i32, %c0_i32_0 : i32, i32
  }
  func.func @transform_7(%arg0: i32) -> (i32, i32) {
    %c0_i32 = arith.constant 0 : i32
    %c0_i32_0 = arith.constant 0 : i32
    %c0_i32_1 = arith.constant 0 : i32
    return %c0_i32, %c0_i32_0 : i32, i32
  }
  func.func @transform_8(%arg0: i32) -> (i32, i32) {
    %c0_i32 = arith.constant 0 : i32
    %c0_i32_0 = arith.constant 0 : i32
    %c0_i32_1 = arith.constant 0 : i32
    return %c0_i32, %c0_i32_0 : i32, i32
  }
  func.func @transform_9(%arg0: i32) -> (i32, i32) {
    %c0_i32 = arith.constant 0 : i32
    %c0_i32_0 = arith.constant 0 : i32
    %c0_i32_1 = arith.constant 0 : i32
    return %c0_i32, %c0_i32_0 : i32, i32
  }
  func.func @transform_10(%arg0: i32) -> (i32, i32) {
    %c0_i32 = arith.constant 0 : i32
    %c0_i32_0 = arith.constant 0 : i32
    %c0_i32_1 = arith.constant 0 : i32
    return %c0_i32, %c0_i32_0 : i32, i32
  }
  func.func @transform_11(%arg0: i32) -> (i32, i32) {
    %c0_i32 = arith.constant 0 : i32
    %c0_i32_0 = arith.constant 0 : i32
    %c0_i32_1 = arith.constant 0 : i32
    return %c0_i32, %c0_i32_0 : i32, i32
  }
  func.func @transform_12(%arg0: i32) -> (i32, i32) {
    %c0_i32 = arith.constant 0 : i32
    %c0_i32_0 = arith.constant 0 : i32
    %c0_i32_1 = arith.constant 0 : i32
    return %c0_i32, %c0_i32_0 : i32, i32
  }
  func.func @transform_13(%arg0: i32) -> (i32, i32) {
    %c0_i32 = arith.constant 0 : i32
    %c0_i32_0 = arith.constant 0 : i32
    %c0_i32_1 = arith.constant 0 : i32
    return %c0_i32, %c0_i32_0 : i32, i32
  }
  func.func @transform_14(%arg0: i32) -> (i32, i32, i32) {
    %c0_i32 = arith.constant 0 : i32
    %c0_i32_0 = arith.constant 0 : i32
    %c0_i32_1 = arith.constant 0 : i32
    return %arg0, %c0_i32, %c0_i32_0 : i32, i32, i32
  }
}

</mosaic_0001>

<bundles_post_ra>
// kernel: ldp_net_projector.3
= control target key start
LH: loop header
LB: loop body
LE: loop exit
PB: predicated region body
PF: predicated region fallthrough
CT: control target
= control target key end

     0   :  { %10 = vsyncpa [#allocation3], 0  ;;  %s1436_s0 = inlined_call_operand.hbm [shape: f32[2,16,48], index: 0, kind: input, shape index: {}]   ;;  %s1437_s1 = inlined_call_operand.hbm [shape: bf16[48,32], index: 1, kind: input, shape index: {}]   ;;  %s1438_s2 = inlined_call_operand.hbm [shape: f32[1,32], index: 2, kind: input, shape index: {}]   ;;  %s1439_s3 = inlined_call_operand.hbm [shape: bf16[32,32], index: 3, kind: input, shape index: {}]   ;;  %s1440_s4 = inlined_call_operand.hbm [shape: f32[1,32], index: 4, kind: input, shape index: {}]   ;;  %s1441_s5 = inlined_call_operand.hbm [shape: bf16[2,16,32], index: 5, kind: output, shape index: {}]  }
   0x1   :  { %12 = vsyncpa [#allocation3 + $0x1], 0 }
   0x2   :  { %13 = vsyncpa [#allocation6], 0 }
   0x3   :  { %14 = vsyncpa [#allocation9], 0 }
   0x4   :  { %15 = vsyncpa [#allocation4], 0 }
   0x5   :  { %17 = vsyncpa [#allocation4 + $0x1], 0  ;;  %s1137_s18 = smov 0   ;;  %s1139_s19 = smov 0  }
   0x6   :  { %s1141_s20 = smov 0   ;;  %s1143_s21 = smov 0  }
   0x7   :  { %s1145_s22 = smov 0   ;;  %s1147_s23 = smov 0  }
   0x8 LB: > { %1448 = sst [smem:[#allocation16_spill]] %s1070_s18  ;;  %s670_s24 = sadd.s32 4294967295, %s1090_s23   ;;  %s1090_s23 = sphi %s1147_s23, %s23_s23   ;;  %s1086_s22 = sphi %s1145_s22, %s1471_s22   ;;  %s1082_s21 = sphi %s1143_s21, %s1470_s21   ;;  %s1078_s20 = sphi %s1141_s20, %s1469_s20   ;;  %s1074_s19 = sphi %s1139_s19, %s1468_s19   ;;  %s1070_s18 = sphi %s1137_s18, %s1467_s18  }
   0x9   : > { %s671_s25 = sadd.s32 4294967294, %s1090_s23   ;;  %p57_p0 = scmp.ne.s32.totalorder %s1074_s19, %s1070_s18 }
   0xa   : > { %p1171_p1 = scmp.eq.s32.totalorder %s670_s24, 0  ;;  %p1175_p2 = scmp.eq.s32.totalorder %s670_s24, 1 }
   0xb   : > { %p173_p3 = scmp.eq.s32.totalorder %s671_s25, 1  ;;  %p672_p5 = scmp.ge.s32.totalorder %s1090_s23, 1 }
   0xc   : > { %s1449_s26 = scalar_select %p1171_p1, 1, 0 }
   0xd   : > { %s1450_s27 = scalar_select %p1175_p2, 1, 0 }
   0xe   : > { %p1181_p4 = por %p1171_p1, %p57_p0  ;;  %p1186_p6 = por %p173_p3, %p57_p0 }
   0xf   : > { %p180_p7 = scmp.lt.s32.totalorder %s1090_s23, 3  ;;  %s1092_s6 = smov [#allocation5]  }
  0x10   : > { %s1451_s28 = scalar_select %p1181_p4, 1, 0 }
  0x11   : > { %s1452_s29 = scalar_select %p1186_p6, 1, 0 }
  0x12   : > { %p1191_p8 = pnand %p672_p5, %p180_p7  ;;  %s192_s7 = sshll.u32 %s1092_s6, 4  ;;  %s1195_s7 = int_to_ptr.vmem [resolvable:$true] %s192_s7 }
  0x13   : > { %1453 = sst [smem:[#allocation17_spill]] %s1452_s29  ;;  %s1093_s9 = smov [#allocation8]  }
  0x14   : > { %s1454_s30 = scalar_select %p1191_p8, 1, 0 }
  0x15   : > { %p753_p9 = pneg %p1191_p8  ;;  %s216_s10 = sshll.u32 %s1093_s9, 4  ;;  %s1206_s10 = int_to_ptr.vmem [resolvable:$true] %s216_s10 }
  0x16   : > { %s1094_s11 = smov [#allocation7]   ;;  %s858_s15 = scalar_lea.hbm %s1437_s1, 384 }
  0x17   : > { %p1202_p11 = pnand %p753_p9, %p1171_p1  ;;  %s1208_s12 = sshll.u32 %s1094_s11, 4  ;;  %s207_s12 = int_to_ptr.vmem [resolvable:$true] %s1208_s12 }
  0x18   : > { %p859_p12 = scmp.ne.s32.totalorder %s1437_s1, %s858_s15  ;;  %p865_p5 = scmp.lt.u32.totalorder %s858_s15, %s1437_s1 }
  0x19   : > { %p1218_p13 = pneg %p1202_p11 }
  0x1b   : > { %p861_p0 = pnand %p1218_p13, %p859_p12 }
  0x1d   : > { %p862_p3 = pneg %p861_p0 }
  0x1f   : > { %p867_p7 = pnand %p865_p5, %p862_p3 }
  0x21   : > { %870 = shalt.err (!%p867_p7)
}
  0x22   : > { %s871_s9 = scalar_lea.vmem %s1195_s7, 384  ;;  %p879_p1 = scmp.lt.s32.totalorder %s1195_s7, %s1195_s7 }
  0x23   : > { %p872_p9 = scmp.ne.s32.totalorder %s1195_s7, %s871_s9  ;;  %p880_p4 = scmp.lt.s32.totalorder %s871_s9, %s871_s9 }
  0x25   : > { %p874_p10 = pnand %p872_p9, %p1218_p13  ;;  %p881_p12 = por %p880_p4, %p879_p1 }
  0x27   : > { %p875_p6 = pneg %p874_p10 }
  0x29   : > { %p882_p0 = pnand %p881_p12, %p875_p6 }
  0x2b   : > { %885 = shalt.err (!%p882_p0)
}
  0x2c   : > { %s1095_s11 = smov 64   ;;  %s1096_s13 = smov 4  }
  0x2d   : > { %756 = dma.hbm_to_vmem [thread:$0]  (!%p1202_p11), %s1437_s1, 384, %s1195_s7, [#allocation6], %s1095_s11, %s1095_s11, %s1096_s13  }
  0x2e   : > { %s886_s25 = scalar_lea.hbm %s1439_s3, 256 }
  0x2f   : > { %p887_p1 = scmp.ne.s32.totalorder %s1439_s3, %s886_s25  ;;  %p893_p10 = scmp.lt.u32.totalorder %s886_s25, %s1439_s3 }
  0x31   : > { %p889_p4 = pnand %p887_p1, %p1218_p13 }
  0x33   : > { %p890_p6 = pneg %p889_p4 }
  0x35   : > { %p895_p3 = pnand %p893_p10, %p890_p6 }
  0x37   : > { %898 = shalt.err (!%p895_p3)
}
  0x38   : > { %s899_s7 = scalar_lea.vmem %s1206_s10, 256  ;;  %p907_p12 = scmp.lt.s32.totalorder %s1206_s10, %s1206_s10 }
  0x39   : > { %p900_p5 = scmp.ne.s32.totalorder %s1206_s10, %s899_s7  ;;  %p908_p0 = scmp.lt.s32.totalorder %s899_s7, %s899_s7 }
  0x3b   : > { %p902_p7 = pnand %p900_p5, %p1218_p13  ;;  %p909_p1 = por %p908_p0, %p907_p12 }
  0x3d   : > { %p903_p9 = pneg %p902_p7 }
  0x3f   : > { %p910_p4 = pnand %p909_p1, %p903_p9 }
  0x41   : > { %913 = shalt.err (!%p910_p4)
}
  0x42   : > { %762 = dma.hbm_to_vmem [thread:$0]  (!%p1202_p11), %s1439_s3, 256, %s1206_s10, [#allocation9], %s1095_s11, %s1095_s11, %s1096_s13  }
  0x43   : > { %s914_s16 = scalar_lea.hbm %s1438_s2, 16 }
  0x44   : > { %p915_p6 = scmp.ne.s32.totalorder %s1438_s2, %s914_s16  ;;  %p921_p5 = scmp.lt.u32.totalorder %s914_s16, %s1438_s2 }
  0x46   : > { %p917_p10 = pnand %p915_p6, %p1218_p13 }
  0x48   : > { %p918_p3 = pneg %p917_p10 }
  0x4a   : > { %p923_p7 = pnand %p921_p5, %p918_p3 }
  0x4c   : > { %926 = shalt.err (!%p923_p7)
}
  0x4d   : > { %s927_s7 = scalar_lea.vmem %s207_s12, 16  ;;  %s934_s10 = scalar_lea.vmem %s207_s12, 32 }
  0x4e   : > { %p928_p9 = scmp.ne.s32.totalorder %s207_s12, %s927_s7  ;;  %p935_p1 = scmp.lt.s32.totalorder %s207_s12, %s207_s12 }
  0x4f   : > { %p936_p4 = scmp.lt.s32.totalorder %s934_s10, %s927_s7 }
  0x50   : > { %p930_p12 = pnand %p928_p9, %p1218_p13 }
  0x51   : > { %p937_p8 = por %p936_p4, %p935_p1 }
  0x52   : > { %p931_p0 = pneg %p930_p12 }
  0x54   : > { %p938_p2 = pnand %p937_p8, %p931_p0 }
  0x56   : > { %941 = shalt.err (!%p938_p2)
}
  0x57   : > { %759 = dma.hbm_to_vmem [thread:$0]  (!%p1202_p11), %s1438_s2, 16, %s207_s12, [#allocation6]  }
  0x58   : > { %s1097_s18 = smov [#allocation10]   ;;  %s942_s16 = scalar_lea.hbm %s1440_s4, 16 }
  0x59   : > { %s230_s29 = sshll.u32 %s1097_s18, 4  ;;  %p943_p6 = scmp.ne.s32.totalorder %s1440_s4, %s942_s16  ;;  %s231_s29 = int_to_ptr.vmem [resolvable:$true] %s230_s29 }
  0x5a   : > { %p949_p10 = scmp.lt.u32.totalorder %s942_s16, %s1440_s4 }
  0x5b   : > { %p945_p2 = pnand %p943_p6, %p1218_p13 }
  0x5d   : > { %p946_p8 = pneg %p945_p2 }
  0x5f   : > { %p951_p3 = pnand %p949_p10, %p946_p8 }
  0x61   : > { %954 = shalt.err (!%p951_p3)
}
  0x62   : > { %s955_s12 = scalar_lea.vmem %s231_s29, 16  ;;  %s962_s7 = scalar_lea.vmem %s231_s29, 32 }
  0x63   : > { %p956_p5 = scmp.ne.s32.totalorder %s231_s29, %s955_s12  ;;  %p963_p12 = scmp.lt.s32.totalorder %s231_s29, %s231_s29 }
  0x64   : > { %p964_p0 = scmp.lt.s32.totalorder %s962_s7, %s955_s12 }
  0x65   : > { %p958_p7 = pnand %p956_p5, %p1218_p13 }
  0x66   : > { %p965_p1 = por %p964_p0, %p963_p12 }
  0x67   : > { %p959_p9 = pneg %p958_p7 }
  0x69   : > { %p966_p4 = pnand %p965_p1, %p959_p9 }
  0x6b   : > { %969 = shalt.err (!%p966_p4)
}
  0x6c   : > { %765 = dma.hbm_to_vmem [thread:$0]  (!%p1202_p11), %s1440_s4, 16, %s231_s29, [#allocation9]  }
  0x6d   : > { %s35_s24 = sadd.s32 1, %s1086_s22  ;;  %s44_s13 = sadd.s32 1, %s1078_s20 }
  0x6e   : > { %p37_p13 = scmp.ge.s32.totalorder %s35_s24, 2  ;;  %p51_p6 = scmp.ne.s32.totalorder %s1078_s20, %s1074_s19 }
  0x6f   : > { %p52_p2 = scmp.eq.s32.totalorder %s1090_s23, 0  ;;  %p778_p8 = scmp.lt.s32.totalorder %s1090_s23, 2 }
  0x70   : > { %s1473_s24 = smov (%p37_p13, %s35_s24), 0  ;;  %p1457_p3 = scmp.ne.s32.totalorder %s1450_s27, 0 }
  0x71   : > { %p53_p10 = por %p52_p2, %p51_p6  ;;  %s39_s18 = ssub.s32 %s1086_s22, %s1473_s24 }
  0x72   : > { %p1309_p5 = por %p1457_p3, %p51_p6  ;;  %s241_s14 = sand.u32 1, %s1078_s20  }
  0x73   : > { %p42_p7 = scmp.eq.s32.totalorder %s39_s18, 0  ;;  %s678_s29 = sshll.u32 %s241_s14, 4 }
  0x74   : > { %s704_s15 = sshll.u32 %s1086_s22, 8  ;;  %s245_s27 = scalar_lea.vmem [#allocation2], %s678_s29 }
  0x75   : > { %s1318_s16 = scalar_select %p42_p7, %s1078_s20, %s44_s13  }
  0x76   : > { %s1323_s6 = scalar_lea.hbm %s1436_s0, %s704_s15  ;;  %s254_s9 = sshll.u32 %s245_s27, 4  ;;  %s1331_s9 = int_to_ptr.vmem [resolvable:$true] %s254_s9 }
  0x77   : > { %p1327_p11 = pnand %p778_p8, %p53_p10  ;;  %s1333_s7 = scalar_lea.sflag [#allocation3], %s241_s14 }
  0x78   : > { %s970_s10 = scalar_lea.hbm %s1323_s6, 256  ;;  %s975_s18 = scalar_lea.hbm %s1436_s0, 512 }
  0x79   : > { %p971_p9 = scmp.ne.s32.totalorder %s1323_s6, %s970_s10  ;;  %p972_p12 = pneg %p1327_p11 }
  0x7a   : > { %p976_p4 = scmp.lt.u32.totalorder %s1323_s6, %s1436_s0  ;;  %p977_p13 = scmp.lt.u32.totalorder %s975_s18, %s970_s10 }
  0x7b   : > { %p973_p0 = pnand %p972_p12, %p971_p9  ;;  %p979_p2 = scmp.lt.u32.totalorder %s970_s10, %s1323_s6 }
  0x7c   : > { %p978_p6 = por %p977_p13, %p976_p4 }
  0x7d   : > { %p974_p1 = pneg %p973_p0 }
  0x7e   : > { %p980_p8 = por %p979_p2, %p978_p6 }
  0x80   : > { %p981_p10 = pnand %p980_p8, %p974_p1 }
  0x82   : > { %984 = shalt.err (!%p981_p10)
}
  0x83   : > { %s985_s14 = scalar_lea.vmem %s1331_s9, 256  ;;  %s1098_s17 = smov [#allocation2]  }
  0x84   : > { %p986_p3 = scmp.ne.s32.totalorder %s1331_s9, %s985_s14  ;;  %s990_s25 = sshll.u32 %s1098_s17, 4  ;;  %s991_s25 = int_to_ptr.vmem [resolvable:$false] %s990_s25 }
  0x85   : > { %s992_s27 = scalar_lea.vmem %s991_s25, 512  ;;  %p993_p0 = scmp.lt.s32.totalorder %s1331_s9, %s991_s25 }
  0x86   : > { %p988_p7 = pnand %p986_p3, %p972_p12  ;;  %p994_p4 = scmp.lt.s32.totalorder %s992_s27, %s985_s14 }
  0x88   : > { %p989_p9 = pneg %p988_p7  ;;  %p995_p13 = por %p994_p4, %p993_p0 }
  0x8a   : > { %p996_p6 = pnand %p995_p13, %p989_p9 }
  0x8c   : > { %999 = shalt.err (!%p996_p6)
}
  0x8d   : > { %s1099_s10 = smov 128   ;;  %s1100_s11 = smov 8  }
  0x8e   : > { %769 = dma.hbm_to_vmem [thread:$0]  (!%p1327_p11), %s1323_s6, 256, %s1331_s9, %s1333_s7, %s1099_s10, %s1099_s10, %s1100_s11  }
  0x8f   : > { %p1460_p12 = scmp.ne.s32.totalorder %s1454_s30, 0 }
  0x90   : > { %s1364_s13 = sand.u32 (!%p1460_p12), 1, %s1074_s19   ;;  %p1461_p1 = scmp.ne.s32.totalorder (!%p1460_p12), %s1451_s28, 0 }
  0x91   : > { %266 = sbr.rel (%p1460_p12) target bundleno = 670 (0x29e), region = 40  ;;  %s682_s18 = sshll.u32 (!%p1460_p12), %s1364_s13, 4 }
  0x92   : > { %s269_s29 = scalar_lea.sflag (!%p1460_p12), [#allocation3], %s1364_s13  ;;  %s272_s15 = scalar_lea.vmem (!%p1460_p12), [#allocation2], %s682_s18 }
  0x98   : > { %1053 = dma.done.wait (%p1461_p1), %s269_s29, 256  }
  0x99   : > { %1055 = vsyncadd (%p1461_p1), %s269_s29, 4294967040  ;;  %p1462_p2 = scmp.ne.s32.totalorder %s1449_s26, 0 }
  0x9b   : > { %1057 = dma.done.wait (%p1462_p2), [#allocation6], 400  }
  0x9c   : > { %1059 = vsyncadd (%p1462_p2), [#allocation6], 4294966896 }
  0x9d   : > { %1061 = dma.done.wait (%p1462_p2), [#allocation9], 272  }
  0x9e   : > { %1063 = vsyncadd (%p1462_p2), [#allocation9], 4294967024  ;;  %v1101_v0 = vmov 0.0   ;;  %vm1102_vm0 = vmmov 0   ;;  %v845_v1 = vld [vmem:[#allocation5] sm:$0xff]   ;;  %v846_v2 = vld [vmem:[#allocation5 + $0x8] sm:$0xff]  }
  0x9f   : > { %715 = vmatprep.subr.bf16.mxu0 %v1101_v0  ;;  %721 = vmatprep.mubr.msk.bf16.mxu0 %vm1102_vm0, %v1101_v0  ;;  %v847_v3 = vld [vmem:[#allocation5 + $0x10] sm:$0xff]   ;;  %v319_v5 = vld [vmem:[%s272_s15 + $0x8] sm:$0xff]  ;;  %vm352_vm1 = vcmask 392192   ;;  %v1103_v54 = vmov -1.0   ;;  %vm473_vm4 = vcmask 261120   ;;  %s687_s26 = sshll.u32 %s1364_s13, 3 }
  0xa0   : > { %725 = vmatprep.subr.bf16.mxu1 %v1101_v0  ;;  %729 = vmatprep.mubr.msk.bf16.mxu1 %vm1102_vm0, %v1101_v0  ;;  %v318_v4 = vld [vmem:[%s272_s15] sm:$0xff]  ;;  %v688_v9 = vld [vmem:[#allocation7] ss:$0 sm:$0xff]  ;;  %s314_s28 = scalar_lea.vmem [#allocation11], %s687_s26  ;;  %s707_s6 = sshll.u32 %s1082_s21, 7  ;;  %vm526_vm5 = vcmask 257024  }
  0xa1   : > { %716 = vmatpush3.bf16.msra.mxu0 %v845_v1  ;;  %v320_v6 = vpack.c.bf16 %v319_v5, %v318_v4  ;;  %v848_v7 = vld [vmem:[#allocation8] sm:$0xff]   ;;  %v849_v8 = vld [vmem:[#allocation8 + $0x8] sm:$0xff]   ;;  %v693_v4 = vld [vmem:[#allocation10] ss:$0 sm:$0xff]  ;;  %s545_s30 = sshll.u32 %s314_s28, 4  ;;  %s1385_s7 = scalar_lea.hbm %s1441_s5, %s707_s6  ;;  %s1387_s30 = int_to_ptr.vmem [resolvable:$true] %s545_s30 }
  0xa2   : > { %717 = vmatprep.subr.bf16.mxu0 %v1101_v0  ;;  %726 = vmatpush3.bf16.msra.mxu1 %v848_v7  ;;  %s530_s14 = scalar_lea.sflag [#allocation4], %s1364_s13  ;;  %s1000_s21 = scalar_lea.vmem %s1387_s30, 128 }
  0xa3   : > { %727 = vmatprep.subr.bf16.mxu1 %v1101_v0  ;;  %p1001_p11 = scmp.ne.s32.totalorder %s1387_s30, %s1000_s21  ;;  %s1104_s17 = smov [#allocation11]  }
  0xa4   : > { %s1004_s25 = sshll.u32 %s1104_s17, 4  ;;  %s1005_s25 = int_to_ptr.vmem [resolvable:$false] %s1004_s25 }
  0xa5   : > { %718 = vmatpush3.bf16.msra.mxu0 %v846_v2  ;;  %p1002_p8 = pnand %p1001_p11, %p1309_p5  ;;  %s1006_s27 = scalar_lea.vmem %s1005_s25, 256 }
  0xa6   : > { %719 = vmatprep.subr.bf16.mxu0 %v1101_v0  ;;  %728 = vmatpush3.bf16.msra.mxu1 %v849_v8  ;;  %p1007_p3 = scmp.lt.s32.totalorder %s1387_s30, %s1005_s25  ;;  %p1008_p7 = scmp.lt.s32.totalorder %s1006_s27, %s1000_s21 }
  0xa7   : > { %p1003_p10 = pneg %p1002_p8 }
  0xa8   : > { %p1009_p9 = por %p1008_p7, %p1007_p3 }
  0xa9   : > { %720 = vmatpush3.bf16.msra.mxu0 %v847_v3 }
  0xaa   : > { %p1010_p0 = pnand %p1009_p9, %p1003_p10 }
  0xac   : > { %722 = vmatmul.mubr.msk.bf16.vlgmr.msra.gmra.mrb[0].mxu0 %vm352_vm1, %v320_v6 }
 0x17f   : > { %v390_v10 = vpop.f32.mrb[0].mxu0 }
 0x180   : > { %v391_v11 = vadd.f32 %v688_v9, %v390_v10  ;;  %v723_v12 = vpop.f32.mrb[1].mxu0 }
 0x181   : > { %v393_v13 = vpop.f32.mrb[2].mxu0 }
 0x182   : > { %v399_v14 = vmul.f32 0.70710677, %v391_v11  ;;  %v394_v15 = vadd.f32 %v688_v9, %v393_v13  ;;  %v724_v16 = vpop.f32.mrb[3].mxu0  ;;  %v397_v62 = vmul.f32 0.5, %v391_v11 }
 0x184   : > { %v405_v17 = vand.u32 2147483647, %v399_v14  ;;  %v400_v18 = vmul.f32 0.70710677, %v394_v15  ;;  %vm401_vm2 = vcmp.ge.f32.partialorder %v399_v14, 0.0  ;;  %v398_v63 = vmul.f32 0.5, %v394_v15 }
 0x185   : > { %v403_v55 = vsel %vm401_vm2, 1.0, %v1103_v54 }
 0x186   : > { %v407_v19 = vmul.f32 0.3275911, %v405_v17  ;;  %v406_v20 = vand.u32 2147483647, %v400_v18  ;;  %v431_v24 = vsub.f32 0.0, %v405_v17  ;;  %vm402_vm3 = vcmp.ge.f32.partialorder %v400_v18, 0.0 }
 0x187   : > { %v404_v59 = vsel %vm402_vm3, 1.0, %v1103_v54 }
 0x188   : > { %v409_v21 = vadd.f32 1.0, %v407_v19  ;;  %v408_v22 = vmul.f32 0.3275911, %v406_v20  ;;  %v432_v25 = vsub.f32 0.0, %v406_v20  ;;  %v433_v27 = vmul.f32 %v431_v24, %v405_v17 }
 0x18a   : > { %850 = vrcp.f32 %v409_v21  ;;  %v410_v23 = vadd.f32 1.0, %v408_v22  ;;  %v434_v31 = vmul.f32 %v432_v25, %v406_v20  ;;  %v435_v32 = vmul.f32 1.442695, %v433_v27 }
 0x18c   : > { %852 = vrcp.f32 %v410_v23  ;;  %v437_v37 = vmul.f32 1.442695, %v434_v31 }
 0x18d   : > { %854 = vpow2.f32 %v435_v32 }
 0x18e   : > { %856 = vpow2.f32 %v437_v37 }
 0x194   : > { %v851_v26 = vpop.eup %850 }
 0x195   : > { %v413_v28 = vmul.f32 1.0614054, %v851_v26 }
 0x196   : > { %v853_v29 = vpop.eup %852 }
 0x197   : > { %v415_v30 = vadd.f32 -1.4531521, %v413_v28  ;;  %v414_v33 = vmul.f32 1.0614054, %v853_v29  ;;  %v855_v48 = vpop.eup %854 }
 0x198   : > { %v857_v52 = vpop.eup %856 }
 0x199   : > { %v417_v34 = vmul.f32 %v851_v26, %v415_v30  ;;  %v416_v35 = vadd.f32 -1.4531521, %v414_v33 }
 0x19b   : > { %v419_v36 = vadd.f32 1.4214138, %v417_v34  ;;  %v418_v38 = vmul.f32 %v853_v29, %v416_v35 }
 0x19d   : > { %v421_v39 = vmul.f32 %v851_v26, %v419_v36  ;;  %v420_v40 = vadd.f32 1.4214138, %v418_v38 }
 0x19f   : > { %v423_v41 = vadd.f32 -0.28449672, %v421_v39  ;;  %v422_v42 = vmul.f32 %v853_v29, %v420_v40 }
 0x1a1   : > { %v425_v43 = vmul.f32 %v851_v26, %v423_v41  ;;  %v424_v44 = vadd.f32 -0.28449672, %v422_v42 }
 0x1a3   : > { %v427_v45 = vadd.f32 0.2548296, %v425_v43  ;;  %v426_v46 = vmul.f32 %v853_v29, %v424_v44 }
 0x1a5   : > { %v429_v47 = vmul.f32 %v851_v26, %v427_v45  ;;  %v428_v49 = vadd.f32 0.2548296, %v426_v46 }
 0x1a7   : > { %v439_v50 = vmul.f32 %v855_v48, %v429_v47  ;;  %v430_v51 = vmul.f32 %v853_v29, %v428_v49 }
 0x1a9   : > { %v441_v53 = vsub.f32 1.0, %v439_v50  ;;  %v440_v56 = vmul.f32 %v857_v52, %v430_v51 }
 0x1ab   : > { %v443_v57 = vmul.f32 %v441_v53, %v403_v55  ;;  %v442_v58 = vsub.f32 1.0, %v440_v56 }
 0x1ad   : > { %v445_v60 = vadd.f32 1.0, %v443_v57  ;;  %v444_v61 = vmul.f32 %v442_v58, %v404_v59 }
 0x1af   : > { %v446_v0 = vadd.f32 1.0, %v444_v61  ;;  %v447_v1 = vmul.f32 %v445_v60, %v397_v62 }
 0x1b1   : > { %v448_v2 = vmul.f32 %v446_v0, %v398_v63 }
 0x1b3   : > { %v449_v3 = vpack.c.bf16 %v448_v2, %v447_v1 }
 0x1b5   : > { %730 = vmatmul.mubr.msk.bf16.vlgmr.msra.gmra.mrb[0].mxu1 %vm473_vm4, %v449_v3 }
 0x288   : > { %v511_v5 = vpop.f32.mrb[0].mxu1 }
 0x289   : > { %v512_v6 = vadd.f32 %v693_v4, %v511_v5  ;;  %v731_v7 = vpop.f32.mrb[1].mxu1 }
 0x28a   : > { %v514_v8 = vpop.f32.mrb[2].mxu1 }
 0x28b   : > { %v705_v9 = vpack.c.bf16 %v512_v6, %v512_v6  ;;  %v515_v10 = vadd.f32 %v693_v4, %v514_v8  ;;  %v732_v11 = vpop.f32.mrb[3].mxu1 }
 0x28d   : > { %527 = vst.msk [vmem:[%s314_s28] sm:$0xf] %vm526_vm5, %v705_v9  ;;  %v706_v12 = vpack.c.bf16 %v515_v10, %v515_v10 }
 0x28f   : > { %528 = vst.msk [vmem:[%s314_s28 + $0x4] sm:$0xf] %vm526_vm5, %v706_v12 }
 0x290   : > { %1013 = shalt.err (!%p1010_p0)
}
 0x291   : > { %s1014_s10 = scalar_lea.hbm %s1385_s7, 128  ;;  %s1018_s29 = scalar_lea.hbm %s1441_s5, 256 }
 0x292   : > { %p1015_p4 = scmp.ne.s32.totalorder %s1385_s7, %s1014_s10  ;;  %p1019_p12 = scmp.lt.u32.totalorder %s1385_s7, %s1441_s5 }
 0x293   : > { %p1020_p1 = scmp.lt.u32.totalorder %s1018_s29, %s1014_s10  ;;  %p1022_p11 = scmp.lt.u32.totalorder %s1014_s10, %s1385_s7 }
 0x294   : > { %p1016_p13 = pnand %p1015_p4, %p1309_p5 }
 0x295   : > { %p1021_p2 = por %p1020_p1, %p1019_p12 }
 0x296   : > { %p1017_p6 = pneg %p1016_p13 }
 0x297   : > { %p1023_p8 = por %p1022_p11, %p1021_p2 }
 0x299   : > { %p1024_p10 = pnand %p1023_p8, %p1017_p6 }
 0x29b   : > { %1027 = shalt.err (!%p1024_p10)
}
 0x29c   : > { %s1105_s28 = smov 64   ;;  %s1106_s6 = smov 4  }
 0x29d   : > { %751 = dma.vmem_to_hbm [thread:$0]  (%p1309_p5), %s1387_s30, 128, %s1385_s7, %s530_s14, %s1105_s28, %s1105_s28, %s1106_s6  }
 0x29e PF: > { %s1463_s9 = sld [smem:[#allocation16_spill]]  ;;  %s1464_s12 = sld [smem:[#allocation17_spill]] }
 0x29f   : > { %p1466_p7 = scmp.ge.s32.totalorder %s1090_s23, 2 }
 0x2a4   : > { %s560_s21 = sand.u32 1, %s1463_s9   ;;  %p1465_p3 = scmp.ne.s32.totalorder %s1464_s12, 0 }
 0x2a5   : > { %s561_s17 = scalar_lea.sflag [#allocation4], %s560_s21 }
 0x2a6   : > { %p771_p9 = pnand %p1466_p7, %p1465_p3 }
 0x2a8   : > { %1065 = dma.done.wait (!%p771_p9), %s561_s17, 128  }
 0x2a9   : > { %1067 = vsyncadd (!%p771_p9), %s561_s17, 4294967168  ;;  %s23_s23 = sadd.s32 1, %s1090_s23   ;;  %s1467_s18 = smov %s1074_s19 }
 0x2aa   : > { %p20_p0 = scmp.ge.s32.totalorder %s23_s23, 4   ;;  %s1468_s19 = smov %s1078_s20 }
 0x2ab   : > { %s1469_s20 = smov %s1318_s16  ;;  %s1470_s21 = smov %s1086_s22 }
 0x2ac   : > { %s1471_s22 = smov %s1473_s24  ;;  %22 = sbr.rel (!%p20_p0) target bundleno = 8 (0x8), region = 101 }
 0x2b3   :  { %566 = vsyncpa [#allocation3], 1 }
 0x2b4   :  { %568 = vsyncpa [#allocation3 + $0x1], 1 }
 0x2b5   :  { %569 = vsyncpa [#allocation6], 1 }
 0x2b6   :  { %570 = vsyncpa [#allocation9], 1 }
 0x2b7   :  { %571 = vsyncpa [#allocation4], 1 }
 0x2b8   :  { %573 = vsyncpa [#allocation4 + $0x1], 1 }

// kernel: ldp_net_projector.4
= control target key start
LH: loop header
LB: loop body
LE: loop exit
PB: predicated region body
PF: predicated region fallthrough
CT: control target
= control target key end

     0   :  { %s2853_s0 = inlined_call_operand.hbm [shape: bf16[2,6,6,32], index: 0, kind: input, shape index: {}]   ;;  %s2854_s1 = inlined_call_operand.hbm [shape: f32[9,32], index: 1, kind: input, shape index: {}]   ;;  %s2855_s2 = inlined_call_operand.hbm [shape: f32[1,32], index: 2, kind: input, shape index: {}]   ;;  %s2856_s3 = inlined_call_operand.hbm [shape: f32[1,32], index: 3, kind: input, shape index: {}]   ;;  %s2857_s4 = inlined_call_operand.hbm [shape: bf16[32,8], index: 4, kind: input, shape index: {}]   ;;  %s2858_s5 = inlined_call_operand.hbm [shape: f32[1,8], index: 5, kind: input, shape index: {}]   ;;  %s2859_s6 = inlined_call_operand.hbm [shape: bf16[8,32], index: 6, kind: input, shape index: {}]   ;;  %s2860_s7 = inlined_call_operand.hbm [shape: f32[1,32], index: 7, kind: input, shape index: {}]   ;;  %s2861_s8 = inlined_call_operand.hbm [shape: bf16[32,32], index: 8, kind: input, shape index: {}]   ;;  %s2862_s9 = inlined_call_operand.hbm [shape: f32[1,32], index: 9, kind: input, shape index: {}]   ;;  %s2863_s10 = inlined_call_operand.hbm [shape: f32[1,32], index: 10, kind: input, shape index: {}]   ;;  %s2864_s11 = inlined_call_operand.hbm [shape: bf16[2,16,32], index: 11, kind: output, shape index: {}]  }
   0x1   :  { %2873 = sst [smem:[#allocation29_spill]] %s2853_s0 }
   0x2   :  { %2874 = sst [smem:[#allocation30_spill]] %s2854_s1 }
   0x3   :  { %2875 = sst [smem:[#allocation31_spill]] %s2855_s2 }
   0x4   :  { %2876 = sst [smem:[#allocation32_spill]] %s2856_s3 }
   0x5   :  { %2877 = sst [smem:[#allocation33_spill]] %s2864_s11 }
   0x6   :  { %16 = vsyncpa [#allocation3], 0 }
   0x7   :  { %18 = vsyncpa [#allocation3 + $0x1], 0 }
   0x8   :  { %19 = vsyncpa [#allocation6], 0 }
   0x9   :  { %20 = vsyncpa [#allocation9], 0 }
   0xa   :  { %21 = vsyncpa [#allocation12], 0 }
   0xb   :  { %22 = vsyncpa [#allocation15], 0 }
   0xc   :  { %23 = vsyncpa [#allocation18], 0 }
   0xd   :  { %24 = vsyncpa [#allocation4], 0 }
   0xe   :  { %26 = vsyncpa [#allocation4 + $0x1], 0  ;;  %s2252_s17 = smov 0   ;;  %s2254_s18 = smov 0  }
   0xf   :  { %s2256_s19 = smov 0   ;;  %s2258_s20 = smov 0  }
  0x10 LB: > { %s2170_s21 = smov [#allocation5]   ;;  %s2273_s23 = sadd.s32 4294967295, %s2168_s20   ;;  %s2168_s20 = sphi %s2258_s20, %s2914_s20   ;;  %s2164_s19 = sphi %s2256_s19, %s2913_s19   ;;  %s2160_s18 = sphi %s2254_s18, %s2912_s18   ;;  %s2156_s17 = sphi %s2252_s17, %s2911_s17  }
  0x11   : > { %s311_s22 = sshll.u32 %s2170_s21, 4  ;;  %p1483_p0 = scmp.ge.s32.totalorder %s2168_s20, 1  ;;  %s2278_s22 = int_to_ptr.vmem [resolvable:$true] %s311_s22 }
  0x12   : > { %p2868_p1 = scmp.eq.s32.totalorder %s2273_s23, 0  ;;  %p299_p2 = scmp.lt.s32.totalorder %s2168_s20, 3 }
  0x13   : > { %s2171_s25 = smov [#allocation8]   ;;  %s2172_s28 = smov [#allocation11]  }
  0x14   : > { %p2280_p3 = pnand %p1483_p0, %p299_p2  ;;  %s336_s26 = sshll.u32 %s2171_s25, 4  ;;  %s2293_s26 = int_to_ptr.vmem [resolvable:$true] %s336_s26 }
  0x15   : > { %s360_s29 = sshll.u32 %s2172_s28, 4  ;;  %s2881_s1 = sld [smem:[#allocation30_spill]]  ;;  %s2295_s29 = int_to_ptr.vmem [resolvable:$true] %s360_s29 }
  0x16   : > { %s2878_s24 = scalar_select %p2280_p3, 1, 0 }
  0x17   : > { %p1647_p5 = pneg %p2280_p3 }
  0x18   : > { %2879 = sst [smem:[#allocation28_spill]] %s2878_s24 }
  0x19   : > { %p2289_p6 = pnand %p1647_p5, %p2868_p1 }
  0x1b   : > { %s1772_s13 = scalar_lea.hbm %s2881_s1, 256  ;;  %p2305_p8 = pneg %p2289_p6 }
  0x1c   : > { %p1773_p7 = scmp.ne.s32.totalorder %s2881_s1, %s1772_s13  ;;  %p1779_p11 = scmp.lt.u32.totalorder %s1772_s13, %s2881_s1 }
  0x1e   : > { %p1775_p9 = pnand %p2305_p8, %p1773_p7 }
  0x20   : > { %p1776_p10 = pneg %p1775_p9 }
  0x22   : > { %p1781_p12 = pnand %p1779_p11, %p1776_p10 }
  0x24   : > { %1784 = shalt.err (!%p1781_p12)
}
  0x25   : > { %s1785_s28 = scalar_lea.vmem %s2278_s22, 256  ;;  %p1793_p5 = scmp.lt.s32.totalorder %s2278_s22, %s2278_s22 }
  0x26   : > { %p1786_p13 = scmp.ne.s32.totalorder %s2278_s22, %s1785_s28  ;;  %p1794_p4 = scmp.lt.s32.totalorder %s1785_s28, %s1785_s28 }
  0x28   : > { %p1788_p0 = pnand %p1786_p13, %p2305_p8  ;;  %p1795_p7 = por %p1794_p4, %p1793_p5 }
  0x2a   : > { %p1789_p2 = pneg %p1788_p0 }
  0x2c   : > { %p1796_p9 = pnand %p1795_p7, %p1789_p2 }
  0x2e   : > { %1799 = shalt.err (!%p1796_p9)
}
  0x2f   : > { %s2173_s30 = smov 128   ;;  %s2174_s12 = smov 8  }
  0x30   : > { %1650 = dma.hbm_to_vmem [thread:$0]  (!%p2289_p6), %s2881_s1, 256, %s2278_s22, [#allocation6], %s2173_s30, %s2173_s30, %s2174_s12  }
  0x31   : > { %s2883_s3 = sld [smem:[#allocation32_spill]] }
  0x37   : > { %s1800_s25 = scalar_lea.hbm %s2883_s3, 16 }
  0x38   : > { %p1801_p4 = scmp.ne.s32.totalorder %s2883_s3, %s1800_s25  ;;  %p1807_p12 = scmp.lt.u32.totalorder %s1800_s25, %s2883_s3 }
  0x3a   : > { %p1803_p10 = pnand %p1801_p4, %p2305_p8 }
  0x3c   : > { %p1804_p11 = pneg %p1803_p10 }
  0x3e   : > { %p1809_p13 = pnand %p1807_p12, %p1804_p11 }
  0x40   : > { %1812 = shalt.err (!%p1809_p13)
}
  0x41   : > { %s1813_s22 = scalar_lea.vmem %s2293_s26, 16  ;;  %s1820_s11 = scalar_lea.vmem %s2293_s26, 32 }
  0x42   : > { %p1814_p0 = scmp.ne.s32.totalorder %s2293_s26, %s1813_s22  ;;  %p1821_p7 = scmp.lt.s32.totalorder %s2293_s26, %s2293_s26 }
  0x43   : > { %p1822_p9 = scmp.lt.s32.totalorder %s1820_s11, %s1813_s22 }
  0x44   : > { %p1816_p2 = pnand %p1814_p0, %p2305_p8 }
  0x45   : > { %p1823_p4 = por %p1822_p9, %p1821_p7 }
  0x46   : > { %p1817_p5 = pneg %p1816_p2 }
  0x48   : > { %p1824_p10 = pnand %p1823_p4, %p1817_p5 }
  0x4a   : > { %1827 = shalt.err (!%p1824_p10)
}
  0x4b   : > { %1656 = dma.hbm_to_vmem [thread:$0]  (!%p2289_p6), %s2883_s3, 16, %s2293_s26, [#allocation9]  }
  0x4c   : > { %s1828_s13 = scalar_lea.hbm %s2858_s5, 16 }
  0x4d   : > { %p1829_p11 = scmp.ne.s32.totalorder %s2858_s5, %s1828_s13  ;;  %p1835_p0 = scmp.lt.u32.totalorder %s1828_s13, %s2858_s5 }
  0x4f   : > { %p1831_p12 = pnand %p1829_p11, %p2305_p8 }
  0x51   : > { %p1832_p13 = pneg %p1831_p12 }
  0x53   : > { %p1837_p2 = pnand %p1835_p0, %p1832_p13 }
  0x55   : > { %1840 = shalt.err (!%p1837_p2)
}
  0x56   : > { %s1841_s26 = scalar_lea.vmem %s2295_s29, 16  ;;  %s1848_s28 = scalar_lea.vmem %s2295_s29, 32 }
  0x57   : > { %p1842_p5 = scmp.ne.s32.totalorder %s2295_s29, %s1841_s26  ;;  %p1849_p4 = scmp.lt.s32.totalorder %s2295_s29, %s2295_s29 }
  0x58   : > { %p1850_p10 = scmp.lt.s32.totalorder %s1848_s28, %s1841_s26 }
  0x59   : > { %p1844_p7 = pnand %p1842_p5, %p2305_p8 }
  0x5a   : > { %p1851_p11 = por %p1850_p10, %p1849_p4 }
  0x5b   : > { %p1845_p9 = pneg %p1844_p7 }
  0x5d   : > { %p1852_p12 = pnand %p1851_p11, %p1845_p9 }
  0x5f   : > { %1855 = shalt.err (!%p1852_p12)
}
  0x60   : > { %1662 = dma.hbm_to_vmem [thread:$0]  (!%p2289_p6), %s2858_s5, 16, %s2295_s29, [#allocation12]  }
  0x61   : > { %s2175_s0 = smov [#allocation14]   ;;  %s2176_s30 = smov [#allocation17]  }
  0x62   : > { %s382_s24 = sshll.u32 %s2175_s0, 4  ;;  %s406_s12 = sshll.u32 %s2176_s30, 4  ;;  %s383_s24 = int_to_ptr.vmem [resolvable:$true] %s382_s24  ;;  %s407_s12 = int_to_ptr.vmem [resolvable:$true] %s406_s12 }
  0x63   : > { %s1856_s15 = scalar_lea.hbm %s2860_s7, 16 }
  0x64   : > { %p1857_p13 = scmp.ne.s32.totalorder %s2860_s7, %s1856_s15  ;;  %p1863_p5 = scmp.lt.u32.totalorder %s1856_s15, %s2860_s7 }
  0x66   : > { %p1859_p0 = pnand %p1857_p13, %p2305_p8 }
  0x68   : > { %p1860_p2 = pneg %p1859_p0 }
  0x6a   : > { %p1865_p7 = pnand %p1863_p5, %p1860_p2 }
  0x6c   : > { %1868 = shalt.err (!%p1865_p7)
}
  0x6d   : > { %s1869_s29 = scalar_lea.vmem %s383_s24, 16  ;;  %s1876_s22 = scalar_lea.vmem %s383_s24, 32 }
  0x6e   : > { %p1870_p9 = scmp.ne.s32.totalorder %s383_s24, %s1869_s29  ;;  %p1877_p11 = scmp.lt.s32.totalorder %s383_s24, %s383_s24 }
  0x6f   : > { %p1878_p12 = scmp.lt.s32.totalorder %s1876_s22, %s1869_s29 }
  0x70   : > { %p1872_p4 = pnand %p1870_p9, %p2305_p8 }
  0x71   : > { %p1879_p1 = por %p1878_p12, %p1877_p11 }
  0x72   : > { %p1873_p10 = pneg %p1872_p4 }
  0x74   : > { %p1880_p3 = pnand %p1879_p1, %p1873_p10 }
  0x76   : > { %1883 = shalt.err (!%p1880_p3)
}
  0x77   : > { %1668 = dma.hbm_to_vmem [thread:$0]  (!%p2289_p6), %s2860_s7, 16, %s383_s24, [#allocation15]  }
  0x78   : > { %s1884_s14 = scalar_lea.hbm %s2862_s9, 16 }
  0x79   : > { %p1885_p13 = scmp.ne.s32.totalorder %s2862_s9, %s1884_s14  ;;  %p1891_p3 = scmp.lt.u32.totalorder %s1884_s14, %s2862_s9 }
  0x7b   : > { %p1887_p0 = pnand %p1885_p13, %p2305_p8 }
  0x7d   : > { %p1888_p1 = pneg %p1887_p0 }
  0x7f   : > { %p1893_p2 = pnand %p1891_p3, %p1888_p1 }
  0x81   : > { %1896 = shalt.err (!%p1893_p2)
}
  0x82   : > { %s1897_s28 = scalar_lea.vmem %s407_s12, 16  ;;  %s1904_s24 = scalar_lea.vmem %s407_s12, 32 }
  0x83   : > { %p1898_p5 = scmp.ne.s32.totalorder %s407_s12, %s1897_s28  ;;  %p1905_p4 = scmp.lt.s32.totalorder %s407_s12, %s407_s12 }
  0x84   : > { %p1906_p10 = scmp.lt.s32.totalorder %s1904_s24, %s1897_s28 }
  0x85   : > { %p1900_p7 = pnand %p1898_p5, %p2305_p8 }
  0x86   : > { %p1907_p11 = por %p1906_p10, %p1905_p4 }
  0x87   : > { %p1901_p9 = pneg %p1900_p7 }
  0x89   : > { %p1908_p12 = pnand %p1907_p11, %p1901_p9 }
  0x8b   : > { %1911 = shalt.err (!%p1908_p12)
}
  0x8c   : > { %1674 = dma.hbm_to_vmem [thread:$0]  (!%p2289_p6), %s2862_s9, 16, %s407_s12, [#allocation18]  }
  0x8d   : > { %s2177_s11 = smov [#allocation7]   ;;  %s2178_s30 = smov [#allocation10]  }
  0x8e   : > { %s325_s0 = sshll.u32 %s2177_s11, 4  ;;  %s346_s13 = sshll.u32 %s2178_s30, 4  ;;  %s326_s0 = int_to_ptr.vmem [resolvable:$true] %s325_s0  ;;  %s347_s13 = int_to_ptr.vmem [resolvable:$true] %s346_s13 }
  0x8f   : > { %s2884_s2 = sld [smem:[#allocation31_spill]] }
  0x95   : > { %s1912_s21 = scalar_lea.hbm %s2884_s2, 16 }
  0x96   : > { %p1913_p13 = scmp.ne.s32.totalorder %s2884_s2, %s1912_s21  ;;  %p1919_p3 = scmp.lt.u32.totalorder %s1912_s21, %s2884_s2 }
  0x98   : > { %p1915_p0 = pnand %p1913_p13, %p2305_p8 }
  0x9a   : > { %p1916_p1 = pneg %p1915_p0 }
  0x9c   : > { %p1921_p2 = pnand %p1919_p3, %p1916_p1 }
  0x9e   : > { %1924 = shalt.err (!%p1921_p2)
}
  0x9f   : > { %s1925_s12 = scalar_lea.vmem %s326_s0, 16  ;;  %s1932_s29 = scalar_lea.vmem %s326_s0, 32 }
  0xa0   : > { %p1926_p5 = scmp.ne.s32.totalorder %s326_s0, %s1925_s12  ;;  %p1933_p4 = scmp.lt.s32.totalorder %s326_s0, %s326_s0 }
  0xa1   : > { %p1934_p10 = scmp.lt.s32.totalorder %s1932_s29, %s1925_s12 }
  0xa2   : > { %p1928_p7 = pnand %p1926_p5, %p2305_p8 }
  0xa3   : > { %p1935_p11 = por %p1934_p10, %p1933_p4 }
  0xa4   : > { %p1929_p9 = pneg %p1928_p7 }
  0xa6   : > { %p1936_p12 = pnand %p1935_p11, %p1929_p9 }
  0xa8   : > { %1939 = shalt.err (!%p1936_p12)
}
  0xa9   : > { %1653 = dma.hbm_to_vmem [thread:$0]  (!%p2289_p6), %s2884_s2, 16, %s326_s0, [#allocation6]  }
  0xaa   : > { %s1940_s15 = scalar_lea.hbm %s2857_s4, 256 }
  0xab   : > { %p1941_p13 = scmp.ne.s32.totalorder %s2857_s4, %s1940_s15  ;;  %p1947_p3 = scmp.lt.u32.totalorder %s1940_s15, %s2857_s4 }
  0xad   : > { %p1943_p0 = pnand %p1941_p13, %p2305_p8 }
  0xaf   : > { %p1944_p1 = pneg %p1943_p0 }
  0xb1   : > { %p1949_p2 = pnand %p1947_p3, %p1944_p1 }
  0xb3   : > { %1952 = shalt.err (!%p1949_p2)
}
  0xb4   : > { %s1953_s24 = scalar_lea.vmem %s347_s13, 256  ;;  %p1961_p4 = scmp.lt.s32.totalorder %s347_s13, %s347_s13 }
  0xb5   : > { %p1954_p5 = scmp.ne.s32.totalorder %s347_s13, %s1953_s24  ;;  %p1962_p10 = scmp.lt.s32.totalorder %s1953_s24, %s1953_s24 }
  0xb7   : > { %p1956_p7 = pnand %p1954_p5, %p2305_p8  ;;  %p1963_p11 = por %p1962_p10, %p1961_p4 }
  0xb9   : > { %p1957_p9 = pneg %p1956_p7 }
  0xbb   : > { %p1964_p12 = pnand %p1963_p11, %p1957_p9 }
  0xbd   : > { %1967 = shalt.err (!%p1964_p12)
}
  0xbe   : > { %s2870_s0 = smov 64   ;;  %s2871_s12 = smov 4  }
  0xbf   : > { %1659 = dma.hbm_to_vmem [thread:$0]  (!%p2289_p6), %s2857_s4, 256, %s347_s13, [#allocation9], %s2870_s0, %s2870_s0, %s2871_s12  }
  0xc0   : > { %s2181_s11 = smov [#allocation13]   ;;  %s2182_s14 = smov [#allocation16]  }
  0xc1   : > { %s371_s30 = sshll.u32 %s2181_s11, 4  ;;  %s392_s15 = sshll.u32 %s2182_s14, 4  ;;  %s372_s30 = int_to_ptr.vmem [resolvable:$true] %s371_s30  ;;  %s393_s15 = int_to_ptr.vmem [resolvable:$true] %s392_s15 }
  0xc2   : > { %s1968_s26 = scalar_lea.hbm %s2859_s6, 64 }
  0xc3   : > { %p1969_p13 = scmp.ne.s32.totalorder %s2859_s6, %s1968_s26  ;;  %p1975_p3 = scmp.lt.u32.totalorder %s1968_s26, %s2859_s6 }
  0xc5   : > { %p1971_p0 = pnand %p1969_p13, %p2305_p8 }
  0xc7   : > { %p1972_p1 = pneg %p1971_p0 }
  0xc9   : > { %p1977_p2 = pnand %p1975_p3, %p1972_p1 }
  0xcb   : > { %1980 = shalt.err (!%p1977_p2)
}
  0xcc   : > { %s1981_s13 = scalar_lea.vmem %s372_s30, 64  ;;  %p1989_p4 = scmp.lt.s32.totalorder %s372_s30, %s372_s30 }
  0xcd   : > { %p1982_p5 = scmp.ne.s32.totalorder %s372_s30, %s1981_s13  ;;  %p1990_p10 = scmp.lt.s32.totalorder %s1981_s13, %s1981_s13 }
  0xcf   : > { %p1984_p7 = pnand %p1982_p5, %p2305_p8  ;;  %p1991_p11 = por %p1990_p10, %p1989_p4 }
  0xd1   : > { %p1985_p9 = pneg %p1984_p7 }
  0xd3   : > { %p1992_p12 = pnand %p1991_p11, %p1985_p9 }
  0xd5   : > { %1995 = shalt.err (!%p1992_p12)
}
  0xd6   : > { %1665 = dma.hbm_to_vmem [thread:$0]  (!%p2289_p6), %s2859_s6, 64, %s372_s30, [#allocation12]  }
  0xd7   : > { %s1996_s11 = scalar_lea.hbm %s2861_s8, 256 }
  0xd8   : > { %p1997_p13 = scmp.ne.s32.totalorder %s2861_s8, %s1996_s11  ;;  %p2003_p3 = scmp.lt.u32.totalorder %s1996_s11, %s2861_s8 }
  0xda   : > { %p1999_p0 = pnand %p1997_p13, %p2305_p8 }
  0xdc   : > { %p2000_p1 = pneg %p1999_p0 }
  0xde   : > { %p2005_p2 = pnand %p2003_p3, %p2000_p1 }
  0xe0   : > { %2008 = shalt.err (!%p2005_p2)
}
  0xe1   : > { %s2009_s28 = scalar_lea.vmem %s393_s15, 256  ;;  %p2017_p4 = scmp.lt.s32.totalorder %s393_s15, %s393_s15 }
  0xe2   : > { %p2010_p5 = scmp.ne.s32.totalorder %s393_s15, %s2009_s28  ;;  %p2018_p10 = scmp.lt.s32.totalorder %s2009_s28, %s2009_s28 }
  0xe4   : > { %p2012_p7 = pnand %p2010_p5, %p2305_p8  ;;  %p2019_p11 = por %p2018_p10, %p2017_p4 }
  0xe6   : > { %p2013_p9 = pneg %p2012_p7 }
  0xe8   : > { %p2020_p12 = pnand %p2019_p11, %p2013_p9 }
  0xea   : > { %2023 = shalt.err (!%p2020_p12)
}
  0xeb   : > { %1671 = dma.hbm_to_vmem [thread:$0]  (!%p2289_p6), %s2861_s8, 256, %s393_s15, [#allocation15], %s2870_s0, %s2870_s0, %s2871_s12  }
  0xec   : > { %s2183_s13 = smov [#allocation19]   ;;  %s2024_s2 = scalar_lea.hbm %s2863_s10, 16 }
  0xed   : > { %s417_s29 = sshll.u32 %s2183_s13, 4  ;;  %p2025_p13 = scmp.ne.s32.totalorder %s2863_s10, %s2024_s2  ;;  %s418_s29 = int_to_ptr.vmem [resolvable:$true] %s417_s29 }
  0xee   : > { %p2031_p3 = scmp.lt.u32.totalorder %s2024_s2, %s2863_s10 }
  0xef   : > { %p2027_p0 = pnand %p2025_p13, %p2305_p8 }
  0xf1   : > { %p2028_p1 = pneg %p2027_p0 }
  0xf3   : > { %p2033_p2 = pnand %p2031_p3, %p2028_p1 }
  0xf5   : > { %2036 = shalt.err (!%p2033_p2)
}
  0xf6   : > { %s2037_s15 = scalar_lea.vmem %s418_s29, 16  ;;  %s2044_s26 = scalar_lea.vmem %s418_s29, 32 }
  0xf7   : > { %p2038_p5 = scmp.ne.s32.totalorder %s418_s29, %s2037_s15  ;;  %p2045_p4 = scmp.lt.s32.totalorder %s418_s29, %s418_s29 }
  0xf8   : > { %p2046_p10 = scmp.lt.s32.totalorder %s2044_s26, %s2037_s15 }
  0xf9   : > { %p2040_p7 = pnand %p2038_p5, %p2305_p8 }
  0xfa   : > { %p2047_p11 = por %p2046_p10, %p2045_p4 }
  0xfb   : > { %p2041_p9 = pneg %p2040_p7 }
  0xfd   : > { %p2048_p12 = pnand %p2047_p11, %p2041_p9 }
  0xff   : > { %2051 = shalt.err (!%p2048_p12)
}
 0x100   : > { %1677 = dma.hbm_to_vmem [thread:$0]  (!%p2289_p6), %s2863_s10, 16, %s418_s29, [#allocation18]  }
 0x101   : > { %s1482_s16 = sadd.s32 4294967294, %s2168_s20   ;;  %s2508_s27 = sadd.s32 1, %s2168_s20  }
 0x102   : > { %s36_s24 = ssub.s32 %s2168_s20, %s2508_s27  ;;  %s39_s13 = sadd.s32 1, %s2164_s19 }
 0x103   : > { %p37_p8 = scmp.eq.s32.totalorder %s36_s24, 0  ;;  %p46_p13 = scmp.ne.s32.totalorder %s2164_s19, %s2160_s18 }
 0x104   : > { %p47_p0 = scmp.eq.s32.totalorder %s2168_s20, 0  ;;  %p52_p1 = scmp.ne.s32.totalorder %s2160_s18, %s2156_s17 }
 0x105   : > { %s2519_s22 = scalar_select %p37_p8, %s2164_s19, %s39_s13  }
 0x106   : > { %p48_p3 = por %p47_p0, %p46_p13  ;;  %p2885_p2 = scmp.eq.s32.totalorder %s2273_s23, 0 }
 0x107   : > { %p286_p6 = scmp.eq.s32.totalorder %s2273_s23, 1  ;;  %p292_p7 = scmp.eq.s32.totalorder %s1482_s16, 1 }
 0x108   : > { %p2523_p5 = por %p2885_p2, %p52_p1  ;;  %p1696_p9 = scmp.lt.s32.totalorder %s2168_s20, 2 }
 0x109   : > { %s428_s29 = sand.u32 1, %s2164_s19   ;;  %p2530_p4 = por %p286_p6, %p46_p13 }
 0x10a   : > { %p2534_p10 = por %p292_p7, %p52_p1  ;;  %s1600_s14 = smul.u32 24, %s428_s29 }
 0x10b   : > { %s2887_s2 = scalar_select %p2530_p4, 1, 0 }
 0x10c   : > { %s2888_s11 = scalar_select %p2534_p10, 1, 0 }
 0x10d   : > { %s1601_s21 = smul.u32 384, %s2168_s20  ;;  %p2539_p11 = pnand %p1696_p9, %p48_p3 }
 0x10e   : > { %s2890_s28 = sld [smem:[#allocation29_spill]]  ;;  %s432_s16 = scalar_lea.vmem [#allocation2], %s1600_s14 }
 0x10f   : > { %s439_s24 = sshll.u32 %s432_s16, 4  ;;  %s2550_s13 = scalar_lea.sflag [#allocation3], %s428_s29  ;;  %s2548_s24 = int_to_ptr.vmem [resolvable:$true] %s439_s24 }
 0x110   : > { %p2054_p8 = pneg %p2539_p11 }
 0x114   : > { %s2546_s30 = scalar_lea.hbm %s2890_s28, %s1601_s21  ;;  %s2057_s26 = scalar_lea.hbm %s2890_s28, 768 }
 0x115   : > { %s2052_s0 = scalar_lea.hbm %s2546_s30, 384  ;;  %p2058_p1 = scmp.lt.u32.totalorder %s2546_s30, %s2890_s28 }
 0x116   : > { %p2053_p12 = scmp.ne.s32.totalorder %s2546_s30, %s2052_s0  ;;  %p2059_p3 = scmp.lt.u32.totalorder %s2057_s26, %s2052_s0 }
 0x117   : > { %p2061_p6 = scmp.lt.u32.totalorder %s2052_s0, %s2546_s30 }
 0x118   : > { %p2055_p13 = pnand %p2054_p8, %p2053_p12  ;;  %p2060_p2 = por %p2059_p3, %p2058_p1 }
 0x11a   : > { %p2056_p0 = pneg %p2055_p13  ;;  %p2062_p7 = por %p2061_p6, %p2060_p2 }
 0x11c   : > { %p2063_p9 = pnand %p2062_p7, %p2056_p0 }
 0x11e   : > { %2066 = shalt.err (!%p2063_p9)
}
 0x11f   : > { %s2067_s29 = scalar_lea.vmem %s2548_s24, 384  ;;  %s2184_s14 = smov [#allocation2]  }
 0x120   : > { %p2068_p12 = scmp.ne.s32.totalorder %s2548_s24, %s2067_s29  ;;  %s2072_s16 = sshll.u32 %s2184_s14, 4  ;;  %s2073_s16 = int_to_ptr.vmem [resolvable:$false] %s2072_s16 }
 0x121   : > { %s2074_s3 = scalar_lea.vmem %s2073_s16, 768  ;;  %p2075_p4 = scmp.lt.s32.totalorder %s2548_s24, %s2073_s16 }
 0x122   : > { %p2070_p13 = pnand %p2068_p12, %p2054_p8  ;;  %p2076_p1 = scmp.lt.s32.totalorder %s2074_s3, %s2067_s29 }
 0x124   : > { %p2071_p10 = pneg %p2070_p13  ;;  %p2077_p3 = por %p2076_p1, %p2075_p4 }
 0x126   : > { %p2078_p2 = pnand %p2077_p3, %p2071_p10 }
 0x128   : > { %2081 = shalt.err (!%p2078_p2)
}
 0x129   : > { %s2891_s0 = smov 4   ;;  %s2892_s12 = smov 64  }
 0x12a   : > { %1681 = dma.hbm_to_vmem [thread:$0]  (!%p2539_p11), %s2546_s30, 384, %s2548_s24, %s2550_s13, %s2892_s12, %s2892_s12, %s2891_s0  }
 0x12b   : > { %s2893_s21 = sld [smem:[#allocation28_spill]] }
 0x131   : > { %p2894_p8 = scmp.ne.s32.totalorder %s2893_s21, 0 }
 0x132   : > { %s2584_s15 = sand.u32 (!%p2894_p8), 1, %s2160_s18  }
 0x133   : > { %451 = sbr.rel (%p2894_p8) target bundleno = 1439 (0x59f), region = 64  ;;  %s454_s29 = scalar_lea.sflag (!%p2894_p8), [#allocation3], %s2584_s15 }
 0x134   : > { %s1602_s26 = smul.u32 (!%p2894_p8), 24, %s2584_s15 }
 0x136   : > { %s2588_s14 = scalar_lea.vmem (!%p2894_p8), [#allocation2], %s1602_s26 }
 0x13a   : > { %2127 = dma.done.wait (%p2523_p5), %s454_s29, 384  }
 0x13b   : > { %2129 = vsyncadd (%p2523_p5), %s454_s29, 4294966912  ;;  %p2895_p4 = scmp.eq.s32.totalorder %s2273_s23, 0 }
 0x13d   : > { %2131 = dma.done.wait (%p2895_p4), [#allocation6], 272   ;;  %p2896_p10 = pmov %p2895_p4 }
 0x13e   : > { %p2897_p11 = pmov %p2895_p4 }
 0x13f   : > { %2133 = vsyncadd (%p2896_p10), [#allocation6], 4294967024 }
 0x140   : > { %2135 = dma.done.wait (%p2897_p11), [#allocation9], 272   ;;  %p2898_p0 = pmov %p2895_p4 }
 0x142   : > { %2137 = vsyncadd (%p2898_p0), [#allocation9], 4294967024  ;;  %p2899_p6 = pmov %p2898_p0 }
 0x143   : > { %p2900_p7 = pmov %p2898_p0 }
 0x144   : > { %2139 = dma.done.wait (%p2899_p6), [#allocation12], 80  }
 0x145   : > { %2141 = vsyncadd (%p2900_p7), [#allocation12], 4294967216  ;;  %p2901_p5 = pmov %p2898_p0 }
 0x146   : > { %p2902_p9 = pmov %p2898_p0 }
 0x147   : > { %2143 = dma.done.wait (%p2901_p5), [#allocation15], 272  }
 0x148   : > { %2145 = vsyncadd (%p2902_p9), [#allocation15], 4294967024  ;;  %p2903_p12 = pmov %p2898_p0 }
 0x149   : > { %p2904_p13 = pmov %p2898_p0 }
 0x14a   : > { %2147 = dma.done.wait (%p2903_p12), [#allocation18], 32  }
 0x14b   : > { %2149 = vsyncadd (%p2904_p13), [#allocation18], 4294967264  ;;  %v1508_v0 = vld [vmem:[%s2588_s14 + $0x4] sm:$0x7]  ;;  %v1509_v1 = vld [vmem:[%s2588_s14 + $0x8] sm:$0x7] }
 0x14c   : > { %v2616_v2 = vld [vmem:[#allocation5 + $0x4] ss:$0 sm:$0xff]  ;;  %v2618_v3 = vunpack.c.l.bf16 %v1508_v0  ;;  %v2620_v4 = vunpack.c.l.bf16 %v1509_v1  ;;  %v555_v5 = vld [vmem:[%s2588_s14] sm:$0x3]  ;;  %v556_v6 = vld [vmem:[%s2588_s14 + $0x4] sm:$0x3] }
 0x14d   : > { %v2624_v7 = vld [vmem:[#allocation5] ss:$0 sm:$0xff]  ;;  %v559_v8 = vunpack.c.l.bf16 %v555_v5  ;;  %v560_v9 = vunpack.c.l.bf16 %v556_v6  ;;  %v588_v10 = vld [vmem:[%s2588_s14] sm:$0x7]  ;;  %v589_v11 = vld [vmem:[%s2588_s14 + $0x4] sm:$0x7] }
 0x14e   : > { %v2628_v12 = vld [vmem:[#allocation5 + $0x1] ss:$0 sm:$0xff]  ;;  %v551_v13 = vmul.f32 %v2616_v2, %v2618_v3  ;;  %v552_v14 = vmul.f32 %v2616_v2, %v2620_v4  ;;  %v592_v15 = vunpack.c.l.bf16 %v588_v10  ;;  %v593_v16 = vunpack.c.l.bf16 %v589_v11  ;;  %v609_v17 = vld [vmem:[%s2588_s14] sm:$0x6]  ;;  %v610_v18 = vld [vmem:[%s2588_s14 + $0x4] sm:$0x6] }
 0x14f   : > { %v2636_v19 = vld [vmem:[#allocation5 + $0x2] ss:$0 sm:$0xff]  ;;  %v568_v20 = vmul.f32 %v2624_v7, %v559_v8  ;;  %v569_v21 = vmul.f32 %v2624_v7, %v560_v9  ;;  %v613_v22 = vunpack.c.l.bf16 %v609_v17  ;;  %v614_v23 = vunpack.c.l.bf16 %v610_v18  ;;  %v1516_v24 = vld [vmem:[%s2588_s14 + $0x4] sm:$0x3]  ;;  %v1517_v25 = vld [vmem:[%s2588_s14 + $0x8] sm:$0x3] }
 0x150   : > { %v2642_v26 = vld [vmem:[#allocation5 + $0x3] ss:$0 sm:$0xff]  ;;  %v601_v27 = vmul.f32 %v2628_v12, %v592_v15  ;;  %v602_v28 = vmul.f32 %v2628_v12, %v593_v16  ;;  %v646_v29 = vunpack.c.l.bf16 %v1516_v24  ;;  %v647_v30 = vunpack.c.l.bf16 %v1517_v25  ;;  %v1521_v31 = vld [vmem:[%s2588_s14 + $0x4] sm:$0x6]  ;;  %v1522_v32 = vld [vmem:[%s2588_s14 + $0x8] sm:$0x6] }
 0x151   : > { %v576_v33 = vrot.slane %v568_v20, 7  ;;  %v577_v34 = vrot.slane %v569_v21, 7  ;;  %v622_v35 = vmul.f32 %v2636_v19, %v613_v22  ;;  %v623_v36 = vmul.f32 %v2636_v19, %v614_v23  ;;  %v2650_v37 = vld [vmem:[#allocation5 + $0x5] ss:$0 sm:$0xff]  ;;  %v1526_v42 = vld [vmem:[%s2588_s14 + $0x8] sm:$0x3] }
 0x152   : > { %v655_v38 = vmul.f32 %v2642_v26, %v646_v29  ;;  %v656_v39 = vmul.f32 %v2642_v26, %v647_v30  ;;  %v679_v40 = vunpack.c.l.bf16 %v1521_v31  ;;  %v680_v41 = vunpack.c.l.bf16 %v1522_v32  ;;  %v1527_v43 = vld [vmem:[%s2588_s14 + $0xc] sm:$0x3]  ;;  %v1531_v48 = vld [vmem:[%s2588_s14 + $0x8] sm:$0x7]  ;;  %v2660_v54 = vld [vmem:[#allocation5 + $0x6] ss:$0 sm:$0xff] }
 0x153   : > { %v584_v44 = vadd.f32 %v576_v33, %v551_v13  ;;  %v585_v45 = vadd.f32 %v577_v34, %v552_v14  ;;  %v630_v46 = vrot.slane %v622_v35, 1  ;;  %v631_v47 = vrot.slane %v623_v36, 1  ;;  %v1532_v49 = vld [vmem:[%s2588_s14 + $0xc] sm:$0x7]  ;;  %v2662_v59 = vld [vmem:[#allocation5 + $0x7] ss:$0 sm:$0xff] }
 0x154   : > { %v663_v50 = vrot.slane %v655_v38, 7  ;;  %v664_v51 = vrot.slane %v656_v39, 7  ;;  %v688_v52 = vmul.f32 %v2650_v37, %v679_v40  ;;  %v689_v53 = vmul.f32 %v2650_v37, %v680_v41  ;;  %v1536_v60 = vld [vmem:[%s2588_s14 + $0x8] sm:$0x6]  ;;  %v1537_v61 = vld [vmem:[%s2588_s14 + $0xc] sm:$0x6] }
 0x155   : > { %v605_v55 = vadd.f32 %v601_v27, %v584_v44  ;;  %v606_v56 = vadd.f32 %v602_v28, %v585_v45  ;;  %v713_v57 = vunpack.c.l.bf16 %v1526_v42  ;;  %v714_v58 = vunpack.c.l.bf16 %v1527_v43  ;;  %v2668_v10 = vld [vmem:[#allocation5 + $0x8] ss:$0 sm:$0xff]  ;;  %v1510_v11 = vld [vmem:[%s2588_s14 + $0xc] sm:$0x7]  ;;  %v1511_v13 = vld [vmem:[%s2588_s14 + $0x10] sm:$0x7] }
 0x156   : > { %v696_v62 = vrot.slane %v688_v52, 1  ;;  %v697_v63 = vrot.slane %v689_v53, 1  ;;  %v746_v0 = vunpack.c.l.bf16 %v1531_v48  ;;  %v747_v1 = vunpack.c.l.bf16 %v1532_v49  ;;  %v557_v18 = vld [vmem:[%s2588_s14 + $0x8] sm:$0x3]  ;;  %v558_v20 = vld [vmem:[%s2588_s14 + $0xc] sm:$0x3] }
 0x157   : > { %v638_v5 = vadd.f32 %v630_v46, %v605_v55  ;;  %v639_v6 = vadd.f32 %v631_v47, %v606_v56  ;;  %v722_v8 = vmul.f32 %v2660_v54, %v713_v57  ;;  %v723_v9 = vmul.f32 %v2660_v54, %v714_v58  ;;  %v590_v30 = vld [vmem:[%s2588_s14 + $0x8] sm:$0x7]  ;;  %v591_v31 = vld [vmem:[%s2588_s14 + $0xc] sm:$0x7]  ;;  %v1519_v57 = vld [vmem:[%s2588_s14 + $0x10] sm:$0x3] }
 0x158   : > { %v755_v14 = vmul.f32 %v2662_v59, %v746_v0  ;;  %v756_v15 = vmul.f32 %v2662_v59, %v747_v1  ;;  %v767_v16 = vunpack.c.l.bf16 %v1536_v60  ;;  %v768_v17 = vunpack.c.l.bf16 %v1537_v61  ;;  %v611_v36 = vld [vmem:[%s2588_s14 + $0x8] sm:$0x6]  ;;  %v612_v38 = vld [vmem:[%s2588_s14 + $0xc] sm:$0x6]  ;;  %s1507_s1 = sshll.u32 %s2584_s15, 3  ;;  %s1569_s25 = sshll.u32 %s2273_s23, 7 }
 0x159   : > { %v671_v21 = vadd.f32 %v663_v50, %v638_v5  ;;  %v672_v22 = vadd.f32 %v664_v51, %v639_v6  ;;  %v730_v23 = vrot.slane %v722_v8, 7  ;;  %v731_v24 = vrot.slane %v723_v9, 7  ;;  %v1518_v56 = vld [vmem:[%s2588_s14 + $0xc] sm:$0x3]  ;;  %s535_s30 = scalar_lea.vmem [#allocation20], %s1507_s1  ;;  %s2907_s3 = sld [smem:[#allocation33_spill]] }
 0x15a   : > { %vm804_vm0 = vcmask 1042432   ;;  %vm805_vm1 = vcmask 1046532   ;;  %v776_v25 = vmul.f32 %v2668_v10, %v767_v16  ;;  %v777_v27 = vmul.f32 %v2668_v10, %v768_v17  ;;  %v1523_v9 = vld [vmem:[%s2588_s14 + $0xc] sm:$0x6]  ;;  %s1314_s24 = sshll.u32 %s535_s30, 4  ;;  %s1301_s12 = scalar_lea.sflag [#allocation4], %s2584_s15  ;;  %s2809_s24 = int_to_ptr.vmem [resolvable:$true] %s1314_s24 }
 0x15b   : > { %v2678_v28 = vunpack.c.l.bf16 %v1510_v11  ;;  %v2680_v29 = vunpack.c.l.bf16 %v1511_v13  ;;  %v704_v32 = vadd.f32 %v696_v62, %v671_v21  ;;  %v705_v33 = vadd.f32 %v697_v63, %v672_v22  ;;  %v1524_v11 = vld [vmem:[%s2588_s14 + $0x10] sm:$0x6]  ;;  %vm2702_vm3 = vmor %vm804_vm0, %vm805_vm1  ;;  %s2082_s23 = scalar_lea.vmem %s2809_s24, 128  ;;  %p2908_p3 = scmp.ne.s32.totalorder %s2887_s2, 0 }
 0x15c   : > { %v561_v34 = vunpack.c.l.bf16 %v557_v18  ;;  %v562_v35 = vunpack.c.l.bf16 %v558_v20  ;;  %v784_v39 = vrot.slane %v776_v25, 1  ;;  %v785_v40 = vrot.slane %v777_v27, 1  ;;  %p2083_p1 = scmp.ne.s32.totalorder %s2809_s24, %s2082_s23  ;;  %s2189_s21 = smov [#allocation20]  }
 0x15d   : > { %v553_v41 = vmul.f32 %v2616_v2, %v2678_v28  ;;  %v554_v42 = vmul.f32 %v2616_v2, %v2680_v29  ;;  %v738_v43 = vadd.f32 %v730_v23, %v704_v32  ;;  %v739_v44 = vadd.f32 %v731_v24, %v705_v33  ;;  %v1528_v32 = vld [vmem:[%s2588_s14 + $0x10] sm:$0x3]  ;;  %s2086_s26 = sshll.u32 %s2189_s21, 4  ;;  %s2087_s26 = int_to_ptr.vmem [resolvable:$false] %s2086_s26 }
 0x15e   : > { %v570_v45 = vmul.f32 %v2624_v7, %v561_v34  ;;  %v571_v46 = vmul.f32 %v2624_v7, %v562_v35  ;;  %v594_v47 = vunpack.c.l.bf16 %v590_v30  ;;  %v595_v48 = vunpack.c.l.bf16 %v591_v31  ;;  %p2084_p2 = pnand %p2083_p1, %p2908_p3  ;;  %s2088_s29 = scalar_lea.vmem %s2087_s26, 256 }
 0x15f   : > { %v615_v49 = vunpack.c.l.bf16 %v611_v36  ;;  %v616_v50 = vunpack.c.l.bf16 %v612_v38  ;;  %v759_v51 = vadd.f32 %v755_v14, %v738_v43  ;;  %v760_v52 = vadd.f32 %v756_v15, %v739_v44  ;;  %v1529_v36 = vld [vmem:[%s2588_s14 + $0x14] sm:$0x3]  ;;  %v1533_v38 = vld [vmem:[%s2588_s14 + $0x10] sm:$0x7]  ;;  %s2807_s0 = scalar_lea.hbm %s2907_s3, %s1569_s25  ;;  %p2089_p4 = scmp.lt.s32.totalorder %s2809_s24, %s2087_s26 }
 0x160   : > { %vm833_vm2 = vcmask 261120   ;;  %v578_v53 = vrot.slane %v570_v45, 7  ;;  %v579_v55 = vrot.slane %v571_v46, 7  ;;  %v603_v2 = vmul.f32 %v2628_v12, %v594_v47  ;;  %v1534_v43 = vld [vmem:[%s2588_s14 + $0x14] sm:$0x7]  ;;  %p2085_p8 = pneg %p2084_p2  ;;  %p2090_p10 = scmp.lt.s32.totalorder %s2088_s29, %s2082_s23 }
 0x161   : > { %v604_v58 = vmul.f32 %v2628_v12, %v595_v48  ;;  %v624_v60 = vmul.f32 %v2636_v19, %v615_v49  ;;  %v625_v7 = vmul.f32 %v2636_v19, %v616_v50  ;;  %v792_v61 = vadd.f32 %v784_v39, %v759_v51  ;;  %v1538_v48 = vld [vmem:[%s2588_s14 + $0x10] sm:$0x6] }
 0x162   : > { %v793_v62 = vadd.f32 %v785_v40, %v760_v52  ;;  %v586_v63 = vadd.f32 %v578_v53, %v553_v41  ;;  %v587_v0 = vadd.f32 %v579_v55, %v554_v42  ;;  %v648_v6 = vunpack.c.l.bf16 %v1518_v56  ;;  %v1539_v52 = vld [vmem:[%s2588_s14 + $0x14] sm:$0x6]  ;;  %p2091_p11 = por %p2090_p10, %p2089_p4 }
 0x163   : > { %v632_v1 = vrot.slane %v624_v60, 1  ;;  %v633_v5 = vrot.slane %v625_v7, 1  ;;  %v649_v8 = vunpack.c.l.bf16 %v1519_v57  ;;  %v800_v13 = vcombine.high %v792_v61, %v792_v61 }
 0x164   : > { %v801_v14 = vcombine.high %v793_v62, %v793_v62  ;;  %v1541_v15 = vrot.slane %v792_v61, 9  ;;  %v1542_v16 = vrot.slane %v793_v62, 9  ;;  %v607_v19 = vadd.f32 %v603_v2, %v586_v63  ;;  %p2092_p0 = pnand %p2091_p11, %p2085_p8 }
 0x165   : > { %v608_v17 = vadd.f32 %v604_v58, %v587_v0  ;;  %v657_v18 = vmul.f32 %v2642_v26, %v648_v6  ;;  %v658_v20 = vmul.f32 %v2642_v26, %v649_v8  ;;  %v809_v21 = vrot.slane %v800_v13, 5 }
 0x166   : > { %v813_v22 = vrot.slane %v801_v14, 5  ;;  %v681_v23 = vunpack.c.l.bf16 %v1523_v9  ;;  %v682_v24 = vunpack.c.l.bf16 %v1524_v11  ;;  %v640_v25 = vadd.f32 %v632_v1, %v607_v19 }
 0x167   : > { %v641_v27 = vadd.f32 %v633_v5, %v608_v17  ;;  %v665_v30 = vrot.slane %v657_v18, 7  ;;  %v666_v31 = vrot.slane %v658_v20, 7  ;;  %v2711_v33 = vsel %vm2702_vm3, %v1541_v15, %v809_v21 }
 0x168   : > { %v2715_v34 = vsel %vm2702_vm3, %v1542_v16, %v813_v22  ;;  %v690_v26 = vmul.f32 %v2650_v37, %v681_v23  ;;  %v691_v35 = vmul.f32 %v2650_v37, %v682_v24  ;;  %v843_v40 = vmul.f32 %v2711_v33, %v2711_v33 }
 0x169   : > { %v829_v39 = vcombine.low %v2711_v33, %v2715_v34  ;;  %v844_v41 = vmul.f32 %v2715_v34, %v2715_v34  ;;  %v673_v42 = vadd.f32 %v665_v30, %v640_v25  ;;  %v674_v44 = vadd.f32 %v666_v31, %v641_v27  ;;  %v1760_v31 = vld [vmem:[#allocation10] sm:$0xff]  }
 0x16a   : > { %v698_v45 = vrot.slane %v690_v26, 1  ;;  %v699_v46 = vrot.slane %v691_v35, 1  ;;  %v715_v47 = vunpack.c.l.bf16 %v1528_v32  ;;  %v716_v50 = vunpack.c.l.bf16 %v1529_v36  ;;  %v1761_v26 = vld [vmem:[#allocation10 + $0x8] sm:$0xff]  }
 0x16b   : > { %v834_v37 = vsel %vm833_vm2, %v829_v39, 0.0  ;;  %v851_v49 = vcombine.low %v843_v40, %v844_v41  ;;  %v748_v51 = vunpack.c.l.bf16 %v1533_v38  ;;  %v749_v56 = vunpack.c.l.bf16 %v1534_v43 }
 0x16c   : > { %835 = vadd.xlane.f32.xlu0 %v834_v37  ;;  %v706_v53 = vadd.f32 %v698_v45, %v673_v42  ;;  %v724_v55 = vmul.f32 %v2660_v54, %v715_v47  ;;  %v707_v2 = vadd.f32 %v699_v46, %v674_v44  ;;  %v725_v58 = vmul.f32 %v2660_v54, %v716_v50 }
 0x16d   : > { %v855_v57 = vsel %vm833_vm2, %v851_v49, 0.0  ;;  %v769_v60 = vunpack.c.l.bf16 %v1538_v48  ;;  %v757_v61 = vmul.f32 %v2662_v59, %v748_v51  ;;  %v770_v62 = vunpack.c.l.bf16 %v1539_v52 }
 0x16e   : > { %856 = vadd.xlane.f32.xlu1 %v855_v57  ;;  %v732_v7 = vrot.slane %v724_v55, 7  ;;  %v733_v63 = vrot.slane %v725_v58, 7  ;;  %v758_v0 = vmul.f32 %v2662_v59, %v749_v56  ;;  %v2185_v32 = vmov 0.0  }
 0x16f   : > { %v778_v1 = vmul.f32 %v2668_v10, %v769_v60  ;;  %v779_v6 = vmul.f32 %v2668_v10, %v770_v62  ;;  %1578 = vmatprep.subr.bf16.mxu0 %v2185_v32  ;;  %vm2186_vm4 = vmmov 0   ;;  %1586 = vmatprep.subr.bf16.mxu1 %v2185_v32  ;;  %v2187_v43 = vmov 839922192  }
 0x170   : > { %v740_v5 = vadd.f32 %v732_v7, %v706_v53  ;;  %v741_v8 = vadd.f32 %v733_v63, %v707_v2  ;;  %1582 = vmatprep.mubr.msk.bf16.mxu0 %vm2186_vm4, %v2185_v32  ;;  %1579 = vmatpush3.bf16.msra.mxu0 %v1760_v31  ;;  %v872_v44 = vunpack.c.l.s4 %v2187_v43  ;;  %v874_v45 = vlaneseq }
 0x171   : > { %v786_v9 = vrot.slane %v778_v1, 1  ;;  %v787_v13 = vrot.slane %v779_v6, 1  ;;  %1580 = vmatprep.subr.bf16.mxu0 %v2185_v32  ;;  %1588 = vmatprep.mubr.msk.bf16.mxu1 %vm2186_vm4, %v2185_v32  ;;  %v2188_v46 = vmov 1985246804   ;;  %vm1081_vm5 = vcmask 1043456  }
 0x172   : > { %v761_v11 = vadd.f32 %v757_v61, %v740_v5  ;;  %v762_v14 = vadd.f32 %v758_v0, %v741_v8  ;;  %v879_v47 = vunpack.c.l.s4 %v2188_v46  ;;  %v873_v37 = vunpack.c.0.s8 %v872_v44  ;;  %v1545_v61 = vld [vmem:[#allocation7] ss:$0 sm:$0xff] }
 0x173   : > { %v2761_v49 = vshrl.u32 %v874_v45, 7  ;;  %v955_v6 = vcombine.high %v1545_v61, %v1545_v61  ;;  %vm1077_vm6 = vcmask 64512   ;;  %vm1297_vm7 = vcmask 257024  }
 0x174   : > { %v794_v54 = vadd.f32 %v786_v9, %v761_v11  ;;  %v795_v15 = vadd.f32 %v787_v13, %v762_v14  ;;  %1581 = vmatpush3.bf16.msra.mxu0 %v1761_v26  ;;  %v880_v50 = vunpack.c.0.s8 %v879_v47  ;;  %v1546_v11 = vld [vmem:[#allocation8] ss:$0 sm:$0xff] }
 0x175   : > { %v876_v51 = vsub.s32 %v873_v37, %v2761_v49 }
 0x176   : > { %v802_v16 = vcombine.high %v794_v54, %v794_v54  ;;  %v1543_v19 = vrot.slane %v794_v54, 9  ;;  %v803_v17 = vcombine.high %v795_v15, %v795_v15  ;;  %v1544_v18 = vrot.slane %v795_v15, 9 }
 0x177   : > { %v883_v52 = vsub.s32 %v880_v50, %v2761_v49  ;;  %v967_v54 = vcombine.high %v1546_v11, %v1546_v11 }
 0x178   : > { %v817_v20 = vrot.slane %v802_v16, 5  ;;  %v821_v21 = vrot.slane %v803_v17, 5 }
 0x17a   : > { %v2740_v59 = vsel %vm2702_vm3, %v1543_v19, %v817_v20  ;;  %v2744_v10 = vsel %vm2702_vm3, %v1544_v18, %v821_v21 }
 0x17b   : > { %v845_v22 = vmul.f32 %v2740_v59, %v2740_v59  ;;  %v830_v23 = vcombine.low %v2740_v59, %v2744_v10  ;;  %v846_v24 = vmul.f32 %v2744_v10, %v2744_v10 }
 0x17d   : > { %v837_v25 = vsel %vm833_vm2, %v830_v23, 0.0  ;;  %v852_v27 = vcombine.low %v845_v22, %v846_v24 }
 0x17e   : > { %838 = vadd.xlane.f32.xlu0 %v837_v25 }
 0x17f   : > { %v858_v30 = vsel %vm833_vm2, %v852_v27, 0.0 }
 0x180   : > { %859 = vadd.xlane.f32.xlu1 %v858_v30 }
 0x1f9   : > { %v836_v35 = vpop.xlane.xlu0 %835 }
 0x1fa   : > { %v841_v36 = vmul.f32 0.03125, %v836_v35 }
 0x1fb   : > { %v857_v38 = vpop.xlane.xlu1 %856 }
 0x1fc   : > { %v861_v39 = vmul.f32 0.03125, %v857_v38  ;;  %v863_v40 = vmul.f32 %v841_v36, %v841_v36  ;;  %v877_v55 = vrot.slane %v841_v36, %v876_v51  ;;  %v884_v56 = vrot.slane %v841_v36, %v883_v52 }
 0x1fe   : > { %v865_v41 = vsub.f32 %v861_v39, %v863_v40  ;;  %v903_v0 = vsub.f32 %v2711_v33, %v877_v55  ;;  %v904_v1 = vsub.f32 %v2715_v34, %v884_v56 }
 0x200   : > { %v867_v42 = vmax.f32 %v865_v41, 0.0 }
 0x202   : > { %v907_v48 = vadd.f32 1e-05, %v867_v42 }
 0x204   : > { %1764 = vrsqrt.f32 %v907_v48 }
 0x20b   : > { %v839_v53 = vpop.xlane.xlu0 %838 }
 0x20c   : > { %v842_v57 = vmul.f32 0.03125, %v839_v53 }
 0x20d   : > { %v860_v58 = vpop.xlane.xlu1 %859 }
 0x20e   : > { %v1765_v2 = vpop.eup %1764  ;;  %v862_v62 = vmul.f32 0.03125, %v860_v58  ;;  %v864_v63 = vmul.f32 %v842_v57, %v842_v57  ;;  %v891_v18 = vrot.slane %v842_v57, %v876_v51  ;;  %v898_v20 = vrot.slane %v842_v57, %v883_v52 }
 0x20f   : > { %v919_v60 = vrot.slane %v1765_v2, %v876_v51  ;;  %v926_v7 = vrot.slane %v1765_v2, %v883_v52 }
 0x210   : > { %v866_v5 = vsub.f32 %v862_v62, %v864_v63  ;;  %v905_v34 = vsub.f32 %v2740_v59, %v891_v18  ;;  %v906_v23 = vsub.f32 %v2744_v10, %v898_v20  ;;  %v1763_v18 = vld [vmem:[#allocation16 + $0x8] sm:$0xff]   ;;  %v1076_v20 = vld [vmem:[#allocation14] sm:$0x1] }
 0x211   : > { %v945_v8 = vmul.f32 %v919_v60, %v903_v0  ;;  %v946_v9 = vmul.f32 %v926_v7, %v904_v1 }
 0x212   : > { %v868_v13 = vmax.f32 %v866_v5, 0.0 }
 0x213   : > { %v957_v15 = vmul.f32 %v1545_v61, %v945_v8  ;;  %v958_v16 = vmul.f32 %v955_v6, %v946_v9  ;;  %v1017_v9 = vld [vmem:[#allocation11] sm:$0x1] }
 0x214   : > { %v908_v14 = vadd.f32 1e-05, %v868_v13 }
 0x215   : > { %v969_v19 = vadd.f32 %v1546_v11, %v957_v15  ;;  %v970_v17 = vadd.f32 %v967_v54, %v958_v16 }
 0x216   : > { %1766 = vrsqrt.f32 %v908_v14 }
 0x217   : > { %v973_v21 = vadd.f32 3.0, %v969_v19  ;;  %v974_v22 = vadd.f32 3.0, %v970_v17 }
 0x219   : > { %v977_v27 = vmax.f32 %v973_v21, 0.0  ;;  %v978_v30 = vmax.f32 %v974_v22, 0.0 }
 0x21b   : > { %v981_v38 = vmin.f32 %v977_v27, 6.0  ;;  %v982_v39 = vmin.f32 %v978_v30, 6.0  ;;  %v1131_v30 = vsub.s32 0, %v2761_v49 }
 0x21d   : > { %v985_v44 = vmul.f32 %v981_v38, %v969_v19  ;;  %v986_v45 = vmul.f32 %v982_v39, %v970_v17  ;;  %v1762_v17 = vld [vmem:[#allocation16] sm:$0xff]  }
 0x21f   : > { %v989_v48 = vmul.f32 0.16666667, %v985_v44  ;;  %v990_v37 = vmul.f32 0.16666667, %v986_v45 }
 0x220   : > { %v1767_v33 = vpop.eup %1766 }
 0x221   : > { %v933_v24 = vrot.slane %v1767_v33, %v876_v51  ;;  %v940_v25 = vrot.slane %v1767_v33, %v883_v52  ;;  %v997_v55 = vcombine.low %v989_v48, %v990_v37 }
 0x223   : > { %v947_v31 = vmul.f32 %v933_v24, %v905_v34  ;;  %v948_v26 = vmul.f32 %v940_v25, %v906_v23  ;;  %v1001_v57 = vsel %vm833_vm2, %v997_v55, 0.0 }
 0x225   : > { %v959_v35 = vmul.f32 %v1545_v61, %v947_v31  ;;  %v960_v36 = vmul.f32 %v955_v6, %v948_v26  ;;  %v1075_v6 = vld [vmem:[#allocation13] sm:$0xf] }
 0x226   : > { %v1083_v8 = vsel %vm1081_vm5, %v1075_v6, 0  ;;  %v1264_v6 = vcombine.high %v2620_v4, %v2620_v4 }
 0x227   : > { %v971_v40 = vadd.f32 %v1546_v11, %v959_v35  ;;  %v972_v41 = vadd.f32 %v967_v54, %v960_v36  ;;  %1587 = vmatpush3.bf16.msra.mxu1 %v1083_v8  ;;  %v1265_v8 = vcombine.high %v2678_v28, %v2678_v28 }
 0x228   : > { %1592 = vmatprep.subr.bf16.mxu1 %v2185_v32 }
 0x229   : > { %v975_v42 = vadd.f32 3.0, %v971_v40  ;;  %v976_v43 = vadd.f32 3.0, %v972_v41 }
 0x22b   : > { %v979_v46 = vmax.f32 %v975_v42, 0.0  ;;  %v980_v59 = vmax.f32 %v976_v43, 0.0 }
 0x22d   : > { %v983_v47 = vmin.f32 %v979_v46, 6.0  ;;  %v984_v10 = vmin.f32 %v980_v59, 6.0 }
 0x22f   : > { %v987_v50 = vmul.f32 %v983_v47, %v971_v40  ;;  %v988_v51 = vmul.f32 %v984_v10, %v972_v41 }
 0x231   : > { %v991_v52 = vmul.f32 0.16666667, %v987_v50  ;;  %v992_v53 = vmul.f32 0.16666667, %v988_v51 }
 0x233   : > { %v998_v56 = vcombine.low %v991_v52, %v992_v53 }
 0x235   : > { %v1002_v2 = vsel %vm833_vm2, %v998_v56, 0.0 }
 0x236   : > { %v1003_v58 = vadd.f32 %v1002_v2, %v1001_v57 }
 0x238   : > { %v1004_v60 = vrot.slane %v1003_v58, 4 }
 0x23a   : > { %v1005_v7 = vadd.f32 %v1004_v60, %v1003_v58 }
 0x23c   : > { %v1006_v61 = vrot.slane %v1005_v7, 2 }
 0x23e   : > { %v1007_v62 = vadd.f32 %v1006_v61, %v1005_v7 }
 0x240   : > { %v1008_v63 = vrot.slane %v1007_v62, 1 }
 0x242   : > { %v1009_v0 = vadd.f32 %v1008_v63, %v1007_v62 }
 0x244   : > { %v1011_v1 = vmul.f32 0.0625, %v1009_v0 }
 0x246   : > { %v1012_v5 = vpack.c.bf16 %v1011_v1, %v1011_v1 }
 0x248   : > { %1583 = vmatmul.mubr.msk.bf16.vlgmr.msra.gmra.mrb[0].mxu0 %vm833_vm2, %v1012_v5  ;;  %v1263_v5 = vcombine.high %v2618_v3, %v2618_v3 }
 0x31b   : > { %v1067_v11 = vpop.f32.mrb[0].mxu0 }
 0x31c   : > { %v1068_v13 = vadd.f32 %v1067_v11, %v1017_v9  ;;  %v1584_v14 = vpop.f32.mrb[1].mxu0  ;;  %v1266_v9 = vcombine.high %v2680_v29, %v2680_v29  ;;  %v1556_v11 = vrot.slane %v2618_v3, 9 }
 0x31d   : > { %v1070_v54 = vpop.f32.mrb[2].mxu0  ;;  %v1557_v14 = vrot.slane %v2620_v4, 9 }
 0x31e   : > { %v1073_v15 = vmax.f32 %v1068_v13, 0.0  ;;  %v1585_v16 = vpop.f32.mrb[3].mxu0  ;;  %v1269_v13 = vrot.slane %v1263_v5, 5  ;;  %v1273_v54 = vrot.slane %v1264_v6, 5 }
 0x31f   : > { %v1277_v16 = vrot.slane %v1265_v8, 5 }
 0x320   : > { %v1074_v19 = vpack.c.bf16 %v1073_v15, %v1073_v15  ;;  %v1558_v15 = vrot.slane %v2678_v28, 9 }
 0x322   : > { %1589 = vmatmul.mubr.msk.bf16.vlgmr.msra.gmra.mrb[0].mxu1 %vm1077_vm6, %v1074_v19  ;;  %v1559_v19 = vrot.slane %v2680_v29, 9  ;;  %v1278_v28 = vsel %vm2702_vm3, %v1558_v15, %v1277_v16 }
 0x323   : > { %1596 = vmatprep.mubr.msk.bf16.mxu1 %vm2186_vm4, %v2185_v32  ;;  %1593 = vmatpush3.bf16.msra.mxu1 %v1762_v17  ;;  %v1281_v17 = vrot.slane %v1266_v9, 5 }
 0x324   : > { %1594 = vmatprep.subr.bf16.mxu1 %v2185_v32 }
 0x325   : > { %v1282_v29 = vsel %vm2702_vm3, %v1559_v19, %v1281_v17 }
 0x327   : > { %1595 = vmatpush3.bf16.msra.mxu1 %v1763_v18 }
 0x3f5   : > { %v1119_v21 = vpop.f32.mrb[0].mxu1 }
 0x3f6   : > { %v1120_v22 = vadd.f32 %v1119_v21, %v1076_v20  ;;  %v1590_v33 = vpop.f32.mrb[1].mxu1  ;;  %v1554_v21 = vld [vmem:[#allocation17] ss:$0 sm:$0xff] }
 0x3f7   : > { %v1122_v34 = vpop.f32.mrb[2].mxu1  ;;  %v1274_v33 = vsel %vm2702_vm3, %v1557_v14, %v1273_v54 }
 0x3f8   : > { %v1125_v23 = vadd.f32 3.0, %v1120_v22  ;;  %v1591_v24 = vpop.f32.mrb[3].mxu1  ;;  %v1270_v22 = vsel %vm2702_vm3, %v1556_v11, %v1269_v13 }
 0x3f9   : > { %v1283_v24 = vcombine.low %v1270_v22, %v1274_v33 }
 0x3fa   : > { %v1126_v25 = vmax.f32 %v1125_v23, 0.0  ;;  %v1555_v23 = vld [vmem:[#allocation19] ss:$0 sm:$0xff] }
 0x3fc   : > { %v1127_v27 = vmin.f32 %v1126_v25, 6.0 }
 0x3fe   : > { %v1128_v31 = vmul.f32 0.16666667, %v1127_v27 }
 0x400   : > { %v1132_v26 = vrot.slane %v1128_v31, %v1131_v30  ;;  %v1284_v31 = vcombine.low %v1278_v28, %v1282_v29 }
 0x402   : > { %v1134_v35 = vcombine.high %v1132_v26, %v1132_v26  ;;  %v1136_v36 = vmul.f32 %v1132_v26, %v989_v48  ;;  %v1138_v39 = vmul.f32 %v1132_v26, %v991_v52 }
 0x404   : > { %v1137_v38 = vmul.f32 %v1134_v35, %v990_v37  ;;  %v1139_v32 = vmul.f32 %v1134_v35, %v992_v53 }
 0x406   : > { %v1144_v40 = vcombine.low %v1136_v36, %v1137_v38  ;;  %v1145_v41 = vcombine.low %v1138_v39, %v1139_v32 }
 0x408   : > { %v1148_v42 = vpack.c.bf16 %v1145_v41, %v1144_v40 }
 0x40a   : > { %1597 = vmatmul.mubr.msk.bf16.vlgmr.msra.gmra.mrb[4].mxu1 %vm833_vm2, %v1148_v42 }
 0x4dd   : > { %v1202_v43 = vpop.f32.mrb[4].mxu1 }
 0x4de   : > { %v1598_v44 = vpop.f32.mrb[5].mxu1  ;;  %v1211_v45 = vsel %vm833_vm2, %v1202_v43, 0.0  ;;  %v1219_v46 = vmul.f32 %v1202_v43, %v1202_v43 }
 0x4df   : > { %1212 = vadd.xlane.f32.xlu0 %v1211_v45  ;;  %v1205_v59 = vpop.f32.mrb[6].mxu1 }
 0x4e0   : > { %v1599_v49 = vpop.f32.mrb[7].mxu1  ;;  %v1214_v47 = vsel %vm833_vm2, %v1205_v59, 0.0  ;;  %v1220_v10 = vmul.f32 %v1205_v59, %v1205_v59  ;;  %v1221_v48 = vsel %vm833_vm2, %v1219_v46, 0.0 }
 0x4e1   : > { %1215 = vadd.xlane.f32.xlu1 %v1214_v47 }
 0x4e2   : > { %v1224_v37 = vsel %vm833_vm2, %v1220_v10, 0.0 }
 0x4e3   : > { %1222 = vadd.xlane.f32.xlu0 %v1221_v48 }
 0x4e5   : > { %1225 = vadd.xlane.f32.xlu1 %v1224_v37 }
 0x56c   : > { %v1213_v50 = vpop.xlane.xlu0 %1212 }
 0x56d   : > { %v1217_v51 = vmul.f32 0.03125, %v1213_v50 }
 0x56e   : > { %v1216_v52 = vpop.xlane.xlu1 %1215 }
 0x56f   : > { %v1218_v53 = vmul.f32 0.03125, %v1216_v52  ;;  %v1229_v56 = vmul.f32 %v1217_v51, %v1217_v51  ;;  %v1235_v18 = vsub.f32 %v1202_v43, %v1217_v51 }
 0x570   : > { %v1223_v55 = vpop.xlane.xlu0 %1222 }
 0x571   : > { %v1227_v57 = vmul.f32 0.03125, %v1223_v55  ;;  %v1230_v58 = vmul.f32 %v1218_v53, %v1218_v53  ;;  %v1236_v3 = vsub.f32 %v1205_v59, %v1218_v53 }
 0x572   : > { %v1226_v2 = vpop.xlane.xlu1 %1225 }
 0x573   : > { %v1231_v60 = vsub.f32 %v1227_v57, %v1229_v56  ;;  %v1228_v7 = vmul.f32 0.03125, %v1226_v2 }
 0x575   : > { %v1233_v61 = vmax.f32 %v1231_v60, 0.0  ;;  %v1232_v62 = vsub.f32 %v1228_v7, %v1230_v58 }
 0x577   : > { %v1237_v63 = vadd.f32 1e-05, %v1233_v61  ;;  %v1234_v0 = vmax.f32 %v1232_v62, 0.0 }
 0x579   : > { %1768 = vrsqrt.f32 %v1237_v63  ;;  %v1238_v1 = vadd.f32 1e-05, %v1234_v0 }
 0x57b   : > { %1770 = vrsqrt.f32 %v1238_v1 }
 0x583   : > { %v1769_v20 = vpop.eup %1768 }
 0x584   : > { %v1241_v34 = vmul.f32 %v1769_v20, %v1235_v18 }
 0x585   : > { %v1771_v4 = vpop.eup %1770 }
 0x586   : > { %v1249_v25 = vmul.f32 %v1554_v21, %v1241_v34  ;;  %v1242_v27 = vmul.f32 %v1771_v4, %v1236_v3 }
 0x588   : > { %v1257_v30 = vadd.f32 %v1555_v23, %v1249_v25  ;;  %v1250_v26 = vmul.f32 %v1554_v21, %v1242_v27 }
 0x58a   : > { %v1287_v35 = vadd.f32 %v1283_v24, %v1257_v30  ;;  %v1258_v36 = vadd.f32 %v1555_v23, %v1250_v26 }
 0x58c   : > { %v1567_v38 = vpack.c.bf16 %v1287_v35, %v1287_v35  ;;  %v1288_v39 = vadd.f32 %v1284_v31, %v1258_v36 }
 0x58e   : > { %v1568_v12 = vpack.c.bf16 %v1288_v39, %v1288_v39  ;;  %1298 = vst.msk [vmem:[%s535_s30] sm:$0xf] %vm1297_vm7, %v1567_v38 }
 0x590   : > { %1299 = vst.msk [vmem:[%s535_s30 + $0x4] sm:$0xf] %vm1297_vm7, %v1568_v12 }
 0x591   : > { %2095 = shalt.err (!%p2092_p0)
}
 0x592   : > { %s2096_s14 = scalar_lea.hbm %s2807_s0, 128  ;;  %s2100_s30 = scalar_lea.hbm %s2907_s3, 256 }
 0x593   : > { %p2097_p6 = scmp.ne.s32.totalorder %s2807_s0, %s2096_s14  ;;  %p2101_p9 = scmp.lt.u32.totalorder %s2807_s0, %s2907_s3 }
 0x594   : > { %p2102_p12 = scmp.lt.u32.totalorder %s2100_s30, %s2096_s14  ;;  %p2104_p1 = scmp.lt.u32.totalorder %s2096_s14, %s2807_s0 }
 0x595   : > { %p2098_p7 = pnand %p2097_p6, %p2908_p3 }
 0x596   : > { %p2103_p13 = por %p2102_p12, %p2101_p9 }
 0x597   : > { %p2099_p5 = pneg %p2098_p7 }
 0x598   : > { %p2105_p2 = por %p2104_p1, %p2103_p13 }
 0x59a   : > { %p2106_p8 = pnand %p2105_p2, %p2099_p5 }
 0x59c   : > { %2109 = shalt.err (!%p2106_p8)
}
 0x59d   : > { %s2190_s23 = smov 64   ;;  %s2191_s21 = smov 4  }
 0x59e   : > { %1645 = dma.vmem_to_hbm [thread:$0]  (%p2908_p3), %s2809_s24, 128, %s2807_s0, %s1301_s12, %s2190_s23, %s2190_s23, %s2191_s21  }
 0x59f PF: > { %s1329_s26 = sand.u32 1, %s2156_s17   ;;  %p2909_p4 = scmp.ne.s32.totalorder %s2888_s11, 0 }
 0x5a0   : > { %p2910_p10 = scmp.ge.s32.totalorder %s2168_s20, 2  ;;  %s1330_s29 = scalar_lea.sflag [#allocation4], %s1329_s26 }
 0x5a2   : > { %p1683_p11 = pnand %p2910_p10, %p2909_p4 }
 0x5a4   : > { %2151 = dma.done.wait (!%p1683_p11), %s1330_s29, 128  }
 0x5a5   : > { %2153 = vsyncadd (!%p1683_p11), %s1330_s29, 4294967168  ;;  %p29_p0 = scmp.ge.s32.totalorder %s2508_s27, 4   ;;  %s2911_s17 = smov %s2160_s18 }
 0x5a6   : > { %s2912_s18 = smov %s2164_s19  ;;  %s2913_s19 = smov %s2519_s22 }
 0x5a7   : > { %s2914_s20 = smov %s2508_s27  ;;  %31 = sbr.rel (!%p29_p0) target bundleno = 16 (0x10), region = 151 }
 0x5ae   :  { %1335 = vsyncpa [#allocation3], 1 }
 0x5af   :  { %1337 = vsyncpa [#allocation3 + $0x1], 1 }
 0x5b0   :  { %1338 = vsyncpa [#allocation6], 1 }
 0x5b1   :  { %1339 = vsyncpa [#allocation9], 1 }
 0x5b2   :  { %1340 = vsyncpa [#allocation12], 1 }
 0x5b3   :  { %1341 = vsyncpa [#allocation15], 1 }
 0x5b4   :  { %1342 = vsyncpa [#allocation18], 1 }
 0x5b5   :  { %1343 = vsyncpa [#allocation4], 1 }
 0x5b6   :  { %1345 = vsyncpa [#allocation4 + $0x1], 1 }

// kernel: ldp_net_projector.5
= control target key start
LH: loop header
LB: loop body
LE: loop exit
PB: predicated region body
PF: predicated region fallthrough
CT: control target
= control target key end

     0   :  { %s3005_s0 = inlined_call_operand.hbm [shape: bf16[2,3,3,32], index: 0, kind: input, shape index: {}]   ;;  %s3006_s1 = inlined_call_operand.hbm [shape: bf16[2,3,3,32], index: 1, kind: input, shape index: {}]   ;;  %s3007_s2 = inlined_call_operand.hbm [shape: bf16[2,3,3,32], index: 2, kind: input, shape index: {}]   ;;  %s3008_s3 = inlined_call_operand.hbm [shape: bf16[2,3,3,32], index: 3, kind: input, shape index: {}]   ;;  %s3009_s4 = inlined_call_operand.hbm [shape: f32[9,32], index: 4, kind: input, shape index: {}]   ;;  %s3010_s5 = inlined_call_operand.hbm [shape: f32[1,32], index: 5, kind: input, shape index: {}]   ;;  %s3011_s6 = inlined_call_operand.hbm [shape: f32[1,32], index: 6, kind: input, shape index: {}]   ;;  %s3012_s7 = inlined_call_operand.hbm [shape: bf16[32,8], index: 7, kind: input, shape index: {}]   ;;  %s3013_s8 = inlined_call_operand.hbm [shape: f32[1,8], index: 8, kind: input, shape index: {}]   ;;  %s3014_s9 = inlined_call_operand.hbm [shape: bf16[8,32], index: 9, kind: input, shape index: {}]   ;;  %s3015_s10 = inlined_call_operand.hbm [shape: f32[1,32], index: 10, kind: input, shape index: {}]   ;;  %s3016_s11 = inlined_call_operand.hbm [shape: bf16[32,32], index: 11, kind: input, shape index: {}]   ;;  %s3017_s12 = inlined_call_operand.hbm [shape: f32[1,32], index: 12, kind: input, shape index: {}]   ;;  %s3018_s13 = inlined_call_operand.hbm [shape: f32[1,32], index: 13, kind: input, shape index: {}]   ;;  %s3019_s14 = inlined_call_operand.hbm [shape: f32[2,4,32], index: 14, kind: output, shape index: {}]  }
   0x1   :  { %3049 = sst [smem:[#allocation41_spill]] %s3005_s0 }
   0x2   :  { %3050 = sst [smem:[#allocation42_spill]] %s3006_s1 }
   0x3   :  { %3051 = sst [smem:[#allocation43_spill]] %s3007_s2 }
   0x4   :  { %3052 = sst [smem:[#allocation44_spill]] %s3008_s3 }
   0x5   :  { %3053 = sst [smem:[#allocation45_spill]] %s3009_s4 }
   0x6   :  { %3054 = sst [smem:[#allocation46_spill]] %s3010_s5 }
   0x7   :  { %3055 = sst [smem:[#allocation47_spill]] %s3011_s6 }
   0x8   :  { %3056 = sst [smem:[#allocation48_spill]] %s3012_s7 }
   0x9   :  { %3057 = sst [smem:[#allocation49_spill]] %s3013_s8 }
   0xa   :  { %3058 = sst [smem:[#allocation50_spill]] %s3014_s9 }
   0xb   :  { %3059 = sst [smem:[#allocation51_spill]] %s3015_s10 }
   0xc   :  { %3060 = sst [smem:[#allocation52_spill]] %s3016_s11 }
   0xd   :  { %3061 = sst [smem:[#allocation53_spill]] %s3018_s13 }
   0xe   :  { %3062 = sst [smem:[#allocation54_spill]] %s3019_s14 }
   0xf   :  { %19 = vsyncpa [#allocation3], 0 }
  0x10   :  { %21 = vsyncpa [#allocation3 + $0x1], 0 }
  0x11   :  { %22 = vsyncpa [#allocation6], 0 }
  0x12   :  { %24 = vsyncpa [#allocation6 + $0x1], 0 }
  0x13   :  { %25 = vsyncpa [#allocation9], 0 }
  0x14   :  { %27 = vsyncpa [#allocation9 + $0x1], 0 }
  0x15   :  { %28 = vsyncpa [#allocation12], 0 }
  0x16   :  { %29 = vsyncpa [#allocation15], 0 }
  0x17   :  { %30 = vsyncpa [#allocation18], 0 }
  0x18   :  { %31 = vsyncpa [#allocation21], 0 }
  0x19   :  { %32 = vsyncpa [#allocation24], 0 }
  0x1a   :  { %33 = vsyncpa [#allocation4], 0 }
  0x1b   :  { %35 = vsyncpa [#allocation4 + $0x1], 0  ;;  %s2389_s29 = smov 0   ;;  %s2391_s30 = smov 0  }
  0x1c   :  { %s2393_s15 = smov 0   ;;  %s2395_s16 = smov 0  }
  0x1d LB: > { %3063 = sst [smem:[#allocation36_spill]] %s2274_s29  ;;  %s2288_s17 = smov [#allocation10]   ;;  %s2286_s16 = sphi %s2395_s16, %s3120_s16   ;;  %s2282_s15 = sphi %s2393_s15, %s3124_s15   ;;  %s2278_s30 = sphi %s2391_s30, %s3123_s30   ;;  %s2274_s29 = sphi %s2389_s29, %s3122_s29  }
  0x1e   : > { %s398_s18 = sshll.u32 %s2288_s17, 4  ;;  %s2410_s19 = sadd.s32 4294967295, %s2286_s16   ;;  %s2415_s18 = int_to_ptr.vmem [resolvable:$true] %s398_s18 }
  0x1f   : > { %p1504_p0 = scmp.ge.s32.totalorder %s2286_s16, 1  ;;  %p3026_p1 = scmp.eq.s32.totalorder %s2410_s19, 0 }
  0x20   : > { %p386_p2 = scmp.lt.s32.totalorder %s2286_s16, 3  ;;  %s2289_s21 = smov [#allocation11]  }
  0x21   : > { %s412_s22 = sshll.u32 %s2289_s21, 4  ;;  %s2290_s24 = smov [#allocation14]   ;;  %s2430_s22 = int_to_ptr.vmem [resolvable:$true] %s412_s22 }
  0x22   : > { %p2417_p3 = pnand %p1504_p0, %p386_p2  ;;  %s433_s25 = sshll.u32 %s2290_s24, 4  ;;  %s2432_s25 = int_to_ptr.vmem [resolvable:$true] %s433_s25 }
  0x23   : > { %s3067_s4 = sld [smem:[#allocation45_spill]] }
  0x24   : > { %s3064_s20 = scalar_select %p2417_p3, 1, 0 }
  0x25   : > { %p1657_p5 = pneg %p2417_p3 }
  0x26   : > { %3065 = sst [smem:[#allocation37_spill]] %s3064_s20 }
  0x27   : > { %p2426_p6 = pnand %p1657_p5, %p3026_p1 }
  0x29   : > { %s3066_s23 = scalar_select %p2426_p6, 1, 0 }
  0x2a   : > { %s1788_s28 = scalar_lea.hbm %s3067_s4, 256  ;;  %p2442_p8 = pneg %p2426_p6 }
  0x2b   : > { %p1789_p7 = scmp.ne.s32.totalorder %s3067_s4, %s1788_s28  ;;  %p1795_p11 = scmp.lt.u32.totalorder %s1788_s28, %s3067_s4 }
  0x2c   : > { %s3068_s21 = scalar_select %p2442_p8, 1, 0 }
  0x2d   : > { %p1791_p9 = pnand %p2442_p8, %p1789_p7 }
  0x2f   : > { %p1792_p10 = pneg %p1791_p9 }
  0x31   : > { %p1797_p12 = pnand %p1795_p11, %p1792_p10 }
  0x33   : > { %1800 = shalt.err (!%p1797_p12)
}
  0x34   : > { %s1801_s14 = scalar_lea.vmem %s2415_s18, 256  ;;  %p1809_p5 = scmp.lt.s32.totalorder %s2415_s18, %s2415_s18 }
  0x35   : > { %p1802_p13 = scmp.ne.s32.totalorder %s2415_s18, %s1801_s14  ;;  %p1810_p4 = scmp.lt.s32.totalorder %s1801_s14, %s1801_s14 }
  0x37   : > { %p1804_p0 = pnand %p1802_p13, %p2442_p8  ;;  %p1811_p7 = por %p1810_p4, %p1809_p5 }
  0x39   : > { %p1805_p2 = pneg %p1804_p0 }
  0x3b   : > { %p1812_p9 = pnand %p1811_p7, %p1805_p2 }
  0x3d   : > { %1815 = shalt.err (!%p1812_p9)
}
  0x3e   : > { %s2291_s26 = smov 128   ;;  %s2292_s20 = smov 8  }
  0x3f   : > { %1660 = dma.hbm_to_vmem [thread:$0]  (!%p2426_p6), %s3067_s4, 256, %s2415_s18, [#allocation9], %s2291_s26, %s2291_s26, %s2292_s20  }
  0x40   : > { %s3069_s5 = sld [smem:[#allocation46_spill]] }
  0x46   : > { %s1816_s3 = scalar_lea.hbm %s3069_s5, 16 }
  0x47   : > { %p1817_p4 = scmp.ne.s32.totalorder %s3069_s5, %s1816_s3  ;;  %p1823_p12 = scmp.lt.u32.totalorder %s1816_s3, %s3069_s5 }
  0x49   : > { %p1819_p10 = pnand %p1817_p4, %p2442_p8 }
  0x4b   : > { %p1820_p11 = pneg %p1819_p10 }
  0x4d   : > { %p1825_p13 = pnand %p1823_p12, %p1820_p11 }
  0x4f   : > { %1828 = shalt.err (!%p1825_p13)
}
  0x50   : > { %s1829_s18 = scalar_lea.vmem %s2430_s22, 16  ;;  %s1836_s2 = scalar_lea.vmem %s2430_s22, 32 }
  0x51   : > { %p1830_p0 = scmp.ne.s32.totalorder %s2430_s22, %s1829_s18  ;;  %p1837_p7 = scmp.lt.s32.totalorder %s2430_s22, %s2430_s22 }
  0x52   : > { %p1838_p9 = scmp.lt.s32.totalorder %s1836_s2, %s1829_s18 }
  0x53   : > { %p1832_p2 = pnand %p1830_p0, %p2442_p8 }
  0x54   : > { %p1839_p4 = por %p1838_p9, %p1837_p7 }
  0x55   : > { %p1833_p5 = pneg %p1832_p2 }
  0x57   : > { %p1840_p10 = pnand %p1839_p4, %p1833_p5 }
  0x59   : > { %1843 = shalt.err (!%p1840_p10)
}
  0x5a   : > { %1663 = dma.hbm_to_vmem [thread:$0]  (!%p2426_p6), %s3069_s5, 16, %s2430_s22, [#allocation12]  }
  0x5b   : > { %s3070_s7 = sld [smem:[#allocation48_spill]] }
  0x61   : > { %s1844_s20 = scalar_lea.hbm %s3070_s7, 256 }
  0x62   : > { %p1845_p11 = scmp.ne.s32.totalorder %s3070_s7, %s1844_s20  ;;  %p1851_p0 = scmp.lt.u32.totalorder %s1844_s20, %s3070_s7 }
  0x64   : > { %p1847_p12 = pnand %p1845_p11, %p2442_p8 }
  0x66   : > { %p1848_p13 = pneg %p1847_p12 }
  0x68   : > { %p1853_p2 = pnand %p1851_p0, %p1848_p13 }
  0x6a   : > { %1856 = shalt.err (!%p1853_p2)
}
  0x6b   : > { %s1857_s22 = scalar_lea.vmem %s2432_s25, 256  ;;  %p1865_p4 = scmp.lt.s32.totalorder %s2432_s25, %s2432_s25 }
  0x6c   : > { %p1858_p5 = scmp.ne.s32.totalorder %s2432_s25, %s1857_s22  ;;  %p1866_p10 = scmp.lt.s32.totalorder %s1857_s22, %s1857_s22 }
  0x6e   : > { %p1860_p7 = pnand %p1858_p5, %p2442_p8  ;;  %p1867_p11 = por %p1866_p10, %p1865_p4 }
  0x70   : > { %p1861_p9 = pneg %p1860_p7 }
  0x72   : > { %p1868_p12 = pnand %p1867_p11, %p1861_p9 }
  0x74   : > { %1871 = shalt.err (!%p1868_p12)
}
  0x75   : > { %s2293_s14 = smov 64   ;;  %s2294_s18 = smov 4  }
  0x76   : > { %1669 = dma.hbm_to_vmem [thread:$0]  (!%p2426_p6), %s3070_s7, 256, %s2432_s25, [#allocation15], %s2293_s14, %s2293_s14, %s2294_s18  }
  0x77   : > { %s2295_s3 = smov [#allocation17]   ;;  %s2296_s26 = smov [#allocation20]  }
  0x78   : > { %s458_s13 = sshll.u32 %s2295_s3, 4  ;;  %s479_s20 = sshll.u32 %s2296_s26, 4  ;;  %s459_s13 = int_to_ptr.vmem [resolvable:$true] %s458_s13  ;;  %s480_s20 = int_to_ptr.vmem [resolvable:$true] %s479_s20 }
  0x79   : > { %s3071_s9 = sld [smem:[#allocation50_spill]] }
  0x7f   : > { %s1872_s17 = scalar_lea.hbm %s3071_s9, 64 }
  0x80   : > { %p1873_p13 = scmp.ne.s32.totalorder %s3071_s9, %s1872_s17  ;;  %p1879_p5 = scmp.lt.u32.totalorder %s1872_s17, %s3071_s9 }
  0x82   : > { %p1875_p0 = pnand %p1873_p13, %p2442_p8 }
  0x84   : > { %p1876_p2 = pneg %p1875_p0 }
  0x86   : > { %p1881_p7 = pnand %p1879_p5, %p1876_p2 }
  0x88   : > { %1884 = shalt.err (!%p1881_p7)
}
  0x89   : > { %s1885_s25 = scalar_lea.vmem %s459_s13, 64  ;;  %p1893_p11 = scmp.lt.s32.totalorder %s459_s13, %s459_s13 }
  0x8a   : > { %p1886_p9 = scmp.ne.s32.totalorder %s459_s13, %s1885_s25  ;;  %p1894_p12 = scmp.lt.s32.totalorder %s1885_s25, %s1885_s25 }
  0x8c   : > { %p1888_p4 = pnand %p1886_p9, %p2442_p8  ;;  %p1895_p1 = por %p1894_p12, %p1893_p11 }
  0x8e   : > { %p1889_p10 = pneg %p1888_p4 }
  0x90   : > { %p1896_p3 = pnand %p1895_p1, %p1889_p10 }
  0x92   : > { %1899 = shalt.err (!%p1896_p3)
}
  0x93   : > { %1675 = dma.hbm_to_vmem [thread:$0]  (!%p2426_p6), %s3071_s9, 64, %s459_s13, [#allocation18]  }
  0x94   : > { %s3072_s11 = sld [smem:[#allocation52_spill]] }
  0x9a   : > { %s1900_s3 = scalar_lea.hbm %s3072_s11, 256 }
  0x9b   : > { %p1901_p13 = scmp.ne.s32.totalorder %s3072_s11, %s1900_s3  ;;  %p1907_p3 = scmp.lt.u32.totalorder %s1900_s3, %s3072_s11 }
  0x9d   : > { %p1903_p0 = pnand %p1901_p13, %p2442_p8 }
  0x9f   : > { %p1904_p1 = pneg %p1903_p0 }
  0xa1   : > { %p1909_p2 = pnand %p1907_p3, %p1904_p1 }
  0xa3   : > { %1912 = shalt.err (!%p1909_p2)
}
  0xa4   : > { %s1913_s24 = scalar_lea.vmem %s480_s20, 256  ;;  %p1921_p4 = scmp.lt.s32.totalorder %s480_s20, %s480_s20 }
  0xa5   : > { %p1914_p5 = scmp.ne.s32.totalorder %s480_s20, %s1913_s24  ;;  %p1922_p10 = scmp.lt.s32.totalorder %s1913_s24, %s1913_s24 }
  0xa7   : > { %p1916_p7 = pnand %p1914_p5, %p2442_p8  ;;  %p1923_p11 = por %p1922_p10, %p1921_p4 }
  0xa9   : > { %p1917_p9 = pneg %p1916_p7 }
  0xab   : > { %p1924_p12 = pnand %p1923_p11, %p1917_p9 }
  0xad   : > { %1927 = shalt.err (!%p1924_p12)
}
  0xae   : > { %1681 = dma.hbm_to_vmem [thread:$0]  (!%p2426_p6), %s3072_s11, 256, %s480_s20, [#allocation21], %s2293_s14, %s2293_s14, %s2294_s18  }
  0xaf   : > { %s1503_s25 = sadd.s32 4294967294, %s2286_s16   ;;  %s2554_s2 = sadd.s32 1, %s2286_s16  }
  0xb0   : > { %3073 = sst [smem:[#allocation38_spill]] %s2554_s2  ;;  %s48_s0 = sadd.s32 1, %s2282_s15 }
  0xb1   : > { %s45_s4 = ssub.s32 %s2286_s16, %s2554_s2  ;;  %p55_p13 = scmp.ne.s32.totalorder %s2282_s15, %s2278_s30 }
  0xb2   : > { %p46_p0 = scmp.eq.s32.totalorder %s45_s4, 0  ;;  %p56_p1 = scmp.eq.s32.totalorder %s2286_s16, 0 }
  0xb3   : > { %p61_p3 = scmp.ne.s32.totalorder %s2278_s30, %s2274_s29  ;;  %p373_p2 = scmp.eq.s32.totalorder %s2410_s19, 1 }
  0xb4   : > { %s2566_s5 = scalar_select %p46_p0, %s2282_s15, %s48_s0  }
  0xb5   : > { %p57_p5 = por %p56_p1, %p55_p13  ;;  %p3075_p7 = scmp.eq.s32.totalorder %s2410_s19, 0 }
  0xb6   : > { %3074 = sst [smem:[#allocation39_spill]] %s2566_s5  ;;  %p2574_p4 = por %p373_p2, %p55_p13 }
  0xb7   : > { %p2570_p9 = por %p3075_p7, %p61_p3  ;;  %p379_p10 = scmp.eq.s32.totalorder %s1503_s25, 1 }
  0xb8   : > { %s3077_s18 = scalar_select %p2574_p4, 1, 0 }
  0xb9   : > { %s3076_s14 = scalar_select %p2570_p9, 1, 0 }
  0xba   : > { %p1715_p11 = scmp.lt.s32.totalorder %s2286_s16, 2  ;;  %s3028_s20 = sand.u32 1, %s2282_s15  }
  0xbb   : > { %p2580_p12 = por %p379_p10, %p61_p3  ;;  %s2586_s26 = smul.u32 6, %s3028_s20 }
  0xbc   : > { %s2589_s27 = smul.u32 96, %s2286_s16  ;;  %p2591_p0 = pnand %p1715_p11, %p57_p5 }
  0xbd   : > { %s3078_s3 = scalar_select %p2580_p12, 1, 0 }
  0xbe   : > { %s3080_s28 = scalar_select %p2591_p0, 1, 0 }
  0xbf   : > { %3079 = sst [smem:[#allocation40_spill]] %s3078_s3  ;;  %s3030_s17 = sand.u32 1, %s2286_s16  }
  0xc0   : > { %s3081_s1 = sld [smem:[#allocation42_spill]]  ;;  %s540_s25 = scalar_lea.vmem [#allocation5], %s2586_s26 }
  0xc1   : > { %s547_s0 = sshll.u32 %s540_s25, 4  ;;  %s2607_s4 = scalar_lea.sflag [#allocation6], %s3030_s17  ;;  %s2603_s0 = int_to_ptr.vmem [resolvable:$true] %s547_s0 }
  0xc2   : > { %p2613_p1 = pneg %p2591_p0 }
  0xc4   : > { %s3082_s7 = scalar_select %p2613_p1, 1, 0 }
  0xc6   : > { %s2600_s22 = scalar_lea.hbm %s3081_s1, %s2589_s27  ;;  %s1933_s25 = scalar_lea.hbm %s3081_s1, 192 }
  0xc7   : > { %s1928_s20 = scalar_lea.hbm %s2600_s22, 96  ;;  %p1934_p5 = scmp.lt.u32.totalorder %s2600_s22, %s3081_s1 }
  0xc8   : > { %p1929_p13 = scmp.ne.s32.totalorder %s2600_s22, %s1928_s20  ;;  %p1935_p7 = scmp.lt.u32.totalorder %s1933_s25, %s1928_s20 }
  0xc9   : > { %p1937_p11 = scmp.lt.u32.totalorder %s1928_s20, %s2600_s22 }
  0xca   : > { %p1931_p3 = pnand %p2613_p1, %p1929_p13  ;;  %p1936_p10 = por %p1935_p7, %p1934_p5 }
  0xcc   : > { %p1932_p2 = pneg %p1931_p3  ;;  %p1938_p12 = por %p1937_p11, %p1936_p10 }
  0xce   : > { %p1939_p4 = pnand %p1938_p12, %p1932_p2 }
  0xd0   : > { %1942 = shalt.err (!%p1939_p4)
}
  0xd1   : > { %s1943_s17 = scalar_lea.vmem %s2603_s0, 96  ;;  %s2297_s24 = smov [#allocation5]  }
  0xd2   : > { %p1944_p13 = scmp.ne.s32.totalorder %s2603_s0, %s1943_s17  ;;  %s1948_s13 = sshll.u32 %s2297_s24, 4  ;;  %s1949_s13 = int_to_ptr.vmem [resolvable:$false] %s1948_s13 }
  0xd3   : > { %s1950_s9 = scalar_lea.vmem %s1949_s13, 192  ;;  %p1951_p6 = scmp.lt.s32.totalorder %s2603_s0, %s1949_s13 }
  0xd4   : > { %p1946_p3 = pnand %p1944_p13, %p2613_p1  ;;  %p1952_p8 = scmp.lt.s32.totalorder %s1950_s9, %s1943_s17 }
  0xd6   : > { %p1947_p9 = pneg %p1946_p3  ;;  %p1953_p5 = por %p1952_p8, %p1951_p6 }
  0xd8   : > { %p1954_p7 = pnand %p1953_p5, %p1947_p9 }
  0xda   : > { %1957 = shalt.err (!%p1954_p7)
}
  0xdb   : > { %s3044_s11 = smov 32   ;;  %s3046_s20 = smov 2  }
  0xdc   : > { %1694 = dma.hbm_to_vmem [thread:$0]  (!%p2591_p0), %s2600_s22, 96, %s2603_s0, %s2607_s4, %s3044_s11, %s3044_s11, %s3046_s20  }
  0xdd   : > { %s2300_s25 = smov [#allocation13]   ;;  %s2301_s1 = smov [#allocation16]  }
  0xde   : > { %s423_s24 = sshll.u32 %s2300_s25, 4  ;;  %s447_s13 = sshll.u32 %s2301_s1, 4  ;;  %s424_s24 = int_to_ptr.vmem [resolvable:$true] %s423_s24  ;;  %s2640_s13 = int_to_ptr.vmem [resolvable:$true] %s447_s13 }
  0xdf   : > { %s3083_s6 = sld [smem:[#allocation47_spill]]  ;;  %p3084_p8 = scmp.ne.s32.totalorder %s3068_s21, 0 }
  0xe5   : > { %s1958_s5 = scalar_lea.hbm %s3083_s6, 16 }
  0xe6   : > { %p1959_p6 = scmp.ne.s32.totalorder %s3083_s6, %s1958_s5  ;;  %p1965_p12 = scmp.lt.u32.totalorder %s1958_s5, %s3083_s6 }
  0xe8   : > { %p1961_p9 = pnand %p1959_p6, %p3084_p8 }
  0xea   : > { %p1962_p4 = pneg %p1961_p9 }
  0xec   : > { %p1967_p2 = pnand %p1965_p12, %p1962_p4 }
  0xee   : > { %1970 = shalt.err (!%p1967_p2)
}
  0xef   : > { %s1971_s1 = scalar_lea.vmem %s424_s24, 16  ;;  %s1978_s0 = scalar_lea.vmem %s424_s24, 32 }
  0xf0   : > { %p1972_p10 = scmp.ne.s32.totalorder %s424_s24, %s1971_s1  ;;  %p1979_p3 = scmp.lt.s32.totalorder %s424_s24, %s424_s24 }
  0xf1   : > { %p1980_p5 = scmp.lt.s32.totalorder %s1978_s0, %s1971_s1 }
  0xf2   : > { %p1974_p11 = pnand %p1972_p10, %p3084_p8 }
  0xf3   : > { %p1981_p7 = por %p1980_p5, %p1979_p3 }
  0xf4   : > { %p1975_p13 = pneg %p1974_p11 }
  0xf6   : > { %p1982_p0 = pnand %p1981_p7, %p1975_p13 }
  0xf8   : > { %1985 = shalt.err (!%p1982_p0)
}
  0xf9   : > { %p3085_p6 = scmp.ne.s32.totalorder %s3066_s23, 0  ;;  %s3086_s8 = sld [smem:[#allocation49_spill]] }
  0xfb   : > { %1666 = dma.hbm_to_vmem [thread:$0]  (!%p3085_p6), %s3083_s6, 16, %s424_s24, [#allocation12]  }
  0xff   : > { %s1986_s25 = scalar_lea.hbm %s3086_s8, 16 }
 0x100   : > { %p1987_p9 = scmp.ne.s32.totalorder %s3086_s8, %s1986_s25  ;;  %p1993_p0 = scmp.lt.u32.totalorder %s1986_s25, %s3086_s8 }
 0x102   : > { %p1989_p4 = pnand %p1987_p9, %p3084_p8 }
 0x104   : > { %p1990_p12 = pneg %p1989_p4 }
 0x106   : > { %p1995_p2 = pnand %p1993_p0, %p1990_p12 }
 0x108   : > { %1998 = shalt.err (!%p1995_p2)
}
 0x109   : > { %s1999_s24 = scalar_lea.vmem %s2640_s13, 16  ;;  %s2006_s0 = scalar_lea.vmem %s2640_s13, 32 }
 0x10a   : > { %p2000_p10 = scmp.ne.s32.totalorder %s2640_s13, %s1999_s24  ;;  %p2007_p3 = scmp.lt.s32.totalorder %s2640_s13, %s2640_s13 }
 0x10b   : > { %p2008_p5 = scmp.lt.s32.totalorder %s2006_s0, %s1999_s24 }
 0x10c   : > { %p2002_p11 = pnand %p2000_p10, %p3084_p8 }
 0x10d   : > { %p2009_p7 = por %p2008_p5, %p2007_p3 }
 0x10e   : > { %p2003_p13 = pneg %p2002_p11 }
 0x110   : > { %p2010_p9 = pnand %p2009_p7, %p2003_p13 }
 0x112   : > { %2013 = shalt.err (!%p2010_p9)
}
 0x113   : > { %1672 = dma.hbm_to_vmem [thread:$0]  (!%p3085_p6), %s3086_s8, 16, %s2640_s13, [#allocation15]  }
 0x114   : > { %s2302_s29 = smov [#allocation19]   ;;  %s2303_s25 = smov [#allocation22]  }
 0x115   : > { %s469_s5 = sshll.u32 %s2302_s29, 4  ;;  %s493_s17 = sshll.u32 %s2303_s25, 4  ;;  %s470_s5 = int_to_ptr.vmem [resolvable:$true] %s469_s5  ;;  %s2684_s17 = int_to_ptr.vmem [resolvable:$true] %s493_s17 }
 0x116   : > { %s3087_s10 = sld [smem:[#allocation51_spill]] }
 0x11c   : > { %s2014_s1 = scalar_lea.hbm %s3087_s10, 16 }
 0x11d   : > { %p2015_p4 = scmp.ne.s32.totalorder %s3087_s10, %s2014_s1  ;;  %p2021_p2 = scmp.lt.u32.totalorder %s2014_s1, %s3087_s10 }
 0x11f   : > { %p2017_p12 = pnand %p2015_p4, %p3084_p8 }
 0x121   : > { %p2018_p0 = pneg %p2017_p12 }
 0x123   : > { %p2023_p10 = pnand %p2021_p2, %p2018_p0 }
 0x125   : > { %2026 = shalt.err (!%p2023_p10)
}
 0x126   : > { %s2027_s3 = scalar_lea.vmem %s470_s5, 16  ;;  %s2034_s29 = scalar_lea.vmem %s470_s5, 32 }
 0x127   : > { %p2028_p11 = scmp.ne.s32.totalorder %s470_s5, %s2027_s3  ;;  %p2035_p5 = scmp.lt.s32.totalorder %s470_s5, %s470_s5 }
 0x128   : > { %p2036_p7 = scmp.lt.s32.totalorder %s2034_s29, %s2027_s3 }
 0x129   : > { %p2030_p13 = pnand %p2028_p11, %p3084_p8 }
 0x12a   : > { %p2037_p9 = por %p2036_p7, %p2035_p5 }
 0x12b   : > { %p2031_p3 = pneg %p2030_p13 }
 0x12d   : > { %p2038_p1 = pnand %p2037_p9, %p2031_p3 }
 0x12f   : > { %2041 = shalt.err (!%p2038_p1)
}
 0x130   : > { %1678 = dma.hbm_to_vmem [thread:$0]  (!%p3085_p6), %s3087_s10, 16, %s470_s5, [#allocation18]  }
 0x131   : > { %s2042_s24 = scalar_lea.hbm %s3017_s12, 16 }
 0x132   : > { %p2043_p4 = scmp.ne.s32.totalorder %s3017_s12, %s2042_s24  ;;  %p2049_p1 = scmp.lt.u32.totalorder %s2042_s24, %s3017_s12 }
 0x134   : > { %p2045_p12 = pnand %p2043_p4, %p3084_p8 }
 0x136   : > { %p2046_p0 = pneg %p2045_p12 }
 0x138   : > { %p2051_p2 = pnand %p2049_p1, %p2046_p0 }
 0x13a   : > { %2054 = shalt.err (!%p2051_p2)
}
 0x13b   : > { %s2055_s5 = scalar_lea.vmem %s2684_s17, 16  ;;  %s2062_s29 = scalar_lea.vmem %s2684_s17, 32 }
 0x13c   : > { %p2056_p10 = scmp.ne.s32.totalorder %s2684_s17, %s2055_s5  ;;  %p2063_p3 = scmp.lt.s32.totalorder %s2684_s17, %s2684_s17 }
 0x13d   : > { %p2064_p5 = scmp.lt.s32.totalorder %s2062_s29, %s2055_s5 }
 0x13e   : > { %p2058_p11 = pnand %p2056_p10, %p3084_p8 }
 0x13f   : > { %p2065_p7 = por %p2064_p5, %p2063_p3 }
 0x140   : > { %p2059_p13 = pneg %p2058_p11 }
 0x142   : > { %p2066_p9 = pnand %p2065_p7, %p2059_p13 }
 0x144   : > { %2069 = shalt.err (!%p2066_p9)
}
 0x145   : > { %1684 = dma.hbm_to_vmem [thread:$0]  (!%p3085_p6), %s3017_s12, 16, %s2684_s17, [#allocation21]  }
 0x146   : > { %s2304_s22 = smov [#allocation23]   ;;  %s3088_s2 = sld [smem:[#allocation41_spill]] }
 0x147   : > { %s504_s1 = sshll.u32 %s2304_s22, 4  ;;  %s3089_s29 = sld [smem:[#allocation53_spill]]  ;;  %s505_s1 = int_to_ptr.vmem [resolvable:$true] %s504_s1 }
 0x14c   : > { %s2732_s13 = scalar_lea.hbm %s3088_s2, %s2589_s27 }
 0x14d   : > { %s3090_s11 = smov %s3089_s29  ;;  %s2070_s20 = scalar_lea.hbm %s3089_s29, 16 }
 0x14e   : > { %p2071_p4 = scmp.ne.s32.totalorder %s3090_s11, %s2070_s20  ;;  %p2077_p1 = scmp.lt.u32.totalorder %s2070_s20, %s3090_s11 }
 0x150   : > { %p2073_p12 = pnand %p2071_p4, %p3084_p8 }
 0x152   : > { %p2074_p0 = pneg %p2073_p12 }
 0x154   : > { %p2079_p2 = pnand %p2077_p1, %p2074_p0 }
 0x156   : > { %2082 = shalt.err (!%p2079_p2)
}
 0x157   : > { %s2083_s9 = scalar_lea.vmem %s505_s1, 16  ;;  %s2090_s22 = scalar_lea.vmem %s505_s1, 32 }
 0x158   : > { %p2084_p10 = scmp.ne.s32.totalorder %s505_s1, %s2083_s9  ;;  %p2091_p3 = scmp.lt.s32.totalorder %s505_s1, %s505_s1 }
 0x159   : > { %p2092_p5 = scmp.lt.s32.totalorder %s2090_s22, %s2083_s9 }
 0x15a   : > { %p2086_p11 = pnand %p2084_p10, %p3084_p8 }
 0x15b   : > { %p2093_p7 = por %p2092_p5, %p2091_p3 }
 0x15c   : > { %p2087_p13 = pneg %p2086_p11 }
 0x15e   : > { %p2094_p9 = pnand %p2093_p7, %p2087_p13 }
 0x160   : > { %2097 = shalt.err (!%p2094_p9)
}
 0x161   : > { %1687 = dma.hbm_to_vmem [thread:$0]  (!%p3085_p6), %s3090_s11, 16, %s505_s1, [#allocation24]  }
 0x162   : > { %s519_s21 = scalar_lea.vmem [#allocation2], %s2586_s26  ;;  %s3091_s3 = sld [smem:[#allocation43_spill]] }
 0x163   : > { %s526_s20 = sshll.u32 %s519_s21, 4  ;;  %s3092_s5 = sand.u32 1, %s2282_s15   ;;  %s2753_s20 = int_to_ptr.vmem [resolvable:$true] %s526_s20 }
 0x164   : > { %s2763_s29 = scalar_lea.sflag [#allocation3], %s3092_s5  ;;  %s2098_s17 = scalar_lea.hbm %s2732_s13, 96 }
 0x165   : > { %p2099_p8 = scmp.ne.s32.totalorder %s2732_s13, %s2098_s17  ;;  %p3093_p4 = scmp.ne.s32.totalorder %s3082_s7, 0 }
 0x166   : > { %s2103_s1 = scalar_lea.hbm %s3088_s2, 192  ;;  %p2104_p6 = scmp.lt.u32.totalorder %s2732_s13, %s3088_s2 }
 0x167   : > { %p2101_p12 = pnand %p2099_p8, %p3093_p4  ;;  %p2105_p1 = scmp.lt.u32.totalorder %s2103_s1, %s2098_s17 }
 0x168   : > { %s2759_s23 = scalar_lea.hbm %s3091_s3, %s2589_s27  ;;  %p2107_p10 = scmp.lt.u32.totalorder %s2098_s17, %s2732_s13 }
 0x169   : > { %p2102_p0 = pneg %p2101_p12  ;;  %p2106_p2 = por %p2105_p1, %p2104_p6 }
 0x16b   : > { %p2108_p11 = por %p2107_p10, %p2106_p2 }
 0x16d   : > { %p2109_p13 = pnand %p2108_p11, %p2102_p0 }
 0x16f   : > { %2112 = shalt.err (!%p2109_p13)
}
 0x170   : > { %s2113_s8 = scalar_lea.vmem %s2753_s20, 96  ;;  %s2305_s21 = smov [#allocation2]  }
 0x171   : > { %p2114_p3 = scmp.ne.s32.totalorder %s2753_s20, %s2113_s8  ;;  %s2118_s24 = sshll.u32 %s2305_s21, 4  ;;  %s2119_s24 = int_to_ptr.vmem [resolvable:$false] %s2118_s24 }
 0x172   : > { %s2120_s0 = scalar_lea.vmem %s2119_s24, 192  ;;  %p2121_p9 = scmp.lt.s32.totalorder %s2753_s20, %s2119_s24 }
 0x173   : > { %p2116_p5 = pnand %p2114_p3, %p3093_p4  ;;  %p2122_p8 = scmp.lt.s32.totalorder %s2120_s0, %s2113_s8 }
 0x175   : > { %p2117_p7 = pneg %p2116_p5  ;;  %p2123_p12 = por %p2122_p8, %p2121_p9 }
 0x177   : > { %p2124_p6 = pnand %p2123_p12, %p2117_p7 }
 0x179   : > { %2127 = shalt.err (!%p2124_p6)
}
 0x17a   : > { %p3094_p0 = scmp.ne.s32.totalorder %s3080_s28, 0  ;;  %s3095_s5 = smov 2  }
 0x17b   : > { %s3096_s17 = smov 32   ;;  %s561_s25 = scalar_lea.vmem [#allocation7], %s2586_s26 }
 0x17c   : > { %1691 = dma.hbm_to_vmem [thread:$0]  (!%p3094_p0), %s2732_s13, 96, %s2753_s20, %s2763_s29, %s3096_s17, %s3096_s17, %s3095_s5  }
 0x17d   : > { %s568_s9 = sshll.u32 %s561_s25, 4  ;;  %s3097_s6 = sld [smem:[#allocation44_spill]]  ;;  %s2791_s9 = int_to_ptr.vmem [resolvable:$true] %s568_s9 }
 0x17e   : > { %s2128_s21 = scalar_lea.hbm %s2759_s23, 96  ;;  %s2133_s2 = scalar_lea.hbm %s3091_s3, 192 }
 0x17f   : > { %p2129_p1 = scmp.ne.s32.totalorder %s2759_s23, %s2128_s21  ;;  %p2134_p11 = scmp.lt.u32.totalorder %s2759_s23, %s3091_s3 }
 0x180   : > { %p2135_p13 = scmp.lt.u32.totalorder %s2133_s2, %s2128_s21  ;;  %p2137_p5 = scmp.lt.u32.totalorder %s2128_s21, %s2759_s23 }
 0x181   : > { %p2131_p2 = pnand %p2129_p1, %p3093_p4 }
 0x182   : > { %p2136_p3 = por %p2135_p13, %p2134_p11 }
 0x183   : > { %s2797_s8 = scalar_lea.hbm %s3097_s6, %s2589_s27  ;;  %p2132_p10 = pneg %p2131_p2 }
 0x184   : > { %p2138_p7 = por %p2137_p5, %p2136_p3 }
 0x186   : > { %p2139_p9 = pnand %p2138_p7, %p2132_p10 }
 0x188   : > { %2142 = shalt.err (!%p2139_p9)
}
 0x189   : > { %s2143_s27 = scalar_lea.vmem %s2791_s9, 96  ;;  %s2306_s20 = smov [#allocation7]  }
 0x18a   : > { %p2144_p8 = scmp.ne.s32.totalorder %s2791_s9, %s2143_s27  ;;  %s2148_s29 = sshll.u32 %s2306_s20, 4  ;;  %s2149_s29 = int_to_ptr.vmem [resolvable:$false] %s2148_s29 }
 0x18b   : > { %s2150_s10 = scalar_lea.vmem %s2149_s29, 192  ;;  %p2151_p1 = scmp.lt.s32.totalorder %s2791_s9, %s2149_s29 }
 0x18c   : > { %p2146_p12 = pnand %p2144_p8, %p3093_p4  ;;  %p2152_p2 = scmp.lt.s32.totalorder %s2150_s10, %s2143_s27 }
 0x18e   : > { %p2147_p6 = pneg %p2146_p12  ;;  %p2153_p11 = por %p2152_p2, %p2151_p1 }
 0x190   : > { %p2154_p13 = pnand %p2153_p11, %p2147_p6 }
 0x192   : > { %2157 = shalt.err (!%p2154_p13)
}
 0x193   : > { %1697 = dma.hbm_to_vmem [thread:$0]  (!%p3094_p0), %s2759_s23, 96, %s2791_s9, %s2607_s4, %s3096_s17, %s3096_s17, %s3095_s5  }
 0x194   : > { %s582_s2 = scalar_lea.vmem [#allocation8], %s2586_s26  ;;  %s3098_s1 = sand.u32 1, %s2286_s16  }
 0x195   : > { %s589_s25 = sshll.u32 %s582_s2, 4  ;;  %s2829_s22 = scalar_lea.sflag [#allocation9], %s3098_s1  ;;  %s2825_s25 = int_to_ptr.vmem [resolvable:$true] %s589_s25 }
 0x196   : > { %s2158_s21 = scalar_lea.hbm %s2797_s8, 96  ;;  %s2163_s13 = scalar_lea.hbm %s3097_s6, 192 }
 0x197   : > { %p2159_p10 = scmp.ne.s32.totalorder %s2797_s8, %s2158_s21  ;;  %p2164_p7 = scmp.lt.u32.totalorder %s2797_s8, %s3097_s6 }
 0x198   : > { %p2165_p9 = scmp.lt.u32.totalorder %s2163_s13, %s2158_s21  ;;  %p2167_p12 = scmp.lt.u32.totalorder %s2158_s21, %s2797_s8 }
 0x199   : > { %p2161_p3 = pnand %p2159_p10, %p3093_p4 }
 0x19a   : > { %p2166_p8 = por %p2165_p9, %p2164_p7 }
 0x19b   : > { %p2162_p5 = pneg %p2161_p3 }
 0x19c   : > { %p2168_p6 = por %p2167_p12, %p2166_p8 }
 0x19e   : > { %p2169_p1 = pnand %p2168_p6, %p2162_p5 }
 0x1a0   : > { %2172 = shalt.err (!%p2169_p1)
}
 0x1a1   : > { %s2173_s26 = scalar_lea.vmem %s2825_s25, 96  ;;  %s2307_s4 = smov [#allocation8]  }
 0x1a2   : > { %p2174_p2 = scmp.ne.s32.totalorder %s2825_s25, %s2173_s26  ;;  %s2178_s23 = sshll.u32 %s2307_s4, 4  ;;  %s2179_s23 = int_to_ptr.vmem [resolvable:$false] %s2178_s23 }
 0x1a3   : > { %s2180_s9 = scalar_lea.vmem %s2179_s23, 192  ;;  %p2181_p10 = scmp.lt.s32.totalorder %s2825_s25, %s2179_s23 }
 0x1a4   : > { %p2176_p11 = pnand %p2174_p2, %p3093_p4  ;;  %p2182_p3 = scmp.lt.s32.totalorder %s2180_s9, %s2173_s26 }
 0x1a6   : > { %p2177_p13 = pneg %p2176_p11  ;;  %p2183_p7 = por %p2182_p3, %p2181_p10 }
 0x1a8   : > { %p2184_p9 = pnand %p2183_p7, %p2177_p13 }
 0x1aa   : > { %2187 = shalt.err (!%p2184_p9)
}
 0x1ab   : > { %1700 = dma.hbm_to_vmem [thread:$0]  (!%p3094_p0), %s2797_s8, 96, %s2825_s25, %s2829_s22, %s3096_s17, %s3096_s17, %s3095_s5  }
 0x1ac   : > { %s3099_s7 = sld [smem:[#allocation37_spill]] }
 0x1b2   : > { %p3100_p4 = scmp.ne.s32.totalorder %s3099_s7, 0 }
 0x1b3   : > { %s2859_s29 = sand.u32 (!%p3100_p4), 1, %s2278_s30   ;;  %p3101_p5 = scmp.ne.s32.totalorder (!%p3100_p4), %s3076_s14, 0 }
 0x1b4   : > { %601 = sbr.rel (%p3100_p4) target bundleno = 1551 (0x60f), region = 76  ;;  %s604_s2 = scalar_lea.sflag (!%p3100_p4), [#allocation3], %s2859_s29 }
 0x1b5   : > { %s1606_s10 = smul.u32 (!%p3100_p4), 6, %s2859_s29 }
 0x1b7   : > { %s2863_s1 = scalar_lea.vmem (!%p3100_p4), [#allocation2], %s1606_s10 }
 0x1bb   : > { %2233 = dma.done.wait (%p3101_p5), %s604_s2, 96  }
 0x1bc   : > { %2235 = vsyncadd (%p3101_p5), %s604_s2, 4294967200  ;;  %s612_s28 = sand.u32 1, %s2410_s19   ;;  %s2870_s17 = scalar_lea.vmem [#allocation5], %s1606_s10 }
 0x1bd   : > { %s613_s5 = scalar_lea.sflag [#allocation6], %s612_s28 }
 0x1be   : > { %2237 = dma.done.wait (%p3101_p5), %s613_s5, 192  }
 0x1bf   : > { %2239 = vsyncadd (%p3101_p5), %s613_s5, 4294967104  ;;  %s2876_s8 = scalar_lea.vmem [#allocation7], %s1606_s10  ;;  %s631_s25 = scalar_lea.sflag [#allocation9], %s612_s28 }
 0x1c0   : > { %s634_s22 = scalar_lea.vmem [#allocation8], %s1606_s10 }
 0x1c1   : > { %2241 = dma.done.wait (%p3101_p5), %s631_s25, 96  }
 0x1c2   : > { %2243 = vsyncadd (%p3101_p5), %s631_s25, 4294967200  ;;  %p3102_p0 = scmp.eq.s32.totalorder %s2410_s19, 0 }
 0x1c4   : > { %2245 = dma.done.wait (%p3102_p0), [#allocation9], 256   ;;  %p3103_p8 = pmov %p3102_p0 }
 0x1c5   : > { %p3104_p12 = pmov %p3102_p0 }
 0x1c6   : > { %2247 = vsyncadd (%p3103_p8), [#allocation9], 4294967040 }
 0x1c7   : > { %2249 = dma.done.wait (%p3104_p12), [#allocation12], 32   ;;  %p3105_p6 = pmov %p3102_p0 }
 0x1c8   : > { %p3106_p1 = pmov %p3102_p0 }
 0x1c9   : > { %2251 = vsyncadd (%p3105_p6), [#allocation12], 4294967264 }
 0x1ca   : > { %2253 = dma.done.wait (%p3106_p1), [#allocation15], 272   ;;  %p3107_p2 = pmov %p3102_p0 }
 0x1cb   : > { %p3108_p11 = pmov %p3102_p0 }
 0x1cc   : > { %2255 = vsyncadd (%p3107_p2), [#allocation15], 4294967024 }
 0x1cd   : > { %2257 = dma.done.wait (%p3108_p11), [#allocation18], 80   ;;  %p3109_p13 = pmov %p3102_p0 }
 0x1ce   : > { %p3110_p10 = pmov %p3102_p0 }
 0x1cf   : > { %2259 = vsyncadd (%p3109_p13), [#allocation18], 4294967216 }
 0x1d0   : > { %2261 = dma.done.wait (%p3110_p10), [#allocation21], 272   ;;  %p3111_p3 = pmov %p3102_p0 }
 0x1d1   : > { %p3112_p7 = pmov %p3102_p0 }
 0x1d2   : > { %2263 = vsyncadd (%p3111_p3), [#allocation21], 4294967024 }
 0x1d3   : > { %2265 = dma.done.wait (%p3112_p7), [#allocation24], 16   ;;  %p3113_p9 = pmov %p3102_p0 }
 0x1d4   : > { %v735_v0 = vld [vmem:[%s634_s22] sm:$0x1]  ;;  %v736_v1 = vld [vmem:[%s634_s22 + $0x2] sm:$0x1]  ;;  %v1532_v2 = vld [vmem:[#allocation10 + $0x4] ss:$0 sm:$0xff] }
 0x1d5   : > { %2267 = vsyncadd (%p3113_p9), [#allocation24], 4294967280  ;;  %v737_v3 = vunpack.c.l.bf16 %v735_v0  ;;  %v738_v4 = vunpack.c.l.bf16 %v736_v1  ;;  %v746_v5 = vld [vmem:[%s2863_s1] sm:$0x1]  ;;  %v747_v6 = vld [vmem:[%s2863_s1 + $0x2] sm:$0x1] }
 0x1d6   : > { %v1533_v7 = vld [vmem:[#allocation10] ss:$0 sm:$0xff]  ;;  %v748_v8 = vunpack.c.l.bf16 %v746_v5  ;;  %v749_v9 = vunpack.c.l.bf16 %v747_v6  ;;  %v759_v10 = vld [vmem:[%s2870_s17] sm:$0x1]  ;;  %v760_v11 = vld [vmem:[%s2870_s17 + $0x2] sm:$0x1] }
 0x1d7   : > { %v1534_v12 = vld [vmem:[#allocation10 + $0x1] ss:$0 sm:$0xff]  ;;  %v744_v13 = vmul.f32 %v1532_v2, %v737_v3  ;;  %v745_v14 = vmul.f32 %v1532_v2, %v738_v4  ;;  %v761_v15 = vunpack.c.l.bf16 %v759_v10  ;;  %v762_v16 = vunpack.c.l.bf16 %v760_v11  ;;  %v772_v17 = vld [vmem:[%s2863_s1] sm:$0x3]  ;;  %v773_v18 = vld [vmem:[%s2863_s1 + $0x2] sm:$0x3] }
 0x1d8   : > { %v1535_v19 = vld [vmem:[#allocation10 + $0x2] ss:$0 sm:$0xff]  ;;  %v755_v20 = vmul.f32 %v1533_v7, %v748_v8  ;;  %v756_v21 = vmul.f32 %v1533_v7, %v749_v9  ;;  %v774_v22 = vunpack.c.l.bf16 %v772_v17  ;;  %v775_v23 = vunpack.c.l.bf16 %v773_v18  ;;  %v793_v24 = vld [vmem:[%s2876_s8] sm:$0x1]  ;;  %v794_v25 = vld [vmem:[%s2876_s8 + $0x2] sm:$0x1] }
 0x1d9   : > { %v1538_v26 = vld [vmem:[#allocation10 + $0x3] ss:$0 sm:$0xff]  ;;  %v768_v27 = vmul.f32 %v1534_v12, %v761_v15  ;;  %v769_v28 = vmul.f32 %v1534_v12, %v762_v16  ;;  %v795_v29 = vunpack.c.l.bf16 %v793_v24  ;;  %v796_v30 = vunpack.c.l.bf16 %v794_v25  ;;  %v806_v31 = vld [vmem:[%s2876_s8] sm:$0x3]  ;;  %v807_v32 = vld [vmem:[%s2876_s8 + $0x2] sm:$0x3] }
 0x1da   : > { %v757_v33 = vadd.f32 %v755_v20, %v744_v13  ;;  %v758_v34 = vadd.f32 %v756_v21, %v745_v14  ;;  %v781_v35 = vmul.f32 %v1535_v19, %v774_v22  ;;  %v782_v36 = vmul.f32 %v1535_v19, %v775_v23  ;;  %v1539_v37 = vld [vmem:[#allocation10 + $0x5] ss:$0 sm:$0xff]  ;;  %v1542_v38 = vld [vmem:[%s2863_s1 + $0x2] sm:$0x1]  ;;  %v1543_v39 = vld [vmem:[%s2863_s1 + $0x4] sm:$0x1] }
 0x1db   : > { %v802_v40 = vmul.f32 %v1538_v26, %v795_v29  ;;  %v803_v41 = vmul.f32 %v1538_v26, %v796_v30  ;;  %v808_v42 = vunpack.c.l.bf16 %v806_v31  ;;  %v809_v43 = vunpack.c.l.bf16 %v807_v32  ;;  %v1545_v44 = vld [vmem:[%s2870_s17 + $0x2] sm:$0x1]  ;;  %v1546_v45 = vld [vmem:[%s2870_s17 + $0x4] sm:$0x1]  ;;  %v1548_v51 = vld [vmem:[%s2863_s1 + $0x2] sm:$0x3] }
 0x1dc   : > { %v770_v46 = vadd.f32 %v768_v27, %v757_v33  ;;  %v771_v47 = vadd.f32 %v769_v28, %v758_v34  ;;  %v1536_v48 = vrot.slane %v781_v35, 9  ;;  %v1537_v49 = vrot.slane %v782_v36, 9  ;;  %v1544_v50 = vld [vmem:[#allocation10 + $0x6] ss:$0 sm:$0xff]  ;;  %v1547_v56 = vld [vmem:[#allocation10 + $0x7] ss:$0 sm:$0xff] }
 0x1dd   : > { %v815_v52 = vmul.f32 %v1539_v37, %v808_v42  ;;  %v816_v53 = vmul.f32 %v1539_v37, %v809_v43  ;;  %v830_v54 = vunpack.c.l.bf16 %v1542_v38  ;;  %v831_v55 = vunpack.c.l.bf16 %v1543_v39  ;;  %v1549_v57 = vld [vmem:[%s2863_s1 + $0x4] sm:$0x3]  ;;  %v1550_v7 = vld [vmem:[#allocation10 + $0x8] ss:$0 sm:$0xff]  ;;  %v1781_v37 = vld [vmem:[#allocation14 + $0x8] sm:$0xff]   ;;  %s1531_s14 = sshll.u32 %s2859_s29, 2 }
 0x1de   : > { %v791_v58 = vadd.f32 %v1536_v48, %v770_v46  ;;  %v792_v59 = vadd.f32 %v1537_v49, %v771_v47  ;;  %v844_v60 = vunpack.c.l.bf16 %v1545_v44  ;;  %v845_v61 = vunpack.c.l.bf16 %v1546_v45  ;;  %v1780_v35 = vld [vmem:[#allocation14] sm:$0xff]   ;;  %s1565_s21 = sshll.u32 %s2410_s19, 6  ;;  %s733_s24 = scalar_lea.vmem [#allocation25], %s1531_s14 }
 0x1df   : > { %v1540_v62 = vrot.slane %v815_v52, 9  ;;  %v1541_v63 = vrot.slane %v816_v53, 9  ;;  %v2308_v0 = vmov 1983009808   ;;  %v884_v2 = vlaneseq  ;;  %s1272_s0 = sshll.u32 %s733_s24, 4  ;;  %s3114_s20 = sld [smem:[#allocation54_spill]]  ;;  %s2962_s0 = int_to_ptr.vmem [resolvable:$true] %s1272_s0 }
 0x1e0   : > { %v882_v1 = vunpack.c.l.s4 %v2308_v0  ;;  %v804_v3 = vadd.f32 %v802_v40, %v791_v58  ;;  %v805_v4 = vadd.f32 %v803_v41, %v792_v59  ;;  %v837_v5 = vmul.f32 %v1544_v50, %v830_v54  ;;  %v1553_v54 = vld [vmem:[#allocation11] ss:$0 sm:$0xff]  ;;  %s1259_s4 = scalar_lea.sflag [#allocation4], %s2859_s29  ;;  %s2188_s23 = scalar_lea.vmem %s2962_s0, 64 }
 0x1e1   : > { %v838_v6 = vmul.f32 %v1544_v50, %v831_v55  ;;  %v857_v8 = vunpack.c.l.bf16 %v1548_v51  ;;  %v858_v9 = vunpack.c.l.bf16 %v1549_v57  ;;  %v851_v12 = vmul.f32 %v1547_v56, %v844_v60  ;;  %v1554_v55 = vld [vmem:[#allocation13] ss:$0 sm:$0xff]  ;;  %p2189_p4 = scmp.ne.s32.totalorder %s2962_s0, %s2188_s23  ;;  %p3115_p5 = scmp.ne.s32.totalorder %s3077_s18, 0 }
 0x1e2   : > { %v825_v10 = vadd.f32 %v1540_v62, %v804_v3  ;;  %v826_v11 = vadd.f32 %v1541_v63, %v805_v4  ;;  %v852_v13 = vmul.f32 %v1547_v56, %v845_v61  ;;  %v883_v18 = vunpack.c.0.s8 %v882_v1  ;;  %s2313_s19 = smov [#allocation25]  }
 0x1e3   : > { %v864_v14 = vmul.f32 %v1550_v7, %v857_v8  ;;  %v865_v15 = vmul.f32 %v1550_v7, %v858_v9  ;;  %v2922_v19 = vshrl.u32 %v884_v2, 7  ;;  %vm889_vm0 = vcmask 257024   ;;  %p2190_p0 = pnand %p2189_p4, %p3115_p5  ;;  %s2192_s9 = sshll.u32 %s2313_s19, 4  ;;  %s2193_s9 = int_to_ptr.vmem [resolvable:$false] %s2192_s9 }
 0x1e4   : > { %v839_v16 = vadd.f32 %v837_v5, %v825_v10  ;;  %v840_v17 = vadd.f32 %v838_v6, %v826_v11  ;;  %v2309_v36 = vmov 0.0   ;;  %vm2310_vm1 = vmmov 0   ;;  %s2194_s7 = scalar_lea.vmem %s2193_s9, 128  ;;  %p2195_p12 = scmp.lt.s32.totalorder %s2962_s0, %s2193_s9 }
 0x1e5   : > { %v1551_v20 = vrot.slane %v864_v14, 9  ;;  %v1552_v21 = vrot.slane %v865_v15, 9  ;;  %v2925_v26 = vsub.s32 %v883_v18, %v2922_v19  ;;  %1576 = vmatprep.subr.bf16.mxu0 %v2309_v36  ;;  %1580 = vmatprep.mubr.msk.bf16.mxu0 %vm2310_vm1, %v2309_v36  ;;  %v2311_v44 = vmov 269488144   ;;  %s2960_s26 = scalar_lea.hbm %s3114_s20, %s1565_s21  ;;  %p2191_p8 = pneg %p2190_p0 }
 0x1e6   : > { %v853_v22 = vadd.f32 %v851_v12, %v839_v16  ;;  %v854_v23 = vadd.f32 %v852_v13, %v840_v17  ;;  %1577 = vmatpush3.bf16.msra.mxu0 %v1780_v35  ;;  %1584 = vmatprep.subr.bf16.mxu1 %v2309_v36  ;;  %v917_v45 = vunpack.c.l.s4 %v2311_v44  ;;  %v2312_v46 = vmov 842150450   ;;  %v1783_v44 = vld [vmem:[#allocation20 + $0x8] sm:$0xff]   ;;  %p2196_p6 = scmp.lt.s32.totalorder %s2194_s7, %s2188_s23 }
 0x1e7   : > { %1578 = vmatprep.subr.bf16.mxu0 %v2309_v36  ;;  %1586 = vmatprep.mubr.msk.bf16.mxu1 %vm2310_vm1, %v2309_v36  ;;  %v924_v47 = vunpack.c.l.s4 %v2312_v46  ;;  %v966_v56 = vrot.slane %v1553_v54, %v2925_v26  ;;  %v983_v59 = vrot.slane %v1554_v55, %v2925_v26  ;;  %vm1037_vm2 = vcmask 261120  }
 0x1e8   : > { %v874_v24 = vadd.f32 %v1551_v20, %v853_v22  ;;  %v875_v25 = vadd.f32 %v1552_v21, %v854_v23  ;;  %v918_v50 = vunpack.c.0.s8 %v917_v45  ;;  %vm1089_vm3 = vcmask 1043456   ;;  %v1084_v45 = vld [vmem:[#allocation19] sm:$0x1]  ;;  %p2197_p1 = por %p2196_p6, %p2195_p12 }
 0x1e9   : > { %v925_v51 = vunpack.c.0.s8 %v924_v47  ;;  %v967_v61 = vcombine.high %v966_v56, %v966_v56  ;;  %v984_v2 = vcombine.high %v983_v59, %v983_v59  ;;  %vm1085_vm4 = vcmask 64512  }
 0x1ea   : > { %v880_v27 = vcombine.low %v874_v24, %v875_v25  ;;  %v895_v28 = vmul.f32 %v874_v24, %v874_v24  ;;  %v896_v29 = vmul.f32 %v875_v25, %v875_v25  ;;  %1579 = vmatpush3.bf16.msra.mxu0 %v1781_v37  ;;  %v921_v52 = vsub.s32 %v918_v50, %v2922_v19  ;;  %p2198_p2 = pnand %p2197_p1, %p2191_p8 }
 0x1eb   : > { %v928_v53 = vsub.s32 %v925_v51, %v2922_v19  ;;  %v1139_v54 = vsub.s32 0, %v2922_v19 }
 0x1ec   : > { %v887_v30 = vrot.slane %v880_v27, %v2925_v26  ;;  %v899_v31 = vcombine.low %v895_v28, %v896_v29 }
 0x1ee   : > { %v890_v32 = vsel %vm889_vm0, %v887_v30, 0.0  ;;  %v906_v33 = vrot.slane %v899_v31, %v2925_v26 }
 0x1ef   : > { %891 = vadd.xlane.f32.xlu0 %v890_v32  ;;  %v1083_v32 = vld [vmem:[#allocation17] sm:$0xf] }
 0x1f0   : > { %v908_v34 = vsel %vm889_vm0, %v906_v33, 0.0  ;;  %v1091_v33 = vsel %vm1089_vm3, %v1083_v32, 0 }
 0x1f1   : > { %1585 = vmatpush3.bf16.msra.mxu1 %v1091_v33 }
 0x1f2   : > { %1590 = vmatprep.subr.bf16.mxu1 %v2309_v36 }
 0x1f3   : > { %909 = vadd.xlane.f32.xlu0 %v908_v34  ;;  %v1024_v34 = vld [vmem:[#allocation16] sm:$0x1] }
 0x27c   : > { %v892_v38 = vpop.xlane.xlu0 %891 }
 0x27d   : > { %v894_v39 = vmul.f32 0.03125, %v892_v38 }
 0x27f   : > { %v912_v41 = vmul.f32 %v894_v39, %v894_v39  ;;  %v922_v57 = vrot.slane %v894_v39, %v921_v52  ;;  %v929_v58 = vrot.slane %v894_v39, %v928_v53 }
 0x280   : > { %v910_v40 = vpop.xlane.xlu0 %909 }
 0x281   : > { %v911_v42 = vmul.f32 0.03125, %v910_v40  ;;  %v932_v62 = vsub.f32 %v874_v24, %v922_v57  ;;  %v933_v63 = vsub.f32 %v875_v25, %v929_v58 }
 0x283   : > { %v913_v43 = vsub.f32 %v911_v42, %v912_v41 }
 0x285   : > { %v914_v48 = vmax.f32 %v913_v43, 0.0  ;;  %v1782_v43 = vld [vmem:[#allocation20] sm:$0xff]  }
 0x287   : > { %v934_v49 = vadd.f32 1e-05, %v914_v48 }
 0x289   : > { %1784 = vrsqrt.f32 %v934_v49 }
 0x293   : > { %v1785_v60 = vpop.eup %1784 }
 0x294   : > { %v943_v0 = vrot.slane %v1785_v60, %v921_v52  ;;  %v950_v1 = vrot.slane %v1785_v60, %v928_v53 }
 0x296   : > { %v953_v3 = vmul.f32 %v943_v0, %v932_v62  ;;  %v954_v4 = vmul.f32 %v950_v1, %v933_v63 }
 0x298   : > { %v970_v5 = vmul.f32 %v966_v56, %v953_v3  ;;  %v971_v6 = vmul.f32 %v967_v61, %v954_v4 }
 0x29a   : > { %v987_v7 = vadd.f32 %v983_v59, %v970_v5  ;;  %v988_v8 = vadd.f32 %v984_v2, %v971_v6 }
 0x29c   : > { %v989_v9 = vadd.f32 3.0, %v987_v7  ;;  %v990_v10 = vadd.f32 3.0, %v988_v8 }
 0x29e   : > { %v991_v11 = vmax.f32 %v989_v9, 0.0  ;;  %v992_v12 = vmax.f32 %v990_v10, 0.0 }
 0x2a0   : > { %v993_v13 = vmin.f32 %v991_v11, 6.0  ;;  %v994_v14 = vmin.f32 %v992_v12, 6.0 }
 0x2a2   : > { %v995_v15 = vmul.f32 %v993_v13, %v987_v7  ;;  %v996_v16 = vmul.f32 %v994_v14, %v988_v8  ;;  %v1562_v14 = vld [vmem:[#allocation22] ss:$0 sm:$0xff] }
 0x2a4   : > { %v997_v17 = vmul.f32 0.16666667, %v995_v15  ;;  %v998_v18 = vmul.f32 0.16666667, %v996_v16  ;;  %v1563_v16 = vld [vmem:[#allocation23] ss:$0 sm:$0xff] }
 0x2a6   : > { %v1001_v20 = vcombine.low %v997_v17, %v998_v18 }
 0x2a8   : > { %v1008_v21 = vrot.slane %v1001_v20, %v2925_v26 }
 0x2aa   : > { %v1010_v22 = vsel %vm889_vm0, %v1008_v21, 0.0 }
 0x2ab   : > { %v1011_v23 = vrot.slane %v1010_v22, 4 }
 0x2ad   : > { %v1012_v24 = vadd.f32 %v1011_v23, %v1010_v22 }
 0x2af   : > { %v1013_v25 = vrot.slane %v1012_v24, 2 }
 0x2b1   : > { %v1014_v27 = vadd.f32 %v1013_v25, %v1012_v24 }
 0x2b3   : > { %v1015_v28 = vrot.slane %v1014_v27, 1 }
 0x2b5   : > { %v1016_v29 = vadd.f32 %v1015_v28, %v1014_v27 }
 0x2b7   : > { %v1018_v30 = vmul.f32 0.25, %v1016_v29 }
 0x2b9   : > { %v1019_v31 = vpack.c.bf16 %v1018_v30, %v1018_v30 }
 0x2bb   : > { %1581 = vmatmul.mubr.msk.bf16.vlgmr.msra.gmra.mrb[0].mxu0 %vm1037_vm2, %v1019_v31 }
 0x38e   : > { %v1075_v35 = vpop.f32.mrb[0].mxu0 }
 0x38f   : > { %v1076_v37 = vadd.f32 %v1075_v35, %v1024_v34  ;;  %v1582_v38 = vpop.f32.mrb[1].mxu0 }
 0x390   : > { %v1078_v39 = vpop.f32.mrb[2].mxu0 }
 0x391   : > { %v1081_v40 = vmax.f32 %v1076_v37, 0.0  ;;  %v1583_v41 = vpop.f32.mrb[3].mxu0 }
 0x393   : > { %v1082_v42 = vpack.c.bf16 %v1081_v40, %v1081_v40 }
 0x395   : > { %1587 = vmatmul.mubr.msk.bf16.vlgmr.msra.gmra.mrb[0].mxu1 %vm1085_vm4, %v1082_v42 }
 0x396   : > { %1594 = vmatprep.mubr.msk.bf16.mxu1 %vm2310_vm1, %v2309_v36  ;;  %1591 = vmatpush3.bf16.msra.mxu1 %v1782_v43 }
 0x397   : > { %1592 = vmatprep.subr.bf16.mxu1 %v2309_v36 }
 0x39a   : > { %1593 = vmatpush3.bf16.msra.mxu1 %v1783_v44 }
 0x468   : > { %v1127_v46 = vpop.f32.mrb[0].mxu1 }
 0x469   : > { %v1128_v47 = vadd.f32 %v1127_v46, %v1084_v45  ;;  %v1588_v48 = vpop.f32.mrb[1].mxu1 }
 0x46a   : > { %v1130_v49 = vpop.f32.mrb[2].mxu1 }
 0x46b   : > { %v1133_v50 = vadd.f32 3.0, %v1128_v47  ;;  %v1589_v51 = vpop.f32.mrb[3].mxu1 }
 0x46d   : > { %v1134_v52 = vmax.f32 %v1133_v50, 0.0 }
 0x46f   : > { %v1135_v53 = vmin.f32 %v1134_v52, 6.0 }
 0x471   : > { %v1136_v55 = vmul.f32 0.16666667, %v1135_v53 }
 0x473   : > { %v1140_v56 = vrot.slane %v1136_v55, %v1139_v54 }
 0x475   : > { %v1148_v57 = vrot.slane %v1140_v56, %v2925_v26 }
 0x477   : > { %v1149_v58 = vcombine.high %v1148_v57, %v1148_v57  ;;  %v1152_v59 = vmul.f32 %v1148_v57, %v997_v17 }
 0x479   : > { %v1153_v36 = vmul.f32 %v1149_v58, %v998_v18 }
 0x47b   : > { %v1156_v60 = vcombine.low %v1152_v59, %v1153_v36 }
 0x47d   : > { %v1163_v61 = vrot.slane %v1156_v60, %v2925_v26 }
 0x47f   : > { %v1165_v62 = vpack.c.bf16 %v1163_v61, %v1163_v61 }
 0x481   : > { %1595 = vmatmul.mubr.msk.bf16.vlgmr.msra.gmra.mrb[4].mxu1 %vm1037_vm2, %v1165_v62 }
 0x554   : > { %v1219_v63 = vpop.f32.mrb[4].mxu1 }
 0x555   : > { %v1596_v0 = vpop.f32.mrb[5].mxu1  ;;  %v1227_v1 = vsel %vm889_vm0, %v1219_v63, 0.0  ;;  %v1231_v2 = vmul.f32 %v1219_v63, %v1219_v63 }
 0x556   : > { %1228 = vadd.xlane.f32.xlu1 %v1227_v1  ;;  %v1222_v19 = vpop.f32.mrb[6].mxu1 }
 0x557   : > { %v1597_v3 = vpop.f32.mrb[7].mxu1  ;;  %v1232_v4 = vsel %vm889_vm0, %v1231_v2, 0.0 }
 0x55a   : > { %1233 = vadd.xlane.f32.xlu1 %v1232_v4 }
 0x5e3   : > { %v1229_v5 = vpop.xlane.xlu1 %1228 }
 0x5e4   : > { %v1230_v6 = vmul.f32 0.03125, %v1229_v5 }
 0x5e6   : > { %v1236_v26 = vmul.f32 %v1230_v6, %v1230_v6  ;;  %v1239_v12 = vsub.f32 %v1219_v63, %v1230_v6 }
 0x5e7   : > { %v1234_v7 = vpop.xlane.xlu1 %1233 }
 0x5e8   : > { %v1235_v8 = vmul.f32 0.03125, %v1234_v7 }
 0x5ea   : > { %v1237_v9 = vsub.f32 %v1235_v8, %v1236_v26 }
 0x5ec   : > { %v1238_v10 = vmax.f32 %v1237_v9, 0.0 }
 0x5ee   : > { %v1240_v11 = vadd.f32 1e-05, %v1238_v10 }
 0x5f0   : > { %1786 = vrsqrt.f32 %v1240_v11 }
 0x5fa   : > { %v1787_v13 = vpop.eup %1786 }
 0x5fb   : > { %v1242_v15 = vmul.f32 %v1787_v13, %v1239_v12 }
 0x5fd   : > { %v1249_v17 = vmul.f32 %v1562_v14, %v1242_v15 }
 0x5ff   : > { %v1256_v18 = vadd.f32 %v1563_v16, %v1249_v17 }
 0x601   : > { %1257 = vst.msk [vmem:[%s733_s24] sm:$0xf] %vm889_vm0, %v1256_v18 }
 0x602   : > { %2201 = shalt.err (!%p2198_p2)
}
 0x603   : > { %s2202_s29 = scalar_lea.hbm %s2960_s26, 64  ;;  %s2206_s1 = scalar_lea.hbm %s3114_s20, 128 }
 0x604   : > { %p2203_p11 = scmp.ne.s32.totalorder %s2960_s26, %s2202_s29  ;;  %p2207_p3 = scmp.lt.u32.totalorder %s2960_s26, %s3114_s20 }
 0x605   : > { %p2208_p7 = scmp.lt.u32.totalorder %s2206_s1, %s2202_s29  ;;  %p2210_p4 = scmp.lt.u32.totalorder %s2202_s29, %s2960_s26 }
 0x606   : > { %p2204_p13 = pnand %p2203_p11, %p3115_p5 }
 0x607   : > { %p2209_p9 = por %p2208_p7, %p2207_p3 }
 0x608   : > { %p2205_p10 = pneg %p2204_p13 }
 0x609   : > { %p2211_p0 = por %p2210_p4, %p2209_p9 }
 0x60b   : > { %p2212_p8 = pnand %p2211_p0, %p2205_p10 }
 0x60d   : > { %2215 = shalt.err (!%p2212_p8)
}
 0x60e   : > { %1655 = dma.vmem_to_hbm [thread:$0]  (%p3115_p5), %s2962_s0, 64, %s2960_s26, %s1259_s4  }
 0x60f PF: > { %s3116_s17 = sld [smem:[#allocation36_spill]]  ;;  %s3117_s8 = sld [smem:[#allocation40_spill]] }
 0x610   : > { %p3119_p6 = scmp.ge.s32.totalorder %s2286_s16, 2 }
 0x615   : > { %s1284_s25 = sand.u32 1, %s3116_s17   ;;  %p3118_p12 = scmp.ne.s32.totalorder %s3117_s8, 0 }
 0x616   : > { %s1285_s22 = scalar_lea.sflag [#allocation4], %s1284_s25 }
 0x617   : > { %p1702_p1 = pnand %p3119_p6, %p3118_p12 }
 0x619   : > { %2269 = dma.done.wait (!%p1702_p1), %s1285_s22, 64  }
 0x61a   : > { %2271 = vsyncadd (!%p1702_p1), %s1285_s22, 4294967232  ;;  %s3120_s16 = sld [smem:[#allocation38_spill]]  ;;  %s3121_s14 = sld [smem:[#allocation39_spill]] }
 0x61b   : > { %s3122_s29 = smov %s2278_s30  ;;  %s3123_s30 = smov %s2282_s15 }
 0x620   : > { %p38_p2 = scmp.ge.s32.totalorder %s3120_s16, 4   ;;  %s3124_s15 = smov %s3121_s14 }
 0x622   :  { %40 = sbr.rel (!%p38_p2) target bundleno = 29 (0x1d), region = 200 }
 0x629   :  { %1290 = vsyncpa [#allocation3], 1 }
 0x62a   :  { %1292 = vsyncpa [#allocation3 + $0x1], 1 }
 0x62b   :  { %1293 = vsyncpa [#allocation6], 1 }
 0x62c   :  { %1295 = vsyncpa [#allocation6 + $0x1], 1 }
 0x62d   :  { %1296 = vsyncpa [#allocation9], 1 }
 0x62e   :  { %1298 = vsyncpa [#allocation9 + $0x1], 1 }
 0x62f   :  { %1299 = vsyncpa [#allocation12], 1 }
 0x630   :  { %1300 = vsyncpa [#allocation15], 1 }
 0x631   :  { %1301 = vsyncpa [#allocation18], 1 }
 0x632   :  { %1302 = vsyncpa [#allocation21], 1 }
 0x633   :  { %1303 = vsyncpa [#allocation24], 1 }
 0x634   :  { %1304 = vsyncpa [#allocation4], 1 }
 0x635   :  { %1306 = vsyncpa [#allocation4 + $0x1], 1 }

</bundles_post_ra>
